<compile_context>
chip_gen: v7x
topology: tpu7x:2x2x1
jax: 0.10.0
libtpu: 0.0.40
codegen_flags: <defaults>
</compile_context>

<pallas_src>
import functools

import numpy as np
import jax
import jax.numpy as jnp
from jax import lax
from jax.experimental import pallas as pl
from jax.experimental.pallas import tpu as pltpu


# ----------------------------------------------------------------------------
# helpers
# ----------------------------------------------------------------------------
def _full_spec(shape):
    nd = len(shape)
    return pl.BlockSpec(tuple(shape), lambda i, _nd=nd: (0,) * _nd)


def _leaky(x):
    return jnp.where(x >= 0, x, 0.2 * x)


# 3x3 tap offsets, row-major: tap index t = (oy+1)*3 + (ox+1); t == 4 is centre
_TAPS = tuple((oy, ox) for oy in (-1, 0, 1) for ox in (-1, 0, 1))


# ----------------------------------------------------------------------------
# fused G_Block kernel (activations live as (C, B*H*W) f32 in VMEM throughout)
# ----------------------------------------------------------------------------
def make_gblock_kernel(B, H, W, Cin, Cout, conv_dtype=jnp.bfloat16):
    HW = H * W
    N = B * HW
    C1, C2 = Cin, Cout

    def kernel(yT_ref, h_in_ref, U_ref, E_ref, tapm_ref,
               a1w1_ref, a1b1_ref, a1w2_ref, a1b2_ref, c1w_ref, c1p_ref,
               a2w1_ref, a2b1_ref, a2w2_ref, a2b2_ref, c2w_ref, c2p_ref,
               scw_ref, scb_ref, o_ref):
        yT = yT_ref[...]                       # (cond, B)
        E = E_ref[...]                         # (B, N)   batch-segment indicator
        masks = tapm_ref[...]                  # (9, N)   f32 tap-validity masks
        U = U_ref[...]                         # (HW0, HW) nearest-upsample 0/1

        # ---- nearest upsample + (B,Cin,HW0) -> (Cin, B*HW) relayout ----------
        # one tiny 0/1-matrix matmul per batch; kept f32 so the shortcut path
        # sees the input values exactly.
        h0 = jnp.concatenate(
            [jnp.dot(h_in_ref[b], U, preferred_element_type=jnp.float32)
             for b in range(B)], axis=1)       # (Cin, N)

        def affine_maps(w1, b1, w2, b2):
            # four Affine heads batched: rows = [gamma0 | beta0 | gamma1 | beta1]
            t = jnp.maximum(
                jnp.dot(w1, yT, preferred_element_type=jnp.float32) + b1, 0.0)
            aff = jnp.dot(w2, t, preferred_element_type=jnp.float32) + b2  # (4C,B)
            return jnp.dot(aff, E, preferred_element_type=jnp.float32)     # (4C,N)

        def dfblk(x, am, C):
            h = _leaky(am[0:C] * x + am[C:2 * C])
            return _leaky(am[2 * C:3 * C] * h + am[3 * C:4 * C])

        def conv_block(x, w_ref, p_ref, Ci, Co):
            wq = w_ref[...]                    # (9, Co, Ci)  conv_dtype (bf16)
            p = p_ref[...]                     # (9, Co, 1)   f32 per-channel params

            # -- 3x3 conv (pad=1, no bias): per-tap MXU accumulation -----------
            # bounds tap live-ranges (only one shifted tap alive at a time);
            # especially cheap on v7x where the MRB accumulates in place.
            conv = jnp.dot(wq[4], x.astype(conv_dtype),
                           preferred_element_type=jnp.float32)   # centre tap
            for t, (oy, ox) in enumerate(_TAPS):
                if oy == 0 and ox == 0:
                    continue
                shifted = pltpu.roll(x, (-(oy * W + ox)) % N, axis=1)
                tap = (shifted * masks[t:t + 1]).astype(conv_dtype)
                conv = conv + jnp.dot(wq[t], tap,
                                      preferred_element_type=jnp.float32)

            # -- BatchNorm2d (training-mode biased batch stats), one pass ------
            s = jnp.sum(conv, axis=1, keepdims=True)
            ss = jnp.sum(conv * conv, axis=1, keepdims=True)
            mu = s * (1.0 / N)
            var = jnp.maximum(ss * (1.0 / N) - mu * mu, 0.0)
            h = (conv - mu) * lax.rsqrt(var + 1e-5) * p[0] + p[1]

            # -- LeakyReLU(0.2) -------------------------------------------------
            h = _leaky(h)

            # -- ShuffleAttention (per-channel; trailing channel shuffle folded
            #    into the weight/param ordering at init) ------------------------
            # fused per-(batch,channel) stats: one dot of [h; h*h] against E,
            # contracting the lane axis of both (no ET materialization).
            hh = jnp.concatenate([h, h * h], axis=0)                 # (2Co, N)
            st = lax.dot_general(hh, E, (((1,), (1,)), ((), ())),
                                 preferred_element_type=jnp.float32)  # (2Co, B)
            m = st[:Co] * (1.0 / HW)
            v = jnp.maximum(st[Co:] * (1.0 / HW) - m * m, 0.0)
            maps = jnp.dot(jnp.concatenate([m, v], axis=0), E,
                           preferred_element_type=jnp.float32)        # (2Co, N)
            m_map, v_map = maps[:Co], maps[Co:]

            gate_c = jax.nn.sigmoid(p[2] * m_map + p[3])              # chan branch
            gn = (h - m_map) * lax.rsqrt(v_map + 1e-5) * p[6] + p[7]  # per-ch GN
            gate_s = jax.nn.sigmoid(p[4] * gn + p[5])                 # spat branch
            blend = p[8]
            return blend * (h * gate_c) + (1.0 - blend) * (h * gate_s)

        # ---- residual branch: fuse1 -> c1 -> fuse2 -> c2 ----------------------
        r = dfblk(h0, affine_maps(a1w1_ref[...], a1b1_ref[...],
                                  a1w2_ref[...], a1b2_ref[...]), C1)
        r = conv_block(r, c1w_ref, c1p_ref, C1, C2)
        r = dfblk(r, affine_maps(a2w1_ref[...], a2b1_ref[...],
                                 a2w2_ref[...], a2b2_ref[...]), C2)
        r = conv_block(r, c2w_ref, c2p_ref, C2, C2)

        # ---- learnable 1x1 shortcut + residual add ----------------------------
        sc = (jnp.dot(scw_ref[...], h0, preferred_element_type=jnp.float32)
              + scb_ref[...])
        out = sc + r                                            # (Cout, N)

        # store per batch: (Cout, HW) lane-dense slabs -> output is already NCHW
        # modulo a free reshape in the wrapper.
        for b in range(B):
            o_ref[b] = out[:, b * HW:(b + 1) * HW]

    return kernel


# ----------------------------------------------------------------------------
# wrapper (free reshapes + trace-time constants only; no HBM relayouts)
# ----------------------------------------------------------------------------
def g_block_forward(h_nchw, y, params, imsize, conv_dtype=jnp.bfloat16):
    B, Cin, H0, W0 = h_nchw.shape
    Cout = params['c_sc']['w'].shape[0]
    S = imsize
    HW = S * S
    HW0 = H0 * W0
    N = B * HW

    # zero-copy relayouts only
    h_in = h_nchw.reshape(B, Cin, HW0).astype(jnp.float32)       # (B, Cin, HW0)
    yT = jnp.transpose(y).astype(jnp.float32)                    # (cond, B), tiny

    # ---- trace-time constants (numpy -> folded into the program) ------------
    # nearest-neighbour upsample matrix: out[c, q] = in[c, src[q]]
    ri = (np.arange(S) * H0) // S
    ci = (np.arange(S) * W0) // S
    src = (ri[:, None] * W0 + ci[None, :]).reshape(HW)
    U = jnp.asarray((np.arange(HW0)[:, None] == src[None, :]).astype(np.float32))

    # batch-segment indicator and per-tap validity masks (implement zero padding)
    lane = np.arange(N)
    hw = lane % HW
    hp = hw // S
    wp = hw % S
    E = jnp.asarray(
        (np.arange(B)[:, None] == (lane // HW)[None, :]).astype(np.float32))
    tapm = jnp.asarray(np.stack(
        [((hp + oy >= 0) & (hp + oy < S) & (wp + ox >= 0) & (wp + ox < S)
          ).astype(np.float32) for (oy, ox) in _TAPS], axis=0))   # (9, N)

    kernel = make_gblock_kernel(B, S, S, Cin, Cout, conv_dtype=conv_dtype)

    args = (yT, h_in, U, E, tapm,
            params['fuse1']['w1'], params['fuse1']['b1'],
            params['fuse1']['w2'], params['fuse1']['b2'],
            params['c1']['w'].astype(conv_dtype), params['c1']['p'],
            params['fuse2']['w1'], params['fuse2']['b1'],
            params['fuse2']['w2'], params['fuse2']['b2'],
            params['c2']['w'].astype(conv_dtype), params['c2']['p'],
            params['c_sc']['w'], params['c_sc']['b'])

    out = pl.pallas_call(
        kernel,
        grid=(1,),
        in_specs=[_full_spec(a.shape) for a in args],
        out_specs=_full_spec((B, Cout, HW)),
        out_shape=jax.ShapeDtypeStruct((B, Cout, HW), jnp.float32),
        compiler_params=pltpu.CompilerParams(
            dimension_semantics=("arbitrary",),
            vmem_limit_bytes=32 * 1024 * 1024),
    )(*args)

    # (B, Cout, HW) -> NCHW is a free reshape
    return out.reshape(B, Cout, S, S)


# ----------------------------------------------------------------------------
# deterministic parameter construction (shapes follow the PyTorch __init__;
# stored pre-transformed into the layouts the fused kernel consumes)
# ----------------------------------------------------------------------------
def init_params(key, cond_dim, in_ch, out_ch, G=8):
    keys = iter(jax.random.split(key, 64))

    def nrm(shape, scale=0.1):
        return scale * jax.random.normal(next(keys), shape, jnp.float32)

    def shuffle_perm(C, groups=2):
        # channel_shuffle(x, groups): output channel k reads input channel
        #   (k % groups) * (C // groups) + k // groups
        k = jnp.arange(C)
        return (k % groups) * (C // groups) + k // groups

    def dfblk_p(C):
        # Affine heads [gamma0, beta0, gamma1, beta1] batched into one MLP:
        #   aff = W2_blockdiag @ relu(W1 @ y^T + b1) + b2   -> (4C, B)
        # (dense (4C,4C) kept on purpose: cheaper than 4 separate dots at small C)
        w1 = nrm((4 * C, cond_dim))
        b1 = nrm((4 * C, 1))
        w2 = jnp.zeros((4 * C, 4 * C), jnp.float32)
        for i in range(4):      # block diagonal: the four heads stay independent
            w2 = w2.at[i * C:(i + 1) * C, i * C:(i + 1) * C].set(nrm((C, C)))
        # PyTorch init: gamma bias ~ 1, beta bias ~ 0 (noise keeps the path live)
        base = jnp.concatenate([jnp.ones((C, 1)), jnp.zeros((C, 1)),
                                jnp.ones((C, 1)), jnp.zeros((C, 1))], axis=0)
        b2 = base.astype(jnp.float32) + nrm((4 * C, 1))
        return {'w1': w1, 'b1': b1, 'w2': w2, 'b2': b2}

    def conv_p(ci, co):
        assert co % (2 * G) == 0
        half = co // (2 * G)
        r = jnp.arange(co) % (co // G)
        is_ch = r < half            # first half of each group: channel branch
        idx = jnp.where(is_ch, r, r - half)

        def expand(v):              # (half,) -> per-channel (co,)
            return v[idx]

        bn_g = 1.0 + nrm((co,))
        bn_b = nrm((co,))
        cw = expand(nrm((half,)));        cb = expand(1.0 + nrm((half,)))
        sw = expand(nrm((half,)));        sb = expand(1.0 + nrm((half,)))
        gnw = expand(1.0 + nrm((half,))); gnb = expand(nrm((half,)))
        mask = is_ch.astype(jnp.float32)

        # conv weight in tap-major layout for the per-tap matmul accumulation:
        #   w[t, o, c] == torch_w[o, c, t // 3, t % 3]
        w = nrm((9, co, ci))

        # Fold ShuffleAttention's trailing channel_shuffle(groups=2) into the
        # OUTPUT channel ordering of this block (static permutation, free).
        sig = shuffle_perm(co, 2)
        p = jnp.stack([bn_g, bn_b, cw, cb, sw, sb, gnw, gnb, mask], axis=0)
        return {'w': w[:, sig, :],              # (9, co, ci)
                'p': p[:, sig][:, :, None]}     # (9, co, 1), one packed DMA

    return {'fuse1': dfblk_p(in_ch),
            'fuse2': dfblk_p(out_ch),
            'c1': conv_p(in_ch, out_ch),
            'c2': conv_p(out_ch, out_ch),
            'c_sc': {'w': nrm((out_ch, in_ch)), 'b': nrm((out_ch, 1))}}


# ----------------------------------------------------------------------------
if __name__ == "__main__":
    B, in_ch, out_ch, cond_dim, imsize = 2, 8, 16, 32, 16
    key = jax.random.PRNGKey(0)
    k1, k2, k3 = jax.random.split(key, 3)

    h = jax.random.normal(k1, (B, in_ch, 8, 8), jnp.float32)   # NCHW, like PyTorch
    y = jax.random.normal(k2, (B, cond_dim), jnp.float32)
    params = init_params(k3, cond_dim, in_ch, out_ch)

    # bf16 is the native MXU path on v5e/v6e/v7x (f32 accumulation, f32 stats);
    # pass conv_dtype=jnp.float32 for full-f32 semantics.
    fwd = jax.jit(functools.partial(g_block_forward, imsize=imsize,
                                    conv_dtype=jnp.bfloat16))
    out = fwd(h, y, params)
    jax.block_until_ready(out)

    assert out.shape == (B, out_ch, imsize, imsize), out.shape
    assert bool(jnp.all(jnp.isfinite(out)))
    print("KERNEL_OK")
</pallas_src>

<mosaic_0001>
module attributes {stable_mosaic.version = 11 : i64} {
  func.func @kernel(%arg0: i32, %arg1: memref<32x2xf32, #tpu.memory_space<vmem>>, %arg2: memref<2x8x64xf32, #tpu.memory_space<vmem>>, %arg3: memref<64x256xf32, #tpu.memory_space<vmem>>, %arg4: memref<2x512xf32, #tpu.memory_space<vmem>>, %arg5: memref<9x512xf32, #tpu.memory_space<vmem>>, %arg6: memref<32x32xf32, #tpu.memory_space<vmem>>, %arg7: memref<32x1xf32, #tpu.memory_space<vmem>>, %arg8: memref<32x32xf32, #tpu.memory_space<vmem>>, %arg9: memref<32x1xf32, #tpu.memory_space<vmem>>, %arg10: memref<9x16x8xbf16, #tpu.memory_space<vmem>>, %arg11: memref<9x16x1xf32, #tpu.memory_space<vmem>>, %arg12: memref<64x32xf32, #tpu.memory_space<vmem>>, %arg13: memref<64x1xf32, #tpu.memory_space<vmem>>, %arg14: memref<64x64xf32, #tpu.memory_space<vmem>>, %arg15: memref<64x1xf32, #tpu.memory_space<vmem>>, %arg16: memref<9x16x16xbf16, #tpu.memory_space<vmem>>, %arg17: memref<9x16x1xf32, #tpu.memory_space<vmem>>, %arg18: memref<16x8xf32, #tpu.memory_space<vmem>>, %arg19: memref<16x1xf32, #tpu.memory_space<vmem>>, %arg20: memref<2x16x256xf32, #tpu.memory_space<vmem>>) attributes {dimension_semantics = [#tpu.dimension_semantics<arbitrary>], iteration_bounds = array<i64: 1>, scalar_prefetch = 0 : i64, scratch_operands = 0 : i64, tpu.core_type = #tpu.core_type<tc>, window_params = [{pipeline_mode = #tpu.pipeline_mode<synchronous>, transform_indices = @transform_0, window_bounds = array<i64: 32, 2>}, {pipeline_mode = #tpu.pipeline_mode<synchronous>, transform_indices = @transform_1, window_bounds = array<i64: 2, 8, 64>}, {pipeline_mode = #tpu.pipeline_mode<synchronous>, transform_indices = @transform_2, window_bounds = array<i64: 64, 256>}, {pipeline_mode = #tpu.pipeline_mode<synchronous>, transform_indices = @transform_3, window_bounds = array<i64: 2, 512>}, {pipeline_mode = #tpu.pipeline_mode<synchronous>, transform_indices = @transform_4, window_bounds = array<i64: 9, 512>}, {pipeline_mode = #tpu.pipeline_mode<synchronous>, transform_indices = @transform_5, window_bounds = array<i64: 32, 32>}, {pipeline_mode = #tpu.pipeline_mode<synchronous>, transform_indices = @transform_6, window_bounds = array<i64: 32, 1>}, {pipeline_mode = #tpu.pipeline_mode<synchronous>, transform_indices = @transform_7, window_bounds = array<i64: 32, 32>}, {pipeline_mode = #tpu.pipeline_mode<synchronous>, transform_indices = @transform_8, window_bounds = array<i64: 32, 1>}, {pipeline_mode = #tpu.pipeline_mode<synchronous>, transform_indices = @transform_9, window_bounds = array<i64: 9, 16, 8>}, {pipeline_mode = #tpu.pipeline_mode<synchronous>, transform_indices = @transform_10, window_bounds = array<i64: 9, 16, 1>}, {pipeline_mode = #tpu.pipeline_mode<synchronous>, transform_indices = @transform_11, window_bounds = array<i64: 64, 32>}, {pipeline_mode = #tpu.pipeline_mode<synchronous>, transform_indices = @transform_12, window_bounds = array<i64: 64, 1>}, {pipeline_mode = #tpu.pipeline_mode<synchronous>, transform_indices = @transform_13, window_bounds = array<i64: 64, 64>}, {pipeline_mode = #tpu.pipeline_mode<synchronous>, transform_indices = @transform_14, window_bounds = array<i64: 64, 1>}, {pipeline_mode = #tpu.pipeline_mode<synchronous>, transform_indices = @transform_15, window_bounds = array<i64: 9, 16, 16>}, {pipeline_mode = #tpu.pipeline_mode<synchronous>, transform_indices = @transform_16, window_bounds = array<i64: 9, 16, 1>}, {pipeline_mode = #tpu.pipeline_mode<synchronous>, transform_indices = @transform_17, window_bounds = array<i64: 16, 8>}, {pipeline_mode = #tpu.pipeline_mode<synchronous>, transform_indices = @transform_18, window_bounds = array<i64: 16, 1>}, {pipeline_mode = #tpu.pipeline_mode<synchronous>, transform_indices = @transform_19, window_bounds = array<i64: 2, 16, 256>}]} {
    %c0 = arith.constant 0 : index
    %c0_0 = arith.constant 0 : index
    %0 = vector.load %arg1[%c0, %c0_0] : memref<32x2xf32, #tpu.memory_space<vmem>>, vector<32x2xf32>
    %c0_1 = arith.constant 0 : index
    %c0_2 = arith.constant 0 : index
    %1 = vector.load %arg4[%c0_1, %c0_2] : memref<2x512xf32, #tpu.memory_space<vmem>>, vector<2x512xf32>
    %c0_3 = arith.constant 0 : index
    %c0_4 = arith.constant 0 : index
    %2 = vector.load %arg5[%c0_3, %c0_4] : memref<9x512xf32, #tpu.memory_space<vmem>>, vector<9x512xf32>
    %c0_5 = arith.constant 0 : index
    %c0_6 = arith.constant 0 : index
    %3 = vector.load %arg3[%c0_5, %c0_6] : memref<64x256xf32, #tpu.memory_space<vmem>>, vector<64x256xf32>
    %c0_7 = arith.constant 0 : index
    %c0_8 = arith.constant 0 : index
    %c0_9 = arith.constant 0 : index
    %4 = vector.load %arg2[%c0_7, %c0_8, %c0_9] : memref<2x8x64xf32, #tpu.memory_space<vmem>>, vector<1x8x64xf32>
    %5 = vector.shape_cast %4 : vector<1x8x64xf32> to vector<8x64xf32>
    %cst = arith.constant dense<0.000000e+00> : vector<8x256xf32>
    %6 = tpu.matmul %5, %3, %cst {dimension_numbers = #tpu.dot_dimension_numbers<[1], [0], [0], [1], [0, 0, 1, 1], [], []>} : vector<8x64xf32>, vector<64x256xf32>, vector<8x256xf32> -> vector<8x256xf32>
    %c1 = arith.constant 1 : index
    %c0_10 = arith.constant 0 : index
    %c0_11 = arith.constant 0 : index
    %7 = vector.load %arg2[%c1, %c0_10, %c0_11] : memref<2x8x64xf32, #tpu.memory_space<vmem>>, vector<1x8x64xf32>
    %8 = vector.shape_cast %7 : vector<1x8x64xf32> to vector<8x64xf32>
    %cst_12 = arith.constant dense<0.000000e+00> : vector<8x256xf32>
    %9 = tpu.matmul %8, %3, %cst_12 {dimension_numbers = #tpu.dot_dimension_numbers<[1], [0], [0], [1], [0, 0, 1, 1], [], []>} : vector<8x64xf32>, vector<64x256xf32>, vector<8x256xf32> -> vector<8x256xf32>
    %10 = tpu.concatenate %6, %9 in 1 : vector<8x256xf32>, vector<8x256xf32> -> vector<8x512xf32>
    %c0_13 = arith.constant 0 : index
    %c0_14 = arith.constant 0 : index
    %11 = vector.load %arg6[%c0_13, %c0_14] : memref<32x32xf32, #tpu.memory_space<vmem>>, vector<32x32xf32>
    %c0_15 = arith.constant 0 : index
    %c0_16 = arith.constant 0 : index
    %12 = vector.load %arg7[%c0_15, %c0_16] : memref<32x1xf32, #tpu.memory_space<vmem>>, vector<32x1xf32>
    %c0_17 = arith.constant 0 : index
    %c0_18 = arith.constant 0 : index
    %13 = vector.load %arg8[%c0_17, %c0_18] : memref<32x32xf32, #tpu.memory_space<vmem>>, vector<32x32xf32>
    %c0_19 = arith.constant 0 : index
    %c0_20 = arith.constant 0 : index
    %14 = vector.load %arg9[%c0_19, %c0_20] : memref<32x1xf32, #tpu.memory_space<vmem>>, vector<32x1xf32>
    %cst_21 = arith.constant dense<0.000000e+00> : vector<32x2xf32>
    %15 = tpu.matmul %11, %0, %cst_21 {dimension_numbers = #tpu.dot_dimension_numbers<[1], [0], [0], [1], [0, 0, 1, 1], [], []>} : vector<32x32xf32>, vector<32x2xf32>, vector<32x2xf32> -> vector<32x2xf32>
    %16 = vector.broadcast %12 : vector<32x1xf32> to vector<32x2xf32>
    %17 = arith.addf %15, %16 : vector<32x2xf32>
    %cst_22 = arith.constant 0.000000e+00 : f32
    %18 = vector.broadcast %cst_22 : f32 to vector<32x2xf32>
    %19 = arith.maximumf %17, %18 : vector<32x2xf32>
    %cst_23 = arith.constant dense<0.000000e+00> : vector<32x2xf32>
    %20 = tpu.matmul %13, %19, %cst_23 {dimension_numbers = #tpu.dot_dimension_numbers<[1], [0], [0], [1], [0, 0, 1, 1], [], []>} : vector<32x32xf32>, vector<32x2xf32>, vector<32x2xf32> -> vector<32x2xf32>
    %21 = vector.broadcast %14 : vector<32x1xf32> to vector<32x2xf32>
    %22 = arith.addf %20, %21 : vector<32x2xf32>
    %cst_24 = arith.constant dense<0.000000e+00> : vector<32x512xf32>
    %23 = tpu.matmul %22, %1, %cst_24 {dimension_numbers = #tpu.dot_dimension_numbers<[1], [0], [0], [1], [0, 0, 1, 1], [], []>} : vector<32x2xf32>, vector<2x512xf32>, vector<32x512xf32> -> vector<32x512xf32>
    %24 = vector.extract_strided_slice %23 {offsets = [0, 0], sizes = [8, 512], strides = [1, 1]} : vector<32x512xf32> to vector<8x512xf32>
    %25 = arith.mulf %24, %10 : vector<8x512xf32>
    %26 = vector.extract_strided_slice %23 {offsets = [8, 0], sizes = [8, 512], strides = [1, 1]} : vector<32x512xf32> to vector<8x512xf32>
    %27 = arith.addf %25, %26 : vector<8x512xf32>
    %cst_25 = arith.constant 0.000000e+00 : f32
    %28 = vector.broadcast %cst_25 : f32 to vector<8x512xf32>
    %29 = arith.cmpf oge, %27, %28 : vector<8x512xf32>
    %cst_26 = arith.constant 2.000000e-01 : f32
    %30 = vector.broadcast %cst_26 : f32 to vector<8x512xf32>
    %31 = arith.mulf %30, %27 : vector<8x512xf32>
    %32 = arith.select %29, %27, %31 : vector<8x512xi1>, vector<8x512xf32>
    %33 = vector.extract_strided_slice %23 {offsets = [16, 0], sizes = [8, 512], strides = [1, 1]} : vector<32x512xf32> to vector<8x512xf32>
    %34 = arith.mulf %33, %32 : vector<8x512xf32>
    %35 = vector.extract_strided_slice %23 {offsets = [24, 0], sizes = [8, 512], strides = [1, 1]} : vector<32x512xf32> to vector<8x512xf32>
    %36 = arith.addf %34, %35 : vector<8x512xf32>
    %cst_27 = arith.constant 0.000000e+00 : f32
    %37 = vector.broadcast %cst_27 : f32 to vector<8x512xf32>
    %38 = arith.cmpf oge, %36, %37 : vector<8x512xf32>
    %cst_28 = arith.constant 2.000000e-01 : f32
    %39 = vector.broadcast %cst_28 : f32 to vector<8x512xf32>
    %40 = arith.mulf %39, %36 : vector<8x512xf32>
    %41 = arith.select %38, %36, %40 : vector<8x512xi1>, vector<8x512xf32>
    %c0_29 = arith.constant 0 : index
    %c0_30 = arith.constant 0 : index
    %c0_31 = arith.constant 0 : index
    %42 = vector.load %arg10[%c0_29, %c0_30, %c0_31] : memref<9x16x8xbf16, #tpu.memory_space<vmem>>, vector<9x16x8xbf16>
    %c0_32 = arith.constant 0 : index
    %c0_33 = arith.constant 0 : index
    %c0_34 = arith.constant 0 : index
    %43 = vector.load %arg11[%c0_32, %c0_33, %c0_34] : memref<9x16x1xf32, #tpu.memory_space<vmem>>, vector<9x16x1xf32>
    %44 = vector.extract_strided_slice %42 {offsets = [4, 0, 0], sizes = [1, 16, 8], strides = [1, 1, 1]} : vector<9x16x8xbf16> to vector<1x16x8xbf16>
    %45 = vector.shape_cast %44 : vector<1x16x8xbf16> to vector<16x8xbf16>
    %46 = arith.truncf %41 : vector<8x512xf32> to vector<8x512xbf16>
    %cst_35 = arith.constant dense<0.000000e+00> : vector<16x512xf32>
    %47 = tpu.matmul %45, %46, %cst_35 {dimension_numbers = #tpu.dot_dimension_numbers<[1], [0], [0], [1], [0, 0, 1, 1], [], []>} : vector<16x8xbf16>, vector<8x512xbf16>, vector<16x512xf32> -> vector<16x512xf32>
    %c17_i32 = arith.constant 17 : i32
    %48 = tpu.dynamic_rotate %41 by %c17_i32 dim 1 : vector<8x512xf32>, i32 -> vector<8x512xf32>
    %49 = vector.extract_strided_slice %2 {offsets = [0, 0], sizes = [1, 512], strides = [1, 1]} : vector<9x512xf32> to vector<1x512xf32>
    %50 = vector.broadcast %49 : vector<1x512xf32> to vector<8x512xf32>
    %51 = arith.mulf %48, %50 : vector<8x512xf32>
    %52 = arith.truncf %51 : vector<8x512xf32> to vector<8x512xbf16>
    %53 = vector.extract_strided_slice %42 {offsets = [0, 0, 0], sizes = [1, 16, 8], strides = [1, 1, 1]} : vector<9x16x8xbf16> to vector<1x16x8xbf16>
    %54 = vector.shape_cast %53 : vector<1x16x8xbf16> to vector<16x8xbf16>
    %cst_36 = arith.constant dense<0.000000e+00> : vector<16x512xf32>
    %55 = tpu.matmul %54, %52, %cst_36 {dimension_numbers = #tpu.dot_dimension_numbers<[1], [0], [0], [1], [0, 0, 1, 1], [], []>} : vector<16x8xbf16>, vector<8x512xbf16>, vector<16x512xf32> -> vector<16x512xf32>
    %56 = arith.addf %47, %55 : vector<16x512xf32>
    %c16_i32 = arith.constant 16 : i32
    %57 = tpu.dynamic_rotate %41 by %c16_i32 dim 1 : vector<8x512xf32>, i32 -> vector<8x512xf32>
    %58 = vector.extract_strided_slice %2 {offsets = [1, 0], sizes = [1, 512], strides = [1, 1]} : vector<9x512xf32> to vector<1x512xf32>
    %59 = vector.broadcast %58 : vector<1x512xf32> to vector<8x512xf32>
    %60 = arith.mulf %57, %59 : vector<8x512xf32>
    %61 = arith.truncf %60 : vector<8x512xf32> to vector<8x512xbf16>
    %62 = vector.extract_strided_slice %42 {offsets = [1, 0, 0], sizes = [1, 16, 8], strides = [1, 1, 1]} : vector<9x16x8xbf16> to vector<1x16x8xbf16>
    %63 = vector.shape_cast %62 : vector<1x16x8xbf16> to vector<16x8xbf16>
    %cst_37 = arith.constant dense<0.000000e+00> : vector<16x512xf32>
    %64 = tpu.matmul %63, %61, %cst_37 {dimension_numbers = #tpu.dot_dimension_numbers<[1], [0], [0], [1], [0, 0, 1, 1], [], []>} : vector<16x8xbf16>, vector<8x512xbf16>, vector<16x512xf32> -> vector<16x512xf32>
    %65 = arith.addf %56, %64 : vector<16x512xf32>
    %c15_i32 = arith.constant 15 : i32
    %66 = tpu.dynamic_rotate %41 by %c15_i32 dim 1 : vector<8x512xf32>, i32 -> vector<8x512xf32>
    %67 = vector.extract_strided_slice %2 {offsets = [2, 0], sizes = [1, 512], strides = [1, 1]} : vector<9x512xf32> to vector<1x512xf32>
    %68 = vector.broadcast %67 : vector<1x512xf32> to vector<8x512xf32>
    %69 = arith.mulf %66, %68 : vector<8x512xf32>
    %70 = arith.truncf %69 : vector<8x512xf32> to vector<8x512xbf16>
    %71 = vector.extract_strided_slice %42 {offsets = [2, 0, 0], sizes = [1, 16, 8], strides = [1, 1, 1]} : vector<9x16x8xbf16> to vector<1x16x8xbf16>
    %72 = vector.shape_cast %71 : vector<1x16x8xbf16> to vector<16x8xbf16>
    %cst_38 = arith.constant dense<0.000000e+00> : vector<16x512xf32>
    %73 = tpu.matmul %72, %70, %cst_38 {dimension_numbers = #tpu.dot_dimension_numbers<[1], [0], [0], [1], [0, 0, 1, 1], [], []>} : vector<16x8xbf16>, vector<8x512xbf16>, vector<16x512xf32> -> vector<16x512xf32>
    %74 = arith.addf %65, %73 : vector<16x512xf32>
    %c1_i32 = arith.constant 1 : i32
    %75 = tpu.dynamic_rotate %41 by %c1_i32 dim 1 : vector<8x512xf32>, i32 -> vector<8x512xf32>
    %76 = vector.extract_strided_slice %2 {offsets = [3, 0], sizes = [1, 512], strides = [1, 1]} : vector<9x512xf32> to vector<1x512xf32>
    %77 = vector.broadcast %76 : vector<1x512xf32> to vector<8x512xf32>
    %78 = arith.mulf %75, %77 : vector<8x512xf32>
    %79 = arith.truncf %78 : vector<8x512xf32> to vector<8x512xbf16>
    %80 = vector.extract_strided_slice %42 {offsets = [3, 0, 0], sizes = [1, 16, 8], strides = [1, 1, 1]} : vector<9x16x8xbf16> to vector<1x16x8xbf16>
    %81 = vector.shape_cast %80 : vector<1x16x8xbf16> to vector<16x8xbf16>
    %cst_39 = arith.constant dense<0.000000e+00> : vector<16x512xf32>
    %82 = tpu.matmul %81, %79, %cst_39 {dimension_numbers = #tpu.dot_dimension_numbers<[1], [0], [0], [1], [0, 0, 1, 1], [], []>} : vector<16x8xbf16>, vector<8x512xbf16>, vector<16x512xf32> -> vector<16x512xf32>
    %83 = arith.addf %74, %82 : vector<16x512xf32>
    %c511_i32 = arith.constant 511 : i32
    %84 = tpu.dynamic_rotate %41 by %c511_i32 dim 1 : vector<8x512xf32>, i32 -> vector<8x512xf32>
    %85 = vector.extract_strided_slice %2 {offsets = [5, 0], sizes = [1, 512], strides = [1, 1]} : vector<9x512xf32> to vector<1x512xf32>
    %86 = vector.broadcast %85 : vector<1x512xf32> to vector<8x512xf32>
    %87 = arith.mulf %84, %86 : vector<8x512xf32>
    %88 = arith.truncf %87 : vector<8x512xf32> to vector<8x512xbf16>
    %89 = vector.extract_strided_slice %42 {offsets = [5, 0, 0], sizes = [1, 16, 8], strides = [1, 1, 1]} : vector<9x16x8xbf16> to vector<1x16x8xbf16>
    %90 = vector.shape_cast %89 : vector<1x16x8xbf16> to vector<16x8xbf16>
    %cst_40 = arith.constant dense<0.000000e+00> : vector<16x512xf32>
    %91 = tpu.matmul %90, %88, %cst_40 {dimension_numbers = #tpu.dot_dimension_numbers<[1], [0], [0], [1], [0, 0, 1, 1], [], []>} : vector<16x8xbf16>, vector<8x512xbf16>, vector<16x512xf32> -> vector<16x512xf32>
    %92 = arith.addf %83, %91 : vector<16x512xf32>
    %c497_i32 = arith.constant 497 : i32
    %93 = tpu.dynamic_rotate %41 by %c497_i32 dim 1 : vector<8x512xf32>, i32 -> vector<8x512xf32>
    %94 = vector.extract_strided_slice %2 {offsets = [6, 0], sizes = [1, 512], strides = [1, 1]} : vector<9x512xf32> to vector<1x512xf32>
    %95 = vector.broadcast %94 : vector<1x512xf32> to vector<8x512xf32>
    %96 = arith.mulf %93, %95 : vector<8x512xf32>
    %97 = arith.truncf %96 : vector<8x512xf32> to vector<8x512xbf16>
    %98 = vector.extract_strided_slice %42 {offsets = [6, 0, 0], sizes = [1, 16, 8], strides = [1, 1, 1]} : vector<9x16x8xbf16> to vector<1x16x8xbf16>
    %99 = vector.shape_cast %98 : vector<1x16x8xbf16> to vector<16x8xbf16>
    %cst_41 = arith.constant dense<0.000000e+00> : vector<16x512xf32>
    %100 = tpu.matmul %99, %97, %cst_41 {dimension_numbers = #tpu.dot_dimension_numbers<[1], [0], [0], [1], [0, 0, 1, 1], [], []>} : vector<16x8xbf16>, vector<8x512xbf16>, vector<16x512xf32> -> vector<16x512xf32>
    %101 = arith.addf %92, %100 : vector<16x512xf32>
    %c496_i32 = arith.constant 496 : i32
    %102 = tpu.dynamic_rotate %41 by %c496_i32 dim 1 : vector<8x512xf32>, i32 -> vector<8x512xf32>
    %103 = vector.extract_strided_slice %2 {offsets = [7, 0], sizes = [1, 512], strides = [1, 1]} : vector<9x512xf32> to vector<1x512xf32>
    %104 = vector.broadcast %103 : vector<1x512xf32> to vector<8x512xf32>
    %105 = arith.mulf %102, %104 : vector<8x512xf32>
    %106 = arith.truncf %105 : vector<8x512xf32> to vector<8x512xbf16>
    %107 = vector.extract_strided_slice %42 {offsets = [7, 0, 0], sizes = [1, 16, 8], strides = [1, 1, 1]} : vector<9x16x8xbf16> to vector<1x16x8xbf16>
    %108 = vector.shape_cast %107 : vector<1x16x8xbf16> to vector<16x8xbf16>
    %cst_42 = arith.constant dense<0.000000e+00> : vector<16x512xf32>
    %109 = tpu.matmul %108, %106, %cst_42 {dimension_numbers = #tpu.dot_dimension_numbers<[1], [0], [0], [1], [0, 0, 1, 1], [], []>} : vector<16x8xbf16>, vector<8x512xbf16>, vector<16x512xf32> -> vector<16x512xf32>
    %110 = arith.addf %101, %109 : vector<16x512xf32>
    %c495_i32 = arith.constant 495 : i32
    %111 = tpu.dynamic_rotate %41 by %c495_i32 dim 1 : vector<8x512xf32>, i32 -> vector<8x512xf32>
    %112 = vector.extract_strided_slice %2 {offsets = [8, 0], sizes = [1, 512], strides = [1, 1]} : vector<9x512xf32> to vector<1x512xf32>
    %113 = vector.broadcast %112 : vector<1x512xf32> to vector<8x512xf32>
    %114 = arith.mulf %111, %113 : vector<8x512xf32>
    %115 = arith.truncf %114 : vector<8x512xf32> to vector<8x512xbf16>
    %116 = vector.extract_strided_slice %42 {offsets = [8, 0, 0], sizes = [1, 16, 8], strides = [1, 1, 1]} : vector<9x16x8xbf16> to vector<1x16x8xbf16>
    %117 = vector.shape_cast %116 : vector<1x16x8xbf16> to vector<16x8xbf16>
    %cst_43 = arith.constant dense<0.000000e+00> : vector<16x512xf32>
    %118 = tpu.matmul %117, %115, %cst_43 {dimension_numbers = #tpu.dot_dimension_numbers<[1], [0], [0], [1], [0, 0, 1, 1], [], []>} : vector<16x8xbf16>, vector<8x512xbf16>, vector<16x512xf32> -> vector<16x512xf32>
    %119 = arith.addf %110, %118 : vector<16x512xf32>
    %cst_44 = arith.constant dense<0.000000e+00> : vector<16xf32>
    %120 = vector.multi_reduction <add>, %119, %cst_44 [1] : vector<16x512xf32> to vector<16xf32>
    %121 = vector.shape_cast %120 : vector<16xf32> to vector<16x1xf32>
    %122 = arith.mulf %119, %119 : vector<16x512xf32>
    %cst_45 = arith.constant dense<0.000000e+00> : vector<16xf32>
    %123 = vector.multi_reduction <add>, %122, %cst_45 [1] : vector<16x512xf32> to vector<16xf32>
    %124 = vector.shape_cast %123 : vector<16xf32> to vector<16x1xf32>
    %cst_46 = arith.constant 0.001953125 : f32
    %125 = vector.broadcast %cst_46 : f32 to vector<16x1xf32>
    %126 = arith.mulf %121, %125 : vector<16x1xf32>
    %cst_47 = arith.constant 0.001953125 : f32
    %127 = vector.broadcast %cst_47 : f32 to vector<16x1xf32>
    %128 = arith.mulf %124, %127 : vector<16x1xf32>
    %129 = arith.mulf %126, %126 : vector<16x1xf32>
    %130 = arith.subf %128, %129 : vector<16x1xf32>
    %cst_48 = arith.constant 0.000000e+00 : f32
    %131 = vector.broadcast %cst_48 : f32 to vector<16x1xf32>
    %132 = arith.maximumf %130, %131 : vector<16x1xf32>
    %133 = vector.broadcast %126 : vector<16x1xf32> to vector<16x512xf32>
    %134 = arith.subf %119, %133 : vector<16x512xf32>
    %cst_49 = arith.constant 9.99999974E-6 : f32
    %135 = vector.broadcast %cst_49 : f32 to vector<16x1xf32>
    %136 = arith.addf %132, %135 : vector<16x1xf32>
    %137 = math.rsqrt %136 : vector<16x1xf32>
    %138 = vector.broadcast %137 : vector<16x1xf32> to vector<16x512xf32>
    %139 = arith.mulf %134, %138 : vector<16x512xf32>
    %140 = vector.extract_strided_slice %43 {offsets = [0, 0, 0], sizes = [1, 16, 1], strides = [1, 1, 1]} : vector<9x16x1xf32> to vector<1x16x1xf32>
    %141 = vector.shape_cast %140 : vector<1x16x1xf32> to vector<16x1xf32>
    %142 = vector.broadcast %141 : vector<16x1xf32> to vector<16x512xf32>
    %143 = arith.mulf %139, %142 : vector<16x512xf32>
    %144 = vector.extract_strided_slice %43 {offsets = [1, 0, 0], sizes = [1, 16, 1], strides = [1, 1, 1]} : vector<9x16x1xf32> to vector<1x16x1xf32>
    %145 = vector.shape_cast %144 : vector<1x16x1xf32> to vector<16x1xf32>
    %146 = vector.broadcast %145 : vector<16x1xf32> to vector<16x512xf32>
    %147 = arith.addf %143, %146 : vector<16x512xf32>
    %cst_50 = arith.constant 0.000000e+00 : f32
    %148 = vector.broadcast %cst_50 : f32 to vector<16x512xf32>
    %149 = arith.cmpf oge, %147, %148 : vector<16x512xf32>
    %cst_51 = arith.constant 2.000000e-01 : f32
    %150 = vector.broadcast %cst_51 : f32 to vector<16x512xf32>
    %151 = arith.mulf %150, %147 : vector<16x512xf32>
    %152 = arith.select %149, %147, %151 : vector<16x512xi1>, vector<16x512xf32>
    %153 = arith.mulf %152, %152 : vector<16x512xf32>
    %154 = tpu.concatenate %152, %153 in 0 : vector<16x512xf32>, vector<16x512xf32> -> vector<32x512xf32>
    %cst_52 = arith.constant dense<0.000000e+00> : vector<32x2xf32>
    %155 = tpu.matmul %154, %1, %cst_52 {dimension_numbers = #tpu.dot_dimension_numbers<[1], [1], [0], [0], [0, 0, 1, 0], [], []>} : vector<32x512xf32>, vector<2x512xf32>, vector<32x2xf32> -> vector<32x2xf32>
    %156 = vector.extract_strided_slice %155 {offsets = [0, 0], sizes = [16, 2], strides = [1, 1]} : vector<32x2xf32> to vector<16x2xf32>
    %cst_53 = arith.constant 3.906250e-03 : f32
    %157 = vector.broadcast %cst_53 : f32 to vector<16x2xf32>
    %158 = arith.mulf %156, %157 : vector<16x2xf32>
    %159 = vector.extract_strided_slice %155 {offsets = [16, 0], sizes = [16, 2], strides = [1, 1]} : vector<32x2xf32> to vector<16x2xf32>
    %cst_54 = arith.constant 3.906250e-03 : f32
    %160 = vector.broadcast %cst_54 : f32 to vector<16x2xf32>
    %161 = arith.mulf %159, %160 : vector<16x2xf32>
    %162 = arith.mulf %158, %158 : vector<16x2xf32>
    %163 = arith.subf %161, %162 : vector<16x2xf32>
    %cst_55 = arith.constant 0.000000e+00 : f32
    %164 = vector.broadcast %cst_55 : f32 to vector<16x2xf32>
    %165 = arith.maximumf %163, %164 : vector<16x2xf32>
    %166 = tpu.concatenate %158, %165 in 0 : vector<16x2xf32>, vector<16x2xf32> -> vector<32x2xf32>
    %cst_56 = arith.constant dense<0.000000e+00> : vector<32x512xf32>
    %167 = tpu.matmul %166, %1, %cst_56 {dimension_numbers = #tpu.dot_dimension_numbers<[1], [0], [0], [1], [0, 0, 1, 1], [], []>} : vector<32x2xf32>, vector<2x512xf32>, vector<32x512xf32> -> vector<32x512xf32>
    %168 = vector.extract_strided_slice %167 {offsets = [0, 0], sizes = [16, 512], strides = [1, 1]} : vector<32x512xf32> to vector<16x512xf32>
    %169 = vector.extract_strided_slice %167 {offsets = [16, 0], sizes = [16, 512], strides = [1, 1]} : vector<32x512xf32> to vector<16x512xf32>
    %170 = vector.extract_strided_slice %43 {offsets = [2, 0, 0], sizes = [1, 16, 1], strides = [1, 1, 1]} : vector<9x16x1xf32> to vector<1x16x1xf32>
    %171 = vector.shape_cast %170 : vector<1x16x1xf32> to vector<16x1xf32>
    %172 = vector.broadcast %171 : vector<16x1xf32> to vector<16x512xf32>
    %173 = arith.mulf %172, %168 : vector<16x512xf32>
    %174 = vector.extract_strided_slice %43 {offsets = [3, 0, 0], sizes = [1, 16, 1], strides = [1, 1, 1]} : vector<9x16x1xf32> to vector<1x16x1xf32>
    %175 = vector.shape_cast %174 : vector<1x16x1xf32> to vector<16x1xf32>
    %176 = vector.broadcast %175 : vector<16x1xf32> to vector<16x512xf32>
    %177 = arith.addf %173, %176 : vector<16x512xf32>
    %178 = arith.negf %177 : vector<16x512xf32>
    %179 = math.exp %178 : vector<16x512xf32>
    %cst_57 = arith.constant 1.000000e+00 : f32
    %180 = vector.broadcast %cst_57 : f32 to vector<16x512xf32>
    %181 = arith.addf %180, %179 : vector<16x512xf32>
    %182 = arith.divf %180, %181 : vector<16x512xf32>
    %183 = arith.subf %152, %168 : vector<16x512xf32>
    %cst_58 = arith.constant 9.99999974E-6 : f32
    %184 = vector.broadcast %cst_58 : f32 to vector<16x512xf32>
    %185 = arith.addf %169, %184 : vector<16x512xf32>
    %186 = math.rsqrt %185 : vector<16x512xf32>
    %187 = arith.mulf %183, %186 : vector<16x512xf32>
    %188 = vector.extract_strided_slice %43 {offsets = [6, 0, 0], sizes = [1, 16, 1], strides = [1, 1, 1]} : vector<9x16x1xf32> to vector<1x16x1xf32>
    %189 = vector.shape_cast %188 : vector<1x16x1xf32> to vector<16x1xf32>
    %190 = vector.broadcast %189 : vector<16x1xf32> to vector<16x512xf32>
    %191 = arith.mulf %187, %190 : vector<16x512xf32>
    %192 = vector.extract_strided_slice %43 {offsets = [7, 0, 0], sizes = [1, 16, 1], strides = [1, 1, 1]} : vector<9x16x1xf32> to vector<1x16x1xf32>
    %193 = vector.shape_cast %192 : vector<1x16x1xf32> to vector<16x1xf32>
    %194 = vector.broadcast %193 : vector<16x1xf32> to vector<16x512xf32>
    %195 = arith.addf %191, %194 : vector<16x512xf32>
    %196 = vector.extract_strided_slice %43 {offsets = [4, 0, 0], sizes = [1, 16, 1], strides = [1, 1, 1]} : vector<9x16x1xf32> to vector<1x16x1xf32>
    %197 = vector.shape_cast %196 : vector<1x16x1xf32> to vector<16x1xf32>
    %198 = vector.broadcast %197 : vector<16x1xf32> to vector<16x512xf32>
    %199 = arith.mulf %198, %195 : vector<16x512xf32>
    %200 = vector.extract_strided_slice %43 {offsets = [5, 0, 0], sizes = [1, 16, 1], strides = [1, 1, 1]} : vector<9x16x1xf32> to vector<1x16x1xf32>
    %201 = vector.shape_cast %200 : vector<1x16x1xf32> to vector<16x1xf32>
    %202 = vector.broadcast %201 : vector<16x1xf32> to vector<16x512xf32>
    %203 = arith.addf %199, %202 : vector<16x512xf32>
    %204 = arith.negf %203 : vector<16x512xf32>
    %205 = math.exp %204 : vector<16x512xf32>
    %cst_59 = arith.constant 1.000000e+00 : f32
    %206 = vector.broadcast %cst_59 : f32 to vector<16x512xf32>
    %207 = arith.addf %206, %205 : vector<16x512xf32>
    %208 = arith.divf %206, %207 : vector<16x512xf32>
    %209 = vector.extract_strided_slice %43 {offsets = [8, 0, 0], sizes = [1, 16, 1], strides = [1, 1, 1]} : vector<9x16x1xf32> to vector<1x16x1xf32>
    %210 = vector.shape_cast %209 : vector<1x16x1xf32> to vector<16x1xf32>
    %211 = arith.mulf %152, %182 : vector<16x512xf32>
    %212 = vector.broadcast %210 : vector<16x1xf32> to vector<16x512xf32>
    %213 = arith.mulf %212, %211 : vector<16x512xf32>
    %cst_60 = arith.constant 1.000000e+00 : f32
    %214 = vector.broadcast %cst_60 : f32 to vector<16x1xf32>
    %215 = arith.subf %214, %210 : vector<16x1xf32>
    %216 = arith.mulf %152, %208 : vector<16x512xf32>
    %217 = vector.broadcast %215 : vector<16x1xf32> to vector<16x512xf32>
    %218 = arith.mulf %217, %216 : vector<16x512xf32>
    %219 = arith.addf %213, %218 : vector<16x512xf32>
    %c0_61 = arith.constant 0 : index
    %c0_62 = arith.constant 0 : index
    %220 = vector.load %arg12[%c0_61, %c0_62] : memref<64x32xf32, #tpu.memory_space<vmem>>, vector<64x32xf32>
    %c0_63 = arith.constant 0 : index
    %c0_64 = arith.constant 0 : index
    %221 = vector.load %arg13[%c0_63, %c0_64] : memref<64x1xf32, #tpu.memory_space<vmem>>, vector<64x1xf32>
    %c0_65 = arith.constant 0 : index
    %c0_66 = arith.constant 0 : index
    %222 = vector.load %arg14[%c0_65, %c0_66] : memref<64x64xf32, #tpu.memory_space<vmem>>, vector<64x64xf32>
    %c0_67 = arith.constant 0 : index
    %c0_68 = arith.constant 0 : index
    %223 = vector.load %arg15[%c0_67, %c0_68] : memref<64x1xf32, #tpu.memory_space<vmem>>, vector<64x1xf32>
    %cst_69 = arith.constant dense<0.000000e+00> : vector<64x2xf32>
    %224 = tpu.matmul %220, %0, %cst_69 {dimension_numbers = #tpu.dot_dimension_numbers<[1], [0], [0], [1], [0, 0, 1, 1], [], []>} : vector<64x32xf32>, vector<32x2xf32>, vector<64x2xf32> -> vector<64x2xf32>
    %225 = vector.broadcast %221 : vector<64x1xf32> to vector<64x2xf32>
    %226 = arith.addf %224, %225 : vector<64x2xf32>
    %cst_70 = arith.constant 0.000000e+00 : f32
    %227 = vector.broadcast %cst_70 : f32 to vector<64x2xf32>
    %228 = arith.maximumf %226, %227 : vector<64x2xf32>
    %cst_71 = arith.constant dense<0.000000e+00> : vector<64x2xf32>
    %229 = tpu.matmul %222, %228, %cst_71 {dimension_numbers = #tpu.dot_dimension_numbers<[1], [0], [0], [1], [0, 0, 1, 1], [], []>} : vector<64x64xf32>, vector<64x2xf32>, vector<64x2xf32> -> vector<64x2xf32>
    %230 = vector.broadcast %223 : vector<64x1xf32> to vector<64x2xf32>
    %231 = arith.addf %229, %230 : vector<64x2xf32>
    %cst_72 = arith.constant dense<0.000000e+00> : vector<64x512xf32>
    %232 = tpu.matmul %231, %1, %cst_72 {dimension_numbers = #tpu.dot_dimension_numbers<[1], [0], [0], [1], [0, 0, 1, 1], [], []>} : vector<64x2xf32>, vector<2x512xf32>, vector<64x512xf32> -> vector<64x512xf32>
    %233 = vector.extract_strided_slice %232 {offsets = [0, 0], sizes = [16, 512], strides = [1, 1]} : vector<64x512xf32> to vector<16x512xf32>
    %234 = arith.mulf %233, %219 : vector<16x512xf32>
    %235 = vector.extract_strided_slice %232 {offsets = [16, 0], sizes = [16, 512], strides = [1, 1]} : vector<64x512xf32> to vector<16x512xf32>
    %236 = arith.addf %234, %235 : vector<16x512xf32>
    %cst_73 = arith.constant 0.000000e+00 : f32
    %237 = vector.broadcast %cst_73 : f32 to vector<16x512xf32>
    %238 = arith.cmpf oge, %236, %237 : vector<16x512xf32>
    %cst_74 = arith.constant 2.000000e-01 : f32
    %239 = vector.broadcast %cst_74 : f32 to vector<16x512xf32>
    %240 = arith.mulf %239, %236 : vector<16x512xf32>
    %241 = arith.select %238, %236, %240 : vector<16x512xi1>, vector<16x512xf32>
    %242 = vector.extract_strided_slice %232 {offsets = [32, 0], sizes = [16, 512], strides = [1, 1]} : vector<64x512xf32> to vector<16x512xf32>
    %243 = arith.mulf %242, %241 : vector<16x512xf32>
    %244 = vector.extract_strided_slice %232 {offsets = [48, 0], sizes = [16, 512], strides = [1, 1]} : vector<64x512xf32> to vector<16x512xf32>
    %245 = arith.addf %243, %244 : vector<16x512xf32>
    %cst_75 = arith.constant 0.000000e+00 : f32
    %246 = vector.broadcast %cst_75 : f32 to vector<16x512xf32>
    %247 = arith.cmpf oge, %245, %246 : vector<16x512xf32>
    %cst_76 = arith.constant 2.000000e-01 : f32
    %248 = vector.broadcast %cst_76 : f32 to vector<16x512xf32>
    %249 = arith.mulf %248, %245 : vector<16x512xf32>
    %250 = arith.select %247, %245, %249 : vector<16x512xi1>, vector<16x512xf32>
    %c0_77 = arith.constant 0 : index
    %c0_78 = arith.constant 0 : index
    %c0_79 = arith.constant 0 : index
    %251 = vector.load %arg16[%c0_77, %c0_78, %c0_79] : memref<9x16x16xbf16, #tpu.memory_space<vmem>>, vector<9x16x16xbf16>
    %c0_80 = arith.constant 0 : index
    %c0_81 = arith.constant 0 : index
    %c0_82 = arith.constant 0 : index
    %252 = vector.load %arg17[%c0_80, %c0_81, %c0_82] : memref<9x16x1xf32, #tpu.memory_space<vmem>>, vector<9x16x1xf32>
    %253 = vector.extract_strided_slice %251 {offsets = [4, 0, 0], sizes = [1, 16, 16], strides = [1, 1, 1]} : vector<9x16x16xbf16> to vector<1x16x16xbf16>
    %254 = vector.shape_cast %253 : vector<1x16x16xbf16> to vector<16x16xbf16>
    %255 = arith.truncf %250 : vector<16x512xf32> to vector<16x512xbf16>
    %cst_83 = arith.constant dense<0.000000e+00> : vector<16x512xf32>
    %256 = tpu.matmul %254, %255, %cst_83 {dimension_numbers = #tpu.dot_dimension_numbers<[1], [0], [0], [1], [0, 0, 1, 1], [], []>} : vector<16x16xbf16>, vector<16x512xbf16>, vector<16x512xf32> -> vector<16x512xf32>
    %c17_i32_84 = arith.constant 17 : i32
    %257 = tpu.dynamic_rotate %250 by %c17_i32_84 dim 1 : vector<16x512xf32>, i32 -> vector<16x512xf32>
    %258 = vector.extract_strided_slice %2 {offsets = [0, 0], sizes = [1, 512], strides = [1, 1]} : vector<9x512xf32> to vector<1x512xf32>
    %259 = vector.broadcast %258 : vector<1x512xf32> to vector<16x512xf32>
    %260 = arith.mulf %257, %259 : vector<16x512xf32>
    %261 = arith.truncf %260 : vector<16x512xf32> to vector<16x512xbf16>
    %262 = vector.extract_strided_slice %251 {offsets = [0, 0, 0], sizes = [1, 16, 16], strides = [1, 1, 1]} : vector<9x16x16xbf16> to vector<1x16x16xbf16>
    %263 = vector.shape_cast %262 : vector<1x16x16xbf16> to vector<16x16xbf16>
    %cst_85 = arith.constant dense<0.000000e+00> : vector<16x512xf32>
    %264 = tpu.matmul %263, %261, %cst_85 {dimension_numbers = #tpu.dot_dimension_numbers<[1], [0], [0], [1], [0, 0, 1, 1], [], []>} : vector<16x16xbf16>, vector<16x512xbf16>, vector<16x512xf32> -> vector<16x512xf32>
    %265 = arith.addf %256, %264 : vector<16x512xf32>
    %c16_i32_86 = arith.constant 16 : i32
    %266 = tpu.dynamic_rotate %250 by %c16_i32_86 dim 1 : vector<16x512xf32>, i32 -> vector<16x512xf32>
    %267 = vector.extract_strided_slice %2 {offsets = [1, 0], sizes = [1, 512], strides = [1, 1]} : vector<9x512xf32> to vector<1x512xf32>
    %268 = vector.broadcast %267 : vector<1x512xf32> to vector<16x512xf32>
    %269 = arith.mulf %266, %268 : vector<16x512xf32>
    %270 = arith.truncf %269 : vector<16x512xf32> to vector<16x512xbf16>
    %271 = vector.extract_strided_slice %251 {offsets = [1, 0, 0], sizes = [1, 16, 16], strides = [1, 1, 1]} : vector<9x16x16xbf16> to vector<1x16x16xbf16>
    %272 = vector.shape_cast %271 : vector<1x16x16xbf16> to vector<16x16xbf16>
    %cst_87 = arith.constant dense<0.000000e+00> : vector<16x512xf32>
    %273 = tpu.matmul %272, %270, %cst_87 {dimension_numbers = #tpu.dot_dimension_numbers<[1], [0], [0], [1], [0, 0, 1, 1], [], []>} : vector<16x16xbf16>, vector<16x512xbf16>, vector<16x512xf32> -> vector<16x512xf32>
    %274 = arith.addf %265, %273 : vector<16x512xf32>
    %c15_i32_88 = arith.constant 15 : i32
    %275 = tpu.dynamic_rotate %250 by %c15_i32_88 dim 1 : vector<16x512xf32>, i32 -> vector<16x512xf32>
    %276 = vector.extract_strided_slice %2 {offsets = [2, 0], sizes = [1, 512], strides = [1, 1]} : vector<9x512xf32> to vector<1x512xf32>
    %277 = vector.broadcast %276 : vector<1x512xf32> to vector<16x512xf32>
    %278 = arith.mulf %275, %277 : vector<16x512xf32>
    %279 = arith.truncf %278 : vector<16x512xf32> to vector<16x512xbf16>
    %280 = vector.extract_strided_slice %251 {offsets = [2, 0, 0], sizes = [1, 16, 16], strides = [1, 1, 1]} : vector<9x16x16xbf16> to vector<1x16x16xbf16>
    %281 = vector.shape_cast %280 : vector<1x16x16xbf16> to vector<16x16xbf16>
    %cst_89 = arith.constant dense<0.000000e+00> : vector<16x512xf32>
    %282 = tpu.matmul %281, %279, %cst_89 {dimension_numbers = #tpu.dot_dimension_numbers<[1], [0], [0], [1], [0, 0, 1, 1], [], []>} : vector<16x16xbf16>, vector<16x512xbf16>, vector<16x512xf32> -> vector<16x512xf32>
    %283 = arith.addf %274, %282 : vector<16x512xf32>
    %c1_i32_90 = arith.constant 1 : i32
    %284 = tpu.dynamic_rotate %250 by %c1_i32_90 dim 1 : vector<16x512xf32>, i32 -> vector<16x512xf32>
    %285 = vector.extract_strided_slice %2 {offsets = [3, 0], sizes = [1, 512], strides = [1, 1]} : vector<9x512xf32> to vector<1x512xf32>
    %286 = vector.broadcast %285 : vector<1x512xf32> to vector<16x512xf32>
    %287 = arith.mulf %284, %286 : vector<16x512xf32>
    %288 = arith.truncf %287 : vector<16x512xf32> to vector<16x512xbf16>
    %289 = vector.extract_strided_slice %251 {offsets = [3, 0, 0], sizes = [1, 16, 16], strides = [1, 1, 1]} : vector<9x16x16xbf16> to vector<1x16x16xbf16>
    %290 = vector.shape_cast %289 : vector<1x16x16xbf16> to vector<16x16xbf16>
    %cst_91 = arith.constant dense<0.000000e+00> : vector<16x512xf32>
    %291 = tpu.matmul %290, %288, %cst_91 {dimension_numbers = #tpu.dot_dimension_numbers<[1], [0], [0], [1], [0, 0, 1, 1], [], []>} : vector<16x16xbf16>, vector<16x512xbf16>, vector<16x512xf32> -> vector<16x512xf32>
    %292 = arith.addf %283, %291 : vector<16x512xf32>
    %c511_i32_92 = arith.constant 511 : i32
    %293 = tpu.dynamic_rotate %250 by %c511_i32_92 dim 1 : vector<16x512xf32>, i32 -> vector<16x512xf32>
    %294 = vector.extract_strided_slice %2 {offsets = [5, 0], sizes = [1, 512], strides = [1, 1]} : vector<9x512xf32> to vector<1x512xf32>
    %295 = vector.broadcast %294 : vector<1x512xf32> to vector<16x512xf32>
    %296 = arith.mulf %293, %295 : vector<16x512xf32>
    %297 = arith.truncf %296 : vector<16x512xf32> to vector<16x512xbf16>
    %298 = vector.extract_strided_slice %251 {offsets = [5, 0, 0], sizes = [1, 16, 16], strides = [1, 1, 1]} : vector<9x16x16xbf16> to vector<1x16x16xbf16>
    %299 = vector.shape_cast %298 : vector<1x16x16xbf16> to vector<16x16xbf16>
    %cst_93 = arith.constant dense<0.000000e+00> : vector<16x512xf32>
    %300 = tpu.matmul %299, %297, %cst_93 {dimension_numbers = #tpu.dot_dimension_numbers<[1], [0], [0], [1], [0, 0, 1, 1], [], []>} : vector<16x16xbf16>, vector<16x512xbf16>, vector<16x512xf32> -> vector<16x512xf32>
    %301 = arith.addf %292, %300 : vector<16x512xf32>
    %c497_i32_94 = arith.constant 497 : i32
    %302 = tpu.dynamic_rotate %250 by %c497_i32_94 dim 1 : vector<16x512xf32>, i32 -> vector<16x512xf32>
    %303 = vector.extract_strided_slice %2 {offsets = [6, 0], sizes = [1, 512], strides = [1, 1]} : vector<9x512xf32> to vector<1x512xf32>
    %304 = vector.broadcast %303 : vector<1x512xf32> to vector<16x512xf32>
    %305 = arith.mulf %302, %304 : vector<16x512xf32>
    %306 = arith.truncf %305 : vector<16x512xf32> to vector<16x512xbf16>
    %307 = vector.extract_strided_slice %251 {offsets = [6, 0, 0], sizes = [1, 16, 16], strides = [1, 1, 1]} : vector<9x16x16xbf16> to vector<1x16x16xbf16>
    %308 = vector.shape_cast %307 : vector<1x16x16xbf16> to vector<16x16xbf16>
    %cst_95 = arith.constant dense<0.000000e+00> : vector<16x512xf32>
    %309 = tpu.matmul %308, %306, %cst_95 {dimension_numbers = #tpu.dot_dimension_numbers<[1], [0], [0], [1], [0, 0, 1, 1], [], []>} : vector<16x16xbf16>, vector<16x512xbf16>, vector<16x512xf32> -> vector<16x512xf32>
    %310 = arith.addf %301, %309 : vector<16x512xf32>
    %c496_i32_96 = arith.constant 496 : i32
    %311 = tpu.dynamic_rotate %250 by %c496_i32_96 dim 1 : vector<16x512xf32>, i32 -> vector<16x512xf32>
    %312 = vector.extract_strided_slice %2 {offsets = [7, 0], sizes = [1, 512], strides = [1, 1]} : vector<9x512xf32> to vector<1x512xf32>
    %313 = vector.broadcast %312 : vector<1x512xf32> to vector<16x512xf32>
    %314 = arith.mulf %311, %313 : vector<16x512xf32>
    %315 = arith.truncf %314 : vector<16x512xf32> to vector<16x512xbf16>
    %316 = vector.extract_strided_slice %251 {offsets = [7, 0, 0], sizes = [1, 16, 16], strides = [1, 1, 1]} : vector<9x16x16xbf16> to vector<1x16x16xbf16>
    %317 = vector.shape_cast %316 : vector<1x16x16xbf16> to vector<16x16xbf16>
    %cst_97 = arith.constant dense<0.000000e+00> : vector<16x512xf32>
    %318 = tpu.matmul %317, %315, %cst_97 {dimension_numbers = #tpu.dot_dimension_numbers<[1], [0], [0], [1], [0, 0, 1, 1], [], []>} : vector<16x16xbf16>, vector<16x512xbf16>, vector<16x512xf32> -> vector<16x512xf32>
    %319 = arith.addf %310, %318 : vector<16x512xf32>
    %c495_i32_98 = arith.constant 495 : i32
    %320 = tpu.dynamic_rotate %250 by %c495_i32_98 dim 1 : vector<16x512xf32>, i32 -> vector<16x512xf32>
    %321 = vector.extract_strided_slice %2 {offsets = [8, 0], sizes = [1, 512], strides = [1, 1]} : vector<9x512xf32> to vector<1x512xf32>
    %322 = vector.broadcast %321 : vector<1x512xf32> to vector<16x512xf32>
    %323 = arith.mulf %320, %322 : vector<16x512xf32>
    %324 = arith.truncf %323 : vector<16x512xf32> to vector<16x512xbf16>
    %325 = vector.extract_strided_slice %251 {offsets = [8, 0, 0], sizes = [1, 16, 16], strides = [1, 1, 1]} : vector<9x16x16xbf16> to vector<1x16x16xbf16>
    %326 = vector.shape_cast %325 : vector<1x16x16xbf16> to vector<16x16xbf16>
    %cst_99 = arith.constant dense<0.000000e+00> : vector<16x512xf32>
    %327 = tpu.matmul %326, %324, %cst_99 {dimension_numbers = #tpu.dot_dimension_numbers<[1], [0], [0], [1], [0, 0, 1, 1], [], []>} : vector<16x16xbf16>, vector<16x512xbf16>, vector<16x512xf32> -> vector<16x512xf32>
    %328 = arith.addf %319, %327 : vector<16x512xf32>
    %cst_100 = arith.constant dense<0.000000e+00> : vector<16xf32>
    %329 = vector.multi_reduction <add>, %328, %cst_100 [1] : vector<16x512xf32> to vector<16xf32>
    %330 = vector.shape_cast %329 : vector<16xf32> to vector<16x1xf32>
    %331 = arith.mulf %328, %328 : vector<16x512xf32>
    %cst_101 = arith.constant dense<0.000000e+00> : vector<16xf32>
    %332 = vector.multi_reduction <add>, %331, %cst_101 [1] : vector<16x512xf32> to vector<16xf32>
    %333 = vector.shape_cast %332 : vector<16xf32> to vector<16x1xf32>
    %cst_102 = arith.constant 0.001953125 : f32
    %334 = vector.broadcast %cst_102 : f32 to vector<16x1xf32>
    %335 = arith.mulf %330, %334 : vector<16x1xf32>
    %cst_103 = arith.constant 0.001953125 : f32
    %336 = vector.broadcast %cst_103 : f32 to vector<16x1xf32>
    %337 = arith.mulf %333, %336 : vector<16x1xf32>
    %338 = arith.mulf %335, %335 : vector<16x1xf32>
    %339 = arith.subf %337, %338 : vector<16x1xf32>
    %cst_104 = arith.constant 0.000000e+00 : f32
    %340 = vector.broadcast %cst_104 : f32 to vector<16x1xf32>
    %341 = arith.maximumf %339, %340 : vector<16x1xf32>
    %342 = vector.broadcast %335 : vector<16x1xf32> to vector<16x512xf32>
    %343 = arith.subf %328, %342 : vector<16x512xf32>
    %cst_105 = arith.constant 9.99999974E-6 : f32
    %344 = vector.broadcast %cst_105 : f32 to vector<16x1xf32>
    %345 = arith.addf %341, %344 : vector<16x1xf32>
    %346 = math.rsqrt %345 : vector<16x1xf32>
    %347 = vector.broadcast %346 : vector<16x1xf32> to vector<16x512xf32>
    %348 = arith.mulf %343, %347 : vector<16x512xf32>
    %349 = vector.extract_strided_slice %252 {offsets = [0, 0, 0], sizes = [1, 16, 1], strides = [1, 1, 1]} : vector<9x16x1xf32> to vector<1x16x1xf32>
    %350 = vector.shape_cast %349 : vector<1x16x1xf32> to vector<16x1xf32>
    %351 = vector.broadcast %350 : vector<16x1xf32> to vector<16x512xf32>
    %352 = arith.mulf %348, %351 : vector<16x512xf32>
    %353 = vector.extract_strided_slice %252 {offsets = [1, 0, 0], sizes = [1, 16, 1], strides = [1, 1, 1]} : vector<9x16x1xf32> to vector<1x16x1xf32>
    %354 = vector.shape_cast %353 : vector<1x16x1xf32> to vector<16x1xf32>
    %355 = vector.broadcast %354 : vector<16x1xf32> to vector<16x512xf32>
    %356 = arith.addf %352, %355 : vector<16x512xf32>
    %cst_106 = arith.constant 0.000000e+00 : f32
    %357 = vector.broadcast %cst_106 : f32 to vector<16x512xf32>
    %358 = arith.cmpf oge, %356, %357 : vector<16x512xf32>
    %cst_107 = arith.constant 2.000000e-01 : f32
    %359 = vector.broadcast %cst_107 : f32 to vector<16x512xf32>
    %360 = arith.mulf %359, %356 : vector<16x512xf32>
    %361 = arith.select %358, %356, %360 : vector<16x512xi1>, vector<16x512xf32>
    %362 = arith.mulf %361, %361 : vector<16x512xf32>
    %363 = tpu.concatenate %361, %362 in 0 : vector<16x512xf32>, vector<16x512xf32> -> vector<32x512xf32>
    %cst_108 = arith.constant dense<0.000000e+00> : vector<32x2xf32>
    %364 = tpu.matmul %363, %1, %cst_108 {dimension_numbers = #tpu.dot_dimension_numbers<[1], [1], [0], [0], [0, 0, 1, 0], [], []>} : vector<32x512xf32>, vector<2x512xf32>, vector<32x2xf32> -> vector<32x2xf32>
    %365 = vector.extract_strided_slice %364 {offsets = [0, 0], sizes = [16, 2], strides = [1, 1]} : vector<32x2xf32> to vector<16x2xf32>
    %cst_109 = arith.constant 3.906250e-03 : f32
    %366 = vector.broadcast %cst_109 : f32 to vector<16x2xf32>
    %367 = arith.mulf %365, %366 : vector<16x2xf32>
    %368 = vector.extract_strided_slice %364 {offsets = [16, 0], sizes = [16, 2], strides = [1, 1]} : vector<32x2xf32> to vector<16x2xf32>
    %cst_110 = arith.constant 3.906250e-03 : f32
    %369 = vector.broadcast %cst_110 : f32 to vector<16x2xf32>
    %370 = arith.mulf %368, %369 : vector<16x2xf32>
    %371 = arith.mulf %367, %367 : vector<16x2xf32>
    %372 = arith.subf %370, %371 : vector<16x2xf32>
    %cst_111 = arith.constant 0.000000e+00 : f32
    %373 = vector.broadcast %cst_111 : f32 to vector<16x2xf32>
    %374 = arith.maximumf %372, %373 : vector<16x2xf32>
    %375 = tpu.concatenate %367, %374 in 0 : vector<16x2xf32>, vector<16x2xf32> -> vector<32x2xf32>
    %cst_112 = arith.constant dense<0.000000e+00> : vector<32x512xf32>
    %376 = tpu.matmul %375, %1, %cst_112 {dimension_numbers = #tpu.dot_dimension_numbers<[1], [0], [0], [1], [0, 0, 1, 1], [], []>} : vector<32x2xf32>, vector<2x512xf32>, vector<32x512xf32> -> vector<32x512xf32>
    %377 = vector.extract_strided_slice %376 {offsets = [0, 0], sizes = [16, 512], strides = [1, 1]} : vector<32x512xf32> to vector<16x512xf32>
    %378 = vector.extract_strided_slice %376 {offsets = [16, 0], sizes = [16, 512], strides = [1, 1]} : vector<32x512xf32> to vector<16x512xf32>
    %379 = vector.extract_strided_slice %252 {offsets = [2, 0, 0], sizes = [1, 16, 1], strides = [1, 1, 1]} : vector<9x16x1xf32> to vector<1x16x1xf32>
    %380 = vector.shape_cast %379 : vector<1x16x1xf32> to vector<16x1xf32>
    %381 = vector.broadcast %380 : vector<16x1xf32> to vector<16x512xf32>
    %382 = arith.mulf %381, %377 : vector<16x512xf32>
    %383 = vector.extract_strided_slice %252 {offsets = [3, 0, 0], sizes = [1, 16, 1], strides = [1, 1, 1]} : vector<9x16x1xf32> to vector<1x16x1xf32>
    %384 = vector.shape_cast %383 : vector<1x16x1xf32> to vector<16x1xf32>
    %385 = vector.broadcast %384 : vector<16x1xf32> to vector<16x512xf32>
    %386 = arith.addf %382, %385 : vector<16x512xf32>
    %387 = arith.negf %386 : vector<16x512xf32>
    %388 = math.exp %387 : vector<16x512xf32>
    %cst_113 = arith.constant 1.000000e+00 : f32
    %389 = vector.broadcast %cst_113 : f32 to vector<16x512xf32>
    %390 = arith.addf %389, %388 : vector<16x512xf32>
    %391 = arith.divf %389, %390 : vector<16x512xf32>
    %392 = arith.subf %361, %377 : vector<16x512xf32>
    %cst_114 = arith.constant 9.99999974E-6 : f32
    %393 = vector.broadcast %cst_114 : f32 to vector<16x512xf32>
    %394 = arith.addf %378, %393 : vector<16x512xf32>
    %395 = math.rsqrt %394 : vector<16x512xf32>
    %396 = arith.mulf %392, %395 : vector<16x512xf32>
    %397 = vector.extract_strided_slice %252 {offsets = [6, 0, 0], sizes = [1, 16, 1], strides = [1, 1, 1]} : vector<9x16x1xf32> to vector<1x16x1xf32>
    %398 = vector.shape_cast %397 : vector<1x16x1xf32> to vector<16x1xf32>
    %399 = vector.broadcast %398 : vector<16x1xf32> to vector<16x512xf32>
    %400 = arith.mulf %396, %399 : vector<16x512xf32>
    %401 = vector.extract_strided_slice %252 {offsets = [7, 0, 0], sizes = [1, 16, 1], strides = [1, 1, 1]} : vector<9x16x1xf32> to vector<1x16x1xf32>
    %402 = vector.shape_cast %401 : vector<1x16x1xf32> to vector<16x1xf32>
    %403 = vector.broadcast %402 : vector<16x1xf32> to vector<16x512xf32>
    %404 = arith.addf %400, %403 : vector<16x512xf32>
    %405 = vector.extract_strided_slice %252 {offsets = [4, 0, 0], sizes = [1, 16, 1], strides = [1, 1, 1]} : vector<9x16x1xf32> to vector<1x16x1xf32>
    %406 = vector.shape_cast %405 : vector<1x16x1xf32> to vector<16x1xf32>
    %407 = vector.broadcast %406 : vector<16x1xf32> to vector<16x512xf32>
    %408 = arith.mulf %407, %404 : vector<16x512xf32>
    %409 = vector.extract_strided_slice %252 {offsets = [5, 0, 0], sizes = [1, 16, 1], strides = [1, 1, 1]} : vector<9x16x1xf32> to vector<1x16x1xf32>
    %410 = vector.shape_cast %409 : vector<1x16x1xf32> to vector<16x1xf32>
    %411 = vector.broadcast %410 : vector<16x1xf32> to vector<16x512xf32>
    %412 = arith.addf %408, %411 : vector<16x512xf32>
    %413 = arith.negf %412 : vector<16x512xf32>
    %414 = math.exp %413 : vector<16x512xf32>
    %cst_115 = arith.constant 1.000000e+00 : f32
    %415 = vector.broadcast %cst_115 : f32 to vector<16x512xf32>
    %416 = arith.addf %415, %414 : vector<16x512xf32>
    %417 = arith.divf %415, %416 : vector<16x512xf32>
    %418 = vector.extract_strided_slice %252 {offsets = [8, 0, 0], sizes = [1, 16, 1], strides = [1, 1, 1]} : vector<9x16x1xf32> to vector<1x16x1xf32>
    %419 = vector.shape_cast %418 : vector<1x16x1xf32> to vector<16x1xf32>
    %420 = arith.mulf %361, %391 : vector<16x512xf32>
    %421 = vector.broadcast %419 : vector<16x1xf32> to vector<16x512xf32>
    %422 = arith.mulf %421, %420 : vector<16x512xf32>
    %cst_116 = arith.constant 1.000000e+00 : f32
    %423 = vector.broadcast %cst_116 : f32 to vector<16x1xf32>
    %424 = arith.subf %423, %419 : vector<16x1xf32>
    %425 = arith.mulf %361, %417 : vector<16x512xf32>
    %426 = vector.broadcast %424 : vector<16x1xf32> to vector<16x512xf32>
    %427 = arith.mulf %426, %425 : vector<16x512xf32>
    %428 = arith.addf %422, %427 : vector<16x512xf32>
    %c0_117 = arith.constant 0 : index
    %c0_118 = arith.constant 0 : index
    %429 = vector.load %arg18[%c0_117, %c0_118] : memref<16x8xf32, #tpu.memory_space<vmem>>, vector<16x8xf32>
    %cst_119 = arith.constant dense<0.000000e+00> : vector<16x512xf32>
    %430 = tpu.matmul %429, %10, %cst_119 {dimension_numbers = #tpu.dot_dimension_numbers<[1], [0], [0], [1], [0, 0, 1, 1], [], []>} : vector<16x8xf32>, vector<8x512xf32>, vector<16x512xf32> -> vector<16x512xf32>
    %c0_120 = arith.constant 0 : index
    %c0_121 = arith.constant 0 : index
    %431 = vector.load %arg19[%c0_120, %c0_121] : memref<16x1xf32, #tpu.memory_space<vmem>>, vector<16x1xf32>
    %432 = vector.broadcast %431 : vector<16x1xf32> to vector<16x512xf32>
    %433 = arith.addf %430, %432 : vector<16x512xf32>
    %434 = arith.addf %433, %428 : vector<16x512xf32>
    %435 = vector.extract_strided_slice %434 {offsets = [0, 0], sizes = [16, 256], strides = [1, 1]} : vector<16x512xf32> to vector<16x256xf32>
    %c0_122 = arith.constant 0 : index
    %c0_123 = arith.constant 0 : index
    %c0_124 = arith.constant 0 : index
    %436 = vector.load %arg20[%c0_122, %c0_123, %c0_124] : memref<2x16x256xf32, #tpu.memory_space<vmem>>, vector<1x16x256xf32>
    %437 = vector.shape_cast %436 : vector<1x16x256xf32> to vector<16x256xf32>
    %438 = vector.shape_cast %435 : vector<16x256xf32> to vector<1x16x256xf32>
    tpu.vector_store %arg20[%c0_122, %c0_123, %c0_124], %438 {strides = array<i32>} : memref<2x16x256xf32, #tpu.memory_space<vmem>>, vector<1x16x256xf32>,
    %439 = vector.extract_strided_slice %434 {offsets = [0, 256], sizes = [16, 256], strides = [1, 1]} : vector<16x512xf32> to vector<16x256xf32>
    %c1_125 = arith.constant 1 : index
    %c0_126 = arith.constant 0 : index
    %c0_127 = arith.constant 0 : index
    %440 = vector.load %arg20[%c1_125, %c0_126, %c0_127] : memref<2x16x256xf32, #tpu.memory_space<vmem>>, vector<1x16x256xf32>
    %441 = vector.shape_cast %440 : vector<1x16x256xf32> to vector<16x256xf32>
    %442 = vector.shape_cast %439 : vector<16x256xf32> to vector<1x16x256xf32>
    tpu.vector_store %arg20[%c1_125, %c0_126, %c0_127], %442 {strides = array<i32>} : memref<2x16x256xf32, #tpu.memory_space<vmem>>, vector<1x16x256xf32>,
    return
  }
  func.func @transform_0(%arg0: i32) -> (i32, i32) {
    %c0_i32 = arith.constant 0 : i32
    %c0_i32_0 = arith.constant 0 : i32
    %c0_i32_1 = arith.constant 0 : i32
    return %c0_i32, %c0_i32_0 : i32, i32
  }
  func.func @transform_1(%arg0: i32) -> (i32, i32, i32) {
    %c0_i32 = arith.constant 0 : i32
    %c0_i32_0 = arith.constant 0 : i32
    %c0_i32_1 = arith.constant 0 : i32
    %c0_i32_2 = arith.constant 0 : i32
    return %c0_i32, %c0_i32_0, %c0_i32_1 : i32, i32, i32
  }
  func.func @transform_2(%arg0: i32) -> (i32, i32) {
    %c0_i32 = arith.constant 0 : i32
    %c0_i32_0 = arith.constant 0 : i32
    %c0_i32_1 = arith.constant 0 : i32
    return %c0_i32, %c0_i32_0 : i32, i32
  }
  func.func @transform_3(%arg0: i32) -> (i32, i32) {
    %c0_i32 = arith.constant 0 : i32
    %c0_i32_0 = arith.constant 0 : i32
    %c0_i32_1 = arith.constant 0 : i32
    return %c0_i32, %c0_i32_0 : i32, i32
  }
  func.func @transform_4(%arg0: i32) -> (i32, i32) {
    %c0_i32 = arith.constant 0 : i32
    %c0_i32_0 = arith.constant 0 : i32
    %c0_i32_1 = arith.constant 0 : i32
    return %c0_i32, %c0_i32_0 : i32, i32
  }
  func.func @transform_5(%arg0: i32) -> (i32, i32) {
    %c0_i32 = arith.constant 0 : i32
    %c0_i32_0 = arith.constant 0 : i32
    %c0_i32_1 = arith.constant 0 : i32
    return %c0_i32, %c0_i32_0 : i32, i32
  }
  func.func @transform_6(%arg0: i32) -> (i32, i32) {
    %c0_i32 = arith.constant 0 : i32
    %c0_i32_0 = arith.constant 0 : i32
    %c0_i32_1 = arith.constant 0 : i32
    return %c0_i32, %c0_i32_0 : i32, i32
  }
  func.func @transform_7(%arg0: i32) -> (i32, i32) {
    %c0_i32 = arith.constant 0 : i32
    %c0_i32_0 = arith.constant 0 : i32
    %c0_i32_1 = arith.constant 0 : i32
    return %c0_i32, %c0_i32_0 : i32, i32
  }
  func.func @transform_8(%arg0: i32) -> (i32, i32) {
    %c0_i32 = arith.constant 0 : i32
    %c0_i32_0 = arith.constant 0 : i32
    %c0_i32_1 = arith.constant 0 : i32
    return %c0_i32, %c0_i32_0 : i32, i32
  }
  func.func @transform_9(%arg0: i32) -> (i32, i32, i32) {
    %c0_i32 = arith.constant 0 : i32
    %c0_i32_0 = arith.constant 0 : i32
    %c0_i32_1 = arith.constant 0 : i32
    %c0_i32_2 = arith.constant 0 : i32
    return %c0_i32, %c0_i32_0, %c0_i32_1 : i32, i32, i32
  }
  func.func @transform_10(%arg0: i32) -> (i32, i32, i32) {
    %c0_i32 = arith.constant 0 : i32
    %c0_i32_0 = arith.constant 0 : i32
    %c0_i32_1 = arith.constant 0 : i32
    %c0_i32_2 = arith.constant 0 : i32
    return %c0_i32, %c0_i32_0, %c0_i32_1 : i32, i32, i32
  }
  func.func @transform_11(%arg0: i32) -> (i32, i32) {
    %c0_i32 = arith.constant 0 : i32
    %c0_i32_0 = arith.constant 0 : i32
    %c0_i32_1 = arith.constant 0 : i32
    return %c0_i32, %c0_i32_0 : i32, i32
  }
  func.func @transform_12(%arg0: i32) -> (i32, i32) {
    %c0_i32 = arith.constant 0 : i32
    %c0_i32_0 = arith.constant 0 : i32
    %c0_i32_1 = arith.constant 0 : i32
    return %c0_i32, %c0_i32_0 : i32, i32
  }
  func.func @transform_13(%arg0: i32) -> (i32, i32) {
    %c0_i32 = arith.constant 0 : i32
    %c0_i32_0 = arith.constant 0 : i32
    %c0_i32_1 = arith.constant 0 : i32
    return %c0_i32, %c0_i32_0 : i32, i32
  }
  func.func @transform_14(%arg0: i32) -> (i32, i32) {
    %c0_i32 = arith.constant 0 : i32
    %c0_i32_0 = arith.constant 0 : i32
    %c0_i32_1 = arith.constant 0 : i32
    return %c0_i32, %c0_i32_0 : i32, i32
  }
  func.func @transform_15(%arg0: i32) -> (i32, i32, i32) {
    %c0_i32 = arith.constant 0 : i32
    %c0_i32_0 = arith.constant 0 : i32
    %c0_i32_1 = arith.constant 0 : i32
    %c0_i32_2 = arith.constant 0 : i32
    return %c0_i32, %c0_i32_0, %c0_i32_1 : i32, i32, i32
  }
  func.func @transform_16(%arg0: i32) -> (i32, i32, i32) {
    %c0_i32 = arith.constant 0 : i32
    %c0_i32_0 = arith.constant 0 : i32
    %c0_i32_1 = arith.constant 0 : i32
    %c0_i32_2 = arith.constant 0 : i32
    return %c0_i32, %c0_i32_0, %c0_i32_1 : i32, i32, i32
  }
  func.func @transform_17(%arg0: i32) -> (i32, i32) {
    %c0_i32 = arith.constant 0 : i32
    %c0_i32_0 = arith.constant 0 : i32
    %c0_i32_1 = arith.constant 0 : i32
    return %c0_i32, %c0_i32_0 : i32, i32
  }
  func.func @transform_18(%arg0: i32) -> (i32, i32) {
    %c0_i32 = arith.constant 0 : i32
    %c0_i32_0 = arith.constant 0 : i32
    %c0_i32_1 = arith.constant 0 : i32
    return %c0_i32, %c0_i32_0 : i32, i32
  }
  func.func @transform_19(%arg0: i32) -> (i32, i32, i32) {
    %c0_i32 = arith.constant 0 : i32
    %c0_i32_0 = arith.constant 0 : i32
    %c0_i32_1 = arith.constant 0 : i32
    %c0_i32_2 = arith.constant 0 : i32
    return %c0_i32, %c0_i32_0, %c0_i32_1 : i32, i32, i32
  }
}

</mosaic_0001>

<bundles_post_ra>
// kernel: g_block_forward.1
= control target key start
LH: loop header
LB: loop body
LE: loop exit
PB: predicated region body
PF: predicated region fallthrough
CT: control target
= control target key end

     0   :  { %v8686_v3 = vmov 0.0   ;;  %v8684_v4 = vmov 0   ;;  %vm93_vm0 = vcmask 523264   ;;  %vm280_vm1 = vcmask 261120   ;;  %s6577_s24 = smov 15   ;;  %s6578_s25 = smov 1   ;;  %s8660_s2 = inlined_call_operand.vmem [shape: f32[64,256], index: 2, kind: input, shape index: {}]   ;;  %s8661_s6 = inlined_call_operand.vmem [shape: f32[32,1], index: 6, kind: input, shape index: {}]   ;;  %s8662_s0 = inlined_call_operand.vmem [shape: f32[32,2], index: 0, kind: input, shape index: {}]   ;;  %s8663_s8 = inlined_call_operand.vmem [shape: f32[32,1], index: 8, kind: input, shape index: {}]   ;;  %s8664_s1 = inlined_call_operand.vmem [shape: f32[2,8,64], index: 1, kind: input, shape index: {}]   ;;  %s8665_s5 = inlined_call_operand.vmem [shape: f32[32,32], index: 5, kind: input, shape index: {}]   ;;  %s8666_s7 = inlined_call_operand.vmem [shape: f32[32,32], index: 7, kind: input, shape index: {}]   ;;  %s8667_s3 = inlined_call_operand.vmem [shape: f32[2,512], index: 3, kind: input, shape index: {}]   ;;  %s8668_s9 = inlined_call_operand.vmem [shape: bf16[9,16,8], index: 9, kind: input, shape index: {}]   ;;  %s8669_s10 = inlined_call_operand.vmem [shape: f32[9,16,1], index: 10, kind: input, shape index: {}]   ;;  %s8670_s4 = inlined_call_operand.vmem [shape: f32[9,512], index: 4, kind: input, shape index: {}]   ;;  %s8671_s12 = inlined_call_operand.vmem [shape: f32[64,1], index: 12, kind: input, shape index: {}]   ;;  %s8672_s14 = inlined_call_operand.vmem [shape: f32[64,1], index: 14, kind: input, shape index: {}]   ;;  %s8673_s11 = inlined_call_operand.vmem [shape: f32[64,32], index: 11, kind: input, shape index: {}]   ;;  %s8674_s13 = inlined_call_operand.vmem [shape: f32[64,64], index: 13, kind: input, shape index: {}]   ;;  %s8675_s15 = inlined_call_operand.vmem [shape: bf16[9,16,16], index: 15, kind: input, shape index: {}]   ;;  %s8676_s16 = inlined_call_operand.vmem [shape: f32[9,16,1], index: 16, kind: input, shape index: {}]   ;;  %s8677_s18 = inlined_call_operand.vmem [shape: f32[16,1], index: 18, kind: input, shape index: {}]   ;;  %s8678_s17 = inlined_call_operand.vmem [shape: f32[16,8], index: 17, kind: input, shape index: {}]   ;;  %s8679_s19 = inlined_call_operand.vmem [shape: f32[2,16,256], index: 19, kind: output, shape index: {}]  }
   0x1   :  { %8741 = sst [smem:[#allocation29_spill]] %s8660_s2  ;;  %161 = vmatprep.mubr.f32.mxu0 %v8686_v3  ;;  %6379 = vset.pattern.permute.xlu0 %v8684_v4  ;;  %v92_v37 = vld [vmem:[%s8664_s1] sm:$0xff]  ;;  %v245_v42 = vld [vmem:[%s8665_s5 + $0x8] sm:$0xff]  ;;  %v246_v43 = vld [vmem:[%s8665_s5 + $0x10] sm:$0xff]  ;;  %vm8740_vm2 = vcmask 1041408   ;;  %vm8739_vm3 = vcmask 15360  }
   0x2   :  { %8742 = sst [smem:[#allocation30_spill]] %s8661_s6  ;;  %s8745_s20 = sld [smem:[#allocation29_spill]]  ;;  %6380 = vset.pattern.permute.xlu1 %v8684_v4  ;;  %237 = vmatprep.mubr.f32.mxu1 %v8686_v3  ;;  %v244_v39 = vld [vmem:[%s8665_s5] sm:$0xff]  ;;  %v247_v44 = vld [vmem:[%s8665_s5 + $0x18] sm:$0xff]  ;;  %v5834_v45 = vld [vmem:[%s8664_s1 + $0x8] sm:$0xff]  ;;  %vm845_vm13 = vcmask 1043456  }
   0x3   :  { %8743 = sst [smem:[#allocation31_spill]] %s8662_s0  ;;  %s8746_s21 = sld [smem:[#allocation30_spill]]  ;;  %v252_v46 = vld [vmem:[%s8666_s7] sm:$0xff]  ;;  %vm8692_vm15 = vcmask 64512  }
   0x4   :  { %8744 = sst [smem:[#allocation32_spill]] %s8663_s8  ;;  %s8747_s27 = sld [smem:[#allocation31_spill]] }
   0x5   :  { %s8748_s26 = sld [smem:[#allocation32_spill]]  ;;  %s6579_s8 = smov 127  }
   0x6   :  { %s6582_s28 = smov 111  }
   0x8   :  { %v77_v0 = vld [vmem:[%s8745_s20 + $0x8] sm:$0xff]  ;;  %v79_v1 = vld [vmem:[%s8745_s20 + $0x18] sm:$0xff]  ;;  %v76_v2 = vld [vmem:[%s8745_s20] sm:$0xff] }
   0x9   :  { %v6152_v5 = vpack.c.bf16 %v79_v1, %v77_v0  ;;  %v78_v6 = vld [vmem:[%s8745_s20 + $0x10] sm:$0xff]  ;;  %v81_v7 = vld [vmem:[%s8745_s20 + $0x28] sm:$0xff]  ;;  %v83_v8 = vld [vmem:[%s8745_s20 + $0x38] sm:$0xff] }
   0xa   :  { %v6154_v9 = vpack.c.bf16 %v78_v6, %v76_v2  ;;  %v6156_v10 = vpack.c.bf16 %v83_v8, %v81_v7  ;;  %v80_v11 = vld [vmem:[%s8745_s20 + $0x20] sm:$0xff]  ;;  %v82_v12 = vld [vmem:[%s8745_s20 + $0x30] sm:$0xff]  ;;  %v85_v13 = vld [vmem:[%s8745_s20 + $0x48] sm:$0xff] }
   0xb   :  { %6153 = vmatprep.subr.bf16.mxu0 %v6152_v5  ;;  %v87_v14 = vld [vmem:[%s8745_s20 + $0x58] sm:$0xff]  ;;  %6169 = vmatprep.subr.bf16.mxu1 %v6152_v5  ;;  %v6158_v15 = vpack.c.bf16 %v82_v12, %v80_v11  ;;  %v84_v17 = vld [vmem:[%s8745_s20 + $0x40] sm:$0xff]  ;;  %v86_v18 = vld [vmem:[%s8745_s20 + $0x50] sm:$0xff]  ;;  %v504_v11 = vlaneseq }
   0xc   :  { %6155 = vmatpush1.bf16.msra.mxu0 %v6154_v9  ;;  %6171 = vmatpush1.bf16.msra.mxu1 %v6154_v9  ;;  %v6160_v16 = vpack.c.bf16 %v87_v14, %v85_v13  ;;  %v89_v19 = vld [vmem:[%s8745_s20 + $0x68] sm:$0xff]  ;;  %v91_v20 = vld [vmem:[%s8745_s20 + $0x78] sm:$0xff]  ;;  %v6162_v21 = vpack.c.bf16 %v86_v18, %v84_v17  ;;  %v248_v22 = vld [vmem:[%s8746_s21] sm:$0xff]  ;;  %v6574_v9 = vmov 1983009808  }
   0xd   :  { %6157 = vmatprep.subr.bf16.mxu0 %v6156_v10  ;;  %6173 = vmatprep.subr.bf16.mxu1 %v6156_v10  ;;  %v250_v23 = vld [vmem:[%s8746_s21 + $0x10] sm:$0xff]  ;;  %v6164_v24 = vpack.c.bf16 %v91_v20, %v89_v19  ;;  %v88_v25 = vld [vmem:[%s8745_s20 + $0x60] sm:$0xff]  ;;  %v64_v28 = vld [vmem:[%s8747_s27 + $0x8] sm:$0xff]  ;;  %v502_v10 = vunpack.c.l.s4 %v6574_v9  ;;  %v6830_v14 = vshrl.u32 %v504_v11, 7 }
   0xe   :  { %v90_v26 = vld [vmem:[%s8745_s20 + $0x70] sm:$0xff]  ;;  %262 = vperm.xlu0 %6379, %v248_v22   ;;  %v63_v27 = vld [vmem:[%s8747_s27] sm:$0xff]  ;;  %272 = vperm.xlu1 %6380, %v250_v23   ;;  %v249_v29 = vld [vmem:[%s8746_s21 + $0x8] sm:$0xff] }
   0xf   :  { %v251_v30 = vld [vmem:[%s8746_s21 + $0x18] sm:$0xff]  ;;  %v6166_v31 = vpack.c.bf16 %v90_v26, %v88_v25  ;;  %v6753_v32 = vpack.c.bf16 %v64_v28, %v63_v27  ;;  %v65_v33 = vld [vmem:[%s8747_s27 + $0x10] sm:$0xff]  ;;  %v256_v35 = vld [vmem:[%s8748_s26] sm:$0xff]  ;;  %v503_v13 = vunpack.c.0.s8 %v502_v10  ;;  %s6581_s21 = smov 112  }
  0x10   :  { %6159 = vmatpush1.bf16.msra.mxu0 %v6158_v15  ;;  %6175 = vmatpush1.bf16.msra.mxu1 %v6158_v15  ;;  %v66_v34 = vld [vmem:[%s8747_s27 + $0x18] sm:$0xff]  ;;  %v257_v36 = vld [vmem:[%s8748_s26 + $0x8] sm:$0xff]  ;;  %v258_v40 = vld [vmem:[%s8748_s26 + $0x10] sm:$0xff] }
  0x11   :  { %6161 = vmatprep.subr.bf16.mxu0 %v6160_v16  ;;  %6177 = vmatprep.subr.bf16.mxu1 %v6160_v16  ;;  %v6771_v38 = vpack.c.bf16 %v66_v34, %v65_v33  ;;  %v259_v41 = vld [vmem:[%s8748_s26 + $0x18] sm:$0xff]  ;;  %v253_v5 = vld [vmem:[%s8666_s7 + $0x8] sm:$0xff]  ;;  %v254_v6 = vld [vmem:[%s8666_s7 + $0x10] sm:$0xff]  ;;  %v506_v16 = vsub.s32 %v503_v13, %v6830_v14  ;;  %s6580_s26 = smov 113  }
  0x12   :  { %267 = vperm.xlu0 %6379, %v249_v29   ;;  %277 = vperm.xlu1 %6380, %v251_v30   ;;  %v255_v7 = vld [vmem:[%s8666_s7 + $0x18] sm:$0xff]  ;;  %v67_v15 = vld [vmem:[%s8667_s3] sm:$0xff]  ;;  %s6575_s3 = smov 17   ;;  %s6576_s7 = smov 16  }
  0x13   :  { %v500_v17 = vcombine.high %v67_v15, %v67_v15  ;;  %v6836_v18 = vrot.slane %v67_v15, %v506_v16 }
  0x14   :  { %6163 = vmatpush1.bf16.msra.mxu0 %v6162_v21  ;;  %6179 = vmatpush1.bf16.msra.mxu1 %v6162_v21 }
  0x15   :  { %6165 = vmatprep.subr.bf16.mxu0 %v6164_v24  ;;  %6181 = vmatprep.subr.bf16.mxu1 %v6164_v24  ;;  %8753 = vst [vmem:[#allocation6_spill] sm:$0xff] %v6836_v18  ;;  %v6838_v19 = vrot.slane %v500_v17, %v506_v16  ;;  %v6842_v20 = vcombine.high %v6836_v18, %v6836_v18 }
  0x16   :  { %384 = vperm.xlu0 %6379, %v256_v35   ;;  %389 = vperm.xlu1 %6380, %v257_v36  }
  0x17   :  { %8754 = vst [vmem:[#allocation7_spill] sm:$0xff] %v6838_v19  ;;  %8755 = vst [vmem:[#allocation8_spill] sm:$0xff] %v6842_v20  ;;  %v6846_v21 = vcombine.high %v6838_v19, %v6838_v19 }
  0x18   :  { %6167 = vmatpush1.bf16.msra.mxu0 %v6166_v31  ;;  %6183 = vmatpush1.bf16.msra.mxu1 %v6166_v31 }
  0x19   :  { %6185 = vmatprep.subr.bf16.mxu0 %v6753_v32  ;;  %8756 = vst [vmem:[#allocation9_spill] sm:$0xff] %v6846_v21 }
  0x1a   :  { %394 = vperm.xlu0 %6379, %v258_v40   ;;  %399 = vperm.xlu1 %6380, %v259_v41  }
  0x1b   :  { %5833 = vmatmul.mubr.msk.f32.vlgmr.msra.gmra.mrb[0].mxu0 %vm93_vm0, %v92_v37  ;;  %5835 = vmatmul.mubr.msk.f32.vlgmr.msra.gmra.mrb[0].mxu1 %vm93_vm0, %v5834_v45 }
  0x1c   :  { %6187 = vmatpush3.bf16.msra.mxu0 %v6753_v32  ;;  %6084 = vmatprep.mubr.msk.f32.mxu0 %vm280_vm1, %v244_v39 }
  0x1d   :  { %6189 = vmatprep.subr.bf16.mxu0 %v6771_v38  ;;  %6098 = vmatprep.mubr.msk.f32.mxu1 %vm280_vm1, %v252_v46 }
  0x20   :  { %6191 = vmatpush3.bf16.msra.mxu0 %v6771_v38 }
  0x21   :  { %5844 = vmatprep.subr.msk.mxu0 %vm8740_vm2, %v6842_v20 }
  0x23   :  { %6085 = vmatmul.mubr.msk.f32.vlgmr.msra.gmra.mrb[2].mxu0 %vm280_vm1, %v245_v42 }
  0x24   :  { %6087 = vmatprep.mubr.msk.f32.mxu0 %vm280_vm1, %v246_v43  ;;  %5845 = vmatpush1.msk.msra.mxu0 %vm8740_vm2, %v6836_v18 }
  0x27   :  { %6088 = vmatmul.mubr.msk.f32.gmra.mrb[4].mxu0 %vm280_vm1, %v247_v44 }
  0x28   :  { %603 = vmatprep.mubr.f32.mxu0 %v8686_v3 }
  0x8d   :  { %v263_v49 = vpop.permute.xlu0 %262  ;;  %v273_v50 = vpop.permute.xlu1 %272 }
  0x91   :  { %v268_v51 = vpop.permute.xlu0 %267  ;;  %v278_v57 = vpop.permute.xlu1 %277 }
  0x95   :  { %v385_v23 = vpop.permute.xlu0 %384  ;;  %v390_v27 = vpop.permute.xlu1 %389 }
  0x99   :  { %v395_v30 = vpop.permute.xlu0 %394  ;;  %v400_v33 = vpop.permute.xlu1 %399 }
  0xee   :  { %v6808_v47 = vpop.f32.mrb[0].mxu0  ;;  %v6825_v8 = vpop.f32.mrb[0].mxu1 }
  0xef   :  { %8749 = vst [vmem:[#allocation2_spill] sm:$0xff] %v6808_v47  ;;  %v6810_v48 = vpop.f32.mrb[1].mxu0  ;;  %8751 = vst [vmem:[#allocation4_spill] sm:$0xff] %v6825_v8  ;;  %v6827_v12 = vpop.f32.mrb[1].mxu1 }
  0xf0   :  { %8750 = vst [vmem:[#allocation3_spill] sm:$0xff] %v6810_v48  ;;  %8752 = vst [vmem:[#allocation5_spill] sm:$0xff] %v6827_v12 }
  0xf6   :  { %v6086_v52 = vpop.f32.mrb[2].mxu0 }
  0xf7   :  { %v365_v53 = vadd.f32 %v6086_v52, %v268_v51  ;;  %v359_v54 = vpop.f32.mrb[3].mxu0 }
  0xf8   :  { %v360_v55 = vadd.f32 %v359_v54, %v263_v49 }
  0xf9   :  { %v379_v56 = vmax.f32 %v365_v53, 0.0 }
  0xfa   :  { %v378_v58 = vmax.f32 %v360_v55, 0.0  ;;  %v6089_v59 = vpop.f32.mrb[4].mxu0 }
  0xfb   :  { %v375_v60 = vadd.f32 %v6089_v59, %v278_v57  ;;  %v369_v61 = vpop.f32.mrb[5].mxu0 }
  0xfc   :  { %v6192_v62 = vpack.c.bf16 %v379_v56, %v378_v58  ;;  %v370_v63 = vadd.f32 %v369_v61, %v273_v50 }
  0xfd   :  { %v381_v0 = vmax.f32 %v375_v60, 0.0 }
  0xfe   :  { %v380_v1 = vmax.f32 %v370_v63, 0.0  ;;  %6193 = vmatprep.subr.bf16.mxu1 %v6192_v62 }
  0xff   :  { %6195 = vmatpush3.bf16.msra.mxu1 %v6192_v62 }
 0x100   :  { %v6196_v2 = vpack.c.bf16 %v381_v0, %v380_v1 }
 0x102   :  { %6197 = vmatprep.subr.bf16.mxu1 %v6196_v2 }
 0x103   :  { %6199 = vmatpush3.bf16.msra.mxu1 %v6196_v2 }
 0x104   :  { %5850 = vmatprep.subr.msk.mxu1 %vm8740_vm2, %v6846_v21 }
 0x106   :  { %6099 = vmatmul.mubr.msk.f32.vlgmr.msra.gmra.mrb[2].mxu1 %vm280_vm1, %v253_v5 }
 0x107   :  { %6101 = vmatprep.mubr.msk.f32.mxu1 %vm280_vm1, %v254_v6  ;;  %5851 = vmatpush1.msk.msra.mxu1 %vm8740_vm2, %v6838_v19 }
 0x10a   :  { %6102 = vmatmul.mubr.msk.f32.gmra.mrb[4].mxu1 %vm280_vm1, %v255_v7 }
 0x10b   :  { %692 = vmatprep.mubr.f32.mxu1 %v8686_v3 }
 0x1d9   :  { %v6100_v22 = vpop.f32.mrb[2].mxu1 }
 0x1da   :  { %v480_v24 = vpop.f32.mrb[3].mxu1  ;;  %v486_v29 = vadd.f32 %v6100_v22, %v390_v27 }
 0x1db   :  { %v481_v25 = vadd.f32 %v480_v24, %v385_v23 }
 0x1dd   :  { %v6103_v26 = vpop.f32.mrb[4].mxu1  ;;  %5846 = vmatmul.mubr.msk.f32.vlgmr.msra.gmra.mrb[6].mxu0 %vm8739_vm3, %v481_v25  ;;  %5852 = vmatmul.mubr.msk.f32.vlgmr.msra.gmra.mrb[6].mxu1 %vm8739_vm3, %v481_v25 }
 0x1de   :  { %v490_v28 = vpop.f32.mrb[5].mxu1  ;;  %609 = vmatprep.mubr.f32.mxu0 %v8686_v3  ;;  %698 = vmatprep.mubr.f32.mxu1 %v8686_v3  ;;  %v496_v34 = vadd.f32 %v6103_v26, %v400_v33  ;;  %v775_v33 = vld [vmem:[%s8669_s10] sm:$0xff] }
 0x1df   :  { %v491_v31 = vadd.f32 %v490_v28, %v395_v30 }
 0x1e1   :  { %5847 = vmatmul.mubr.msk.f32.gmra.mrb[8].mxu0 %vm8739_vm3, %v486_v29  ;;  %5853 = vmatmul.mubr.msk.f32.gmra.mrb[8].mxu1 %vm8739_vm3, %v486_v29 }
 0x1e2   :  { %615 = vmatprep.mubr.f32.mxu0 %v8686_v3  ;;  %704 = vmatprep.mubr.f32.mxu1 %v8686_v3 }
 0x1e5   :  { %5848 = vmatmul.mubr.msk.f32.gmra.mrb[10].mxu0 %vm8739_vm3, %v491_v31  ;;  %5854 = vmatmul.mubr.msk.f32.gmra.mrb[10].mxu1 %vm8739_vm3, %v491_v31 }
 0x1e6   :  { %621 = vmatprep.mubr.f32.mxu0 %v8686_v3  ;;  %710 = vmatprep.mubr.f32.mxu1 %v8686_v3 }
 0x1e9   :  { %5849 = vmatmul.mubr.msk.f32.gmra.mrb[12].mxu0 %vm8739_vm3, %v496_v34  ;;  %5855 = vmatmul.mubr.msk.f32.gmra.mrb[12].mxu1 %vm8739_vm3, %v496_v34  ;;  %v6952_v34 = vand.u32 127, %v504_v11  ;;  %v6972_v11 = vld [vmem:[%s8670_s4 + $0x10] sm:$0xff] }
 0x1ea   :  { %890 = vmatprep.mubr.bf16.mxu0 %v8684_v4  ;;  %933 = vmatprep.mubr.bf16.mxu1 %v8684_v4 }
 0x1eb   :  { %vm807_vm12 = vcmp.lt.s32.totalorder %v6952_v34, 17  ;;  %vm1058_vm14 = vcmp.lt.s32.totalorder %v6952_v34, 16 }
 0x2b0   :  { %v605_v35 = vpop.f32.mrb[6].mxu0  ;;  %v694_v36 = vpop.f32.mrb[6].mxu1 }
 0x2b1   :  { %v717_v37 = vmul.f32 %v605_v35, %v6808_v47  ;;  %v719_v39 = vmul.f32 %v694_v36, %v6825_v8  ;;  %v607_v40 = vpop.f32.mrb[7].mxu0  ;;  %v696_v41 = vpop.f32.mrb[7].mxu1  ;;  %v814_v35 = vsub.s32 0, %v6830_v14  ;;  %v6958_v36 = vld [vmem:[%s8670_s4 + $0x8] sm:$0xff] }
 0x2b2   :  { %v718_v42 = vmul.f32 %v607_v40, %v6810_v48  ;;  %v720_v43 = vmul.f32 %v696_v41, %v6827_v12  ;;  %v6977_v41 = vld [vmem:[%s8670_s4 + $0x18] sm:$0xff] }
 0x2b4   :  { %v611_v44 = vpop.f32.mrb[8].mxu0  ;;  %v700_v45 = vpop.f32.mrb[8].mxu1 }
 0x2b5   :  { %v721_v46 = vadd.f32 %v717_v37, %v611_v44  ;;  %v723_v49 = vadd.f32 %v719_v39, %v700_v45  ;;  %v613_v50 = vpop.f32.mrb[9].mxu0  ;;  %v702_v51 = vpop.f32.mrb[9].mxu1  ;;  %v6962_v37 = vrot.slane %v6958_v36, %v814_v35  ;;  %v6967_v39 = vld [vmem:[%s8670_s4] sm:$0xff] }
 0x2b6   :  { %v722_v52 = vadd.f32 %v718_v42, %v613_v50  ;;  %v724_v53 = vadd.f32 %v720_v43, %v702_v51  ;;  %v6982_v44 = vrot.slane %v6967_v39, %v814_v35  ;;  %v1065_v50 = vsub.s32 1, %v6830_v14 }
 0x2b7   :  { %v729_v54 = vmul.f32 0.2, %v721_v46  ;;  %v731_v55 = vmul.f32 0.2, %v723_v49  ;;  %vm725_vm4 = vcmp.ge.f32.partialorder %v721_v46, 0.0  ;;  %vm727_vm5 = vcmp.ge.f32.partialorder %v723_v49, 0.0 }
 0x2b8   :  { %v730_v56 = vmul.f32 0.2, %v722_v52  ;;  %v732_v57 = vmul.f32 0.2, %v724_v53  ;;  %v617_v58 = vpop.f32.mrb[10].mxu0  ;;  %v706_v59 = vpop.f32.mrb[10].mxu1 }
 0x2b9   :  { %v733_v60 = vsel %vm725_vm4, %v721_v46, %v729_v54  ;;  %v735_v61 = vsel %vm727_vm5, %v723_v49, %v731_v55  ;;  %v619_v62 = vpop.f32.mrb[11].mxu0  ;;  %vm726_vm6 = vcmp.ge.f32.partialorder %v722_v52, 0.0  ;;  %v708_v63 = vpop.f32.mrb[11].mxu1  ;;  %vm728_vm7 = vcmp.ge.f32.partialorder %v724_v53, 0.0 }
 0x2ba   :  { %v737_v0 = vmul.f32 %v733_v60, %v617_v58  ;;  %v739_v1 = vmul.f32 %v735_v61, %v706_v59  ;;  %v734_v2 = vsel %vm726_vm6, %v722_v52, %v730_v56  ;;  %v736_v5 = vsel %vm728_vm7, %v724_v53, %v732_v57 }
 0x2bb   :  { %v738_v6 = vmul.f32 %v734_v2, %v619_v62  ;;  %v740_v7 = vmul.f32 %v736_v5, %v708_v63  ;;  %v6986_v46 = vrot.slane %v6972_v11, %v814_v35  ;;  %v6989_v49 = vrot.slane %v6977_v41, %v814_v35 }
 0x2bc   :  { %v623_v9 = vpop.f32.mrb[12].mxu0  ;;  %v712_v10 = vpop.f32.mrb[12].mxu1  ;;  %v7004_v60 = vrot.slane %v6958_v36, %v1065_v50  ;;  %v7009_v5 = vrot.slane %v6977_v41, %v1065_v50  ;;  %vm1209_vm4 = vcmp.lt.s32.totalorder %v6952_v34, 15  ;;  %vm1360_vm5 = vcmp.lt.s32.totalorder %v6952_v34, 1 }
 0x2bd   :  { %v741_v13 = vadd.f32 %v737_v0, %v623_v9  ;;  %v743_v15 = vadd.f32 %v739_v1, %v712_v10  ;;  %v625_v16 = vpop.f32.mrb[13].mxu0  ;;  %v714_v17 = vpop.f32.mrb[13].mxu1  ;;  %v6382_v10 = vld [vmem:[%s8668_s9] sm:$0xff]   ;;  %vm1511_vm6 = vcmp.lt.s32.totalorder %v6952_v34, 127  ;;  %vm1662_vm7 = vcmp.lt.s32.totalorder %v6952_v34, 113 }
 0x2be   :  { %v742_v22 = vadd.f32 %v738_v6, %v625_v16  ;;  %v744_v23 = vadd.f32 %v740_v7, %v714_v17 }
 0x2bf   :  { %vm745_vm8 = vcmp.ge.f32.partialorder %v741_v13, 0.0  ;;  %v749_v24 = vmul.f32 0.2, %v741_v13  ;;  %v751_v25 = vmul.f32 0.2, %v743_v15  ;;  %vm747_vm11 = vcmp.ge.f32.partialorder %v743_v15, 0.0 }
 0x2c0   :  { %vm746_vm9 = vcmp.ge.f32.partialorder %v742_v22, 0.0  ;;  %v750_v26 = vmul.f32 0.2, %v742_v22  ;;  %vm748_vm10 = vcmp.ge.f32.partialorder %v744_v23, 0.0  ;;  %v752_v28 = vmul.f32 0.2, %v744_v23 }
 0x2c1   :  { %v6876_v27 = vsel %vm745_vm8, %v741_v13, %v749_v24  ;;  %v6886_v31 = vsel %vm747_vm11, %v743_v15, %v751_v25  ;;  %v7029_v25 = vrot.slane %v6967_v39, %v1065_v50  ;;  %vm1813_vm8 = vcmp.lt.s32.totalorder %v6952_v34, 112 }
 0x2c2   :  { %v6878_v29 = vsel %vm746_vm9, %v742_v22, %v750_v26  ;;  %797 = vrot.lane.b32.xlu0 %v6876_v27, %s6575_s3  ;;  %v6884_v30 = vsel %vm748_vm10, %v744_v23, %v752_v28  ;;  %v793_v13 = vpack.c.bf16 %v6876_v27, %v6876_v27  ;;  %v795_v17 = vpack.c.bf16 %v6886_v31, %v6886_v31 }
 0x2c3   :  { %799 = vrot.lane.b32.xlu1 %v6878_v29, %s6575_s3  ;;  %v794_v2 = vpack.c.bf16 %v6878_v29, %v6878_v29  ;;  %v796_v9 = vpack.c.bf16 %v6884_v30, %v6884_v30  ;;  %v1216_v28 = vsub.s32 2, %v6830_v14  ;;  %vm1964_vm9 = vcmp.lt.s32.totalorder %v6952_v34, 111 }
 0x2c6   :  { %803 = vrot.lane.b32.xlu0 %v6884_v30, %s6575_s3 }
 0x2c7   :  { %801 = vrot.lane.b32.xlu1 %v6886_v31, %s6575_s3 }
 0x2ca   :  { %1050 = vrot.lane.b32.xlu0 %v6876_v27, %s6576_s7 }
 0x2cb   :  { %1052 = vrot.lane.b32.xlu1 %v6878_v29, %s6576_s7 }
 0x2ce   :  { %1056 = vrot.lane.b32.xlu0 %v6884_v30, %s6576_s7 }
 0x2cf   :  { %1054 = vrot.lane.b32.xlu1 %v6886_v31, %s6576_s7 }
 0x2d2   :  { %1201 = vrot.lane.b32.xlu0 %v6876_v27, %s6577_s24 }
 0x2d3   :  { %1203 = vrot.lane.b32.xlu1 %v6878_v29, %s6577_s24 }
 0x2d6   :  { %1207 = vrot.lane.b32.xlu0 %v6884_v30, %s6577_s24 }
 0x2d7   :  { %1205 = vrot.lane.b32.xlu1 %v6886_v31, %s6577_s24 }
 0x2da   :  { %1352 = vrot.lane.b32.xlu0 %v6876_v27, %s6578_s25 }
 0x2db   :  { %1354 = vrot.lane.b32.xlu1 %v6878_v29, %s6578_s25 }
 0x2de   :  { %1358 = vrot.lane.b32.xlu0 %v6884_v30, %s6578_s25 }
 0x2df   :  { %1356 = vrot.lane.b32.xlu1 %v6886_v31, %s6578_s25 }
 0x2e2   :  { %1503 = vrot.lane.b32.xlu0 %v6876_v27, %s6579_s8 }
 0x2e3   :  { %1505 = vrot.lane.b32.xlu1 %v6878_v29, %s6579_s8 }
 0x2e6   :  { %1507 = vrot.lane.b32.xlu0 %v6886_v31, %s6579_s8 }
 0x2e7   :  { %1509 = vrot.lane.b32.xlu1 %v6884_v30, %s6579_s8 }
 0x2ea   :  { %1654 = vrot.lane.b32.xlu0 %v6876_v27, %s6580_s26 }
 0x2eb   :  { %1656 = vrot.lane.b32.xlu1 %v6878_v29, %s6580_s26 }
 0x2ee   :  { %1658 = vrot.lane.b32.xlu0 %v6886_v31, %s6580_s26 }
 0x2ef   :  { %1660 = vrot.lane.b32.xlu1 %v6884_v30, %s6580_s26 }
 0x2f2   :  { %1805 = vrot.lane.b32.xlu0 %v6876_v27, %s6581_s21 }
 0x2f3   :  { %1807 = vrot.lane.b32.xlu1 %v6878_v29, %s6581_s21 }
 0x2f6   :  { %1809 = vrot.lane.b32.xlu0 %v6886_v31, %s6581_s21 }
 0x2f7   :  { %1811 = vrot.lane.b32.xlu1 %v6884_v30, %s6581_s21 }
 0x2fa   :  { %1956 = vrot.lane.b32.xlu0 %v6876_v27, %s6582_s28  ;;  %v953_v27 = vsel %vm845_vm13, %v793_v13, 0  ;;  %v7077_v13 = vrot.slane %v6972_v11, %v1216_v28 }
 0x2fb   :  { %1958 = vrot.lane.b32.xlu1 %v6878_v29, %s6582_s28 }
 0x2fc   :  { %8759 = vst [vmem:[#allocation12_spill] sm:$0xff] %v7077_v13 }
 0x2fe   :  { %1960 = vrot.lane.b32.xlu0 %v6886_v31, %s6582_s28 }
 0x2ff   :  { %1962 = vrot.lane.b32.xlu1 %v6884_v30, %s6582_s28  ;;  %v7039_v30 = vrot.slane %v6972_v11, %v1065_v50  ;;  %v7052_v50 = vrot.slane %v6958_v36, %v1216_v28 }
 0x303   :  { %2167 = vperm.xlu1 %6380, %v775_v33   ;;  %v959_v33 = vsel %vm845_vm13, %v795_v17, 0 }
 0x334   :  { %v798_v40 = vpop.permute.xlu0 %797 }
 0x335   :  { %v800_v42 = vpop.permute.xlu1 %799 }
 0x336   :  { %v810_v43 = vsel %vm807_vm12, %v798_v40, %v800_v42 }
 0x337   :  { %v829_v45 = vmul.f32 %v6962_v37, %v810_v43 }
 0x338   :  { %v804_v51 = vpop.permute.xlu0 %803 }
 0x339   :  { %v833_v52 = vpack.c.bf16 %v829_v45, %v829_v45  ;;  %v811_v53 = vsel %vm807_vm12, %v804_v51, %v798_v40  ;;  %v802_v54 = vpop.permute.xlu1 %801 }
 0x33a   :  { %v828_v55 = vmul.f32 %v6982_v44, %v811_v53  ;;  %v808_v56 = vsel %vm807_vm12, %v802_v54, %v804_v51  ;;  %v809_v57 = vsel %vm807_vm12, %v800_v42, %v802_v54  ;;  %v7059_v53 = vrot.slane %v6977_v41, %v1216_v28 }
 0x33b   :  { %v830_v58 = vmul.f32 %v6986_v46, %v809_v57  ;;  %v831_v59 = vmul.f32 %v6989_v49, %v808_v56  ;;  %5857 = vmatprep.subr.msk.bf16.mxu0 %vm845_vm13, %v833_v52 }
 0x33c   :  { %v832_v61 = vpack.c.bf16 %v828_v55, %v828_v55  ;;  %v1051_v62 = vpop.permute.xlu0 %1050  ;;  %8757 = vst [vmem:[#allocation10_spill] sm:$0xff] %v7059_v53 }
 0x33d   :  { %v834_v63 = vpack.c.bf16 %v830_v58, %v830_v58  ;;  %v835_v0 = vpack.c.bf16 %v831_v59, %v831_v59  ;;  %v1053_v1 = vpop.permute.xlu1 %1052  ;;  %v6383_v59 = vld [vmem:[%s8668_s9 + $0x20] sm:$0xff]  }
 0x33e   :  { %v1061_v6 = vsel %vm1058_vm14, %v1051_v62, %v1053_v1  ;;  %v847_v7 = vsel %vm845_vm13, %v832_v61, 0 }
 0x33f   :  { %v1080_v15 = vmul.f32 %v7004_v60, %v1061_v6  ;;  %859 = vmatpush1.bf16.msra.mxu0 %v847_v7  ;;  %5859 = vmatprep.subr.msk.bf16.mxu1 %vm845_vm13, %v835_v0  ;;  %v853_v16 = vsel %vm845_vm13, %v834_v63, 0  ;;  %v7069_v6 = vrot.slane %v6967_v39, %v1216_v28  ;;  %v1367_v7 = vsub.s32 3, %v6830_v14 }
 0x340   :  { %v1057_v22 = vpop.permute.xlu0 %1056  ;;  %902 = vmatpush1.bf16.msra.mxu1 %v853_v16  ;;  %5862 = vmatprep.subr.msk.bf16.mxu0 %vm845_vm13, %v794_v2 }
 0x341   :  { %v1084_v23 = vpack.c.bf16 %v1080_v15, %v1080_v15  ;;  %5864 = vmatprep.subr.msk.bf16.mxu1 %vm845_vm13, %v796_v9  ;;  %v1055_v24 = vpop.permute.xlu1 %1054  ;;  %v1062_v29 = vsel %vm1058_vm14, %v1057_v22, %v1051_v62  ;;  %8758 = vst [vmem:[#allocation11_spill] sm:$0xff] %v7069_v6  ;;  %v7096_v28 = vrot.slane %v6977_v41, %v1367_v7 }
 0x342   :  { %v1059_v26 = vsel %vm1058_vm14, %v1055_v24, %v1057_v22  ;;  %5858 = vmatmul.mubr.msk.bf16.vlgmr.msra.gmra.mrb[16].mxu0 %vm8692_vm15, %v6382_v10  ;;  %v1060_v35 = vsel %vm1058_vm14, %v1053_v1, %v1055_v24  ;;  %v1079_v45 = vmul.f32 %v7029_v25, %v1062_v29  ;;  %v7089_v24 = vrot.slane %v6958_v36, %v1367_v7 }
 0x343   :  { %v1082_v31 = vmul.f32 %v7009_v5, %v1059_v26  ;;  %5860 = vmatmul.mubr.msk.bf16.vlgmr.msra.gmra.mrb[16].mxu1 %vm8692_vm15, %v6382_v10  ;;  %965 = vmatpush1.bf16.msra.mxu0 %v953_v27  ;;  %v1081_v51 = vmul.f32 %v7039_v30, %v1060_v35  ;;  %8761 = vst [vmem:[#allocation14_spill] sm:$0xff] %v7096_v28 }
 0x344   :  { %v1202_v40 = vpop.permute.xlu0 %1201  ;;  %1008 = vmatpush1.bf16.msra.mxu1 %v959_v33  ;;  %5867 = vmatprep.subr.msk.bf16.mxu0 %vm845_vm13, %v1084_v23  ;;  %v1083_v56 = vpack.c.bf16 %v1079_v45, %v1079_v45  ;;  %8760 = vst [vmem:[#allocation13_spill] sm:$0xff] %v7089_v24 }
 0x345   :  { %v1086_v42 = vpack.c.bf16 %v1082_v31, %v1082_v31  ;;  %v1204_v43 = vpop.permute.xlu1 %1203  ;;  %996 = vmatprep.mubr.bf16.mxu0 %v8684_v4  ;;  %1039 = vmatprep.mubr.bf16.mxu1 %v8684_v4  ;;  %v1085_v61 = vpack.c.bf16 %v1081_v51, %v1081_v51 }
 0x346   :  { %v1212_v52 = vsel %vm1209_vm4, %v1202_v40, %v1204_v43  ;;  %v1096_v9 = vsel %vm845_vm13, %v1083_v56, 0  ;;  %v7113_v56 = vrot.slane %v6972_v11, %v1367_v7 }
 0x347   :  { %5869 = vmatprep.subr.msk.bf16.mxu1 %vm845_vm13, %v1086_v42  ;;  %v1231_v57 = vmul.f32 %v7052_v50, %v1212_v52  ;;  %v1102_v15 = vsel %vm845_vm13, %v1085_v61, 0  ;;  %v7106_v52 = vrot.slane %v6967_v39, %v1367_v7  ;;  %v1518_v61 = vsub.s32 5, %v6830_v14 }
 0x348   :  { %v1208_v54 = vpop.permute.xlu0 %1207  ;;  %8763 = vst [vmem:[#allocation16_spill] sm:$0xff] %v7113_v56 }
 0x349   :  { %v1206_v55 = vpop.permute.xlu1 %1205  ;;  %v1235_v2 = vpack.c.bf16 %v1231_v57, %v1231_v57  ;;  %v1213_v10 = vsel %vm1209_vm4, %v1208_v54, %v1202_v40  ;;  %v6384_v40 = vld [vmem:[%s8668_s9 + $0x8] sm:$0xff]   ;;  %8762 = vst [vmem:[#allocation15_spill] sm:$0xff] %v7106_v52 }
 0x34a   :  { %v1210_v58 = vsel %vm1209_vm4, %v1206_v55, %v1208_v54  ;;  %v1211_v16 = vsel %vm1209_vm4, %v1204_v43, %v1206_v55  ;;  %v1230_v23 = vmul.f32 %v7069_v6, %v1213_v10 }
 0x34b   :  { %v1233_v62 = vmul.f32 %v7059_v53, %v1210_v58  ;;  %v1232_v26 = vmul.f32 %v7077_v13, %v1211_v16 }
 0x34c   :  { %v1353_v63 = vpop.permute.xlu0 %1352  ;;  %v1234_v31 = vpack.c.bf16 %v1230_v23, %v1230_v23 }
 0x34d   :  { %v1237_v0 = vpack.c.bf16 %v1233_v62, %v1233_v62  ;;  %v1355_v1 = vpop.permute.xlu1 %1354  ;;  %v1236_v42 = vpack.c.bf16 %v1232_v26, %v1232_v26 }
 0x34e   :  { %5863 = vmatmul.mubr.msk.bf16.vlgmr.msra.gmra.mrb[16].mxu0 %vm8692_vm15, %v6383_v59  ;;  %v1363_v27 = vsel %vm1360_vm5, %v1353_v63, %v1355_v1  ;;  %v1247_v54 = vsel %vm845_vm13, %v1234_v31, 0 }
 0x34f   :  { %1108 = vmatpush1.bf16.msra.mxu0 %v1096_v9  ;;  %5865 = vmatmul.mubr.msk.bf16.vlgmr.msra.gmra.mrb[16].mxu1 %vm8692_vm15, %v6383_v59  ;;  %v1382_v33 = vmul.f32 %v7089_v24, %v1363_v27  ;;  %v1253_v58 = vsel %vm845_vm13, %v1236_v42, 0  ;;  %v7133_v9 = vrot.slane %v6977_v41, %v1518_v61  ;;  %v7150_v42 = vrot.slane %v6972_v11, %v1518_v61 }
 0x350   :  { %1151 = vmatpush1.bf16.msra.mxu1 %v1102_v15  ;;  %5872 = vmatprep.subr.msk.bf16.mxu0 %vm845_vm13, %v1235_v2  ;;  %v1359_v17 = vpop.permute.xlu0 %1358  ;;  %v7126_v2 = vrot.slane %v6958_v36, %v1518_v61 }
 0x351   :  { %5874 = vmatprep.subr.msk.bf16.mxu1 %vm845_vm13, %v1237_v0  ;;  %v1357_v22 = vpop.permute.xlu1 %1356  ;;  %1139 = vmatprep.mubr.bf16.mxu0 %v8684_v4  ;;  %v1386_v51 = vpack.c.bf16 %v1382_v33, %v1382_v33  ;;  %v1364_v55 = vsel %vm1360_vm5, %v1359_v17, %v1353_v63  ;;  %8765 = vst [vmem:[#allocation18_spill] sm:$0xff] %v7133_v9  ;;  %8767 = vst [vmem:[#allocation20_spill] sm:$0xff] %v7150_v42 }
 0x352   :  { %1182 = vmatprep.mubr.bf16.mxu1 %v8684_v4  ;;  %v1361_v29 = vsel %vm1360_vm5, %v1357_v22, %v1359_v17  ;;  %v1362_v59 = vsel %vm1360_vm5, %v1355_v1, %v1357_v22  ;;  %v1381_v63 = vmul.f32 %v7106_v52, %v1364_v55  ;;  %8764 = vst [vmem:[#allocation17_spill] sm:$0xff] %v7126_v2  ;;  %v6385_v22 = vld [vmem:[%s8668_s9 + $0x10] sm:$0xff]   ;;  %v1669_v55 = vsub.s32 6, %v6830_v14 }
 0x353   :  { %v1384_v43 = vmul.f32 %v7096_v28, %v1361_v29  ;;  %v1383_v1 = vmul.f32 %v7113_v56, %v1362_v59  ;;  %v7143_v29 = vrot.slane %v6967_v39, %v1518_v61 }
 0x354   :  { %v1504_v35 = vpop.permute.xlu0 %1503  ;;  %v1385_v15 = vpack.c.bf16 %v1381_v63, %v1381_v63 }
 0x355   :  { %v1506_v45 = vpop.permute.xlu1 %1505  ;;  %v1388_v57 = vpack.c.bf16 %v1384_v43, %v1384_v43  ;;  %v1387_v23 = vpack.c.bf16 %v1383_v1, %v1383_v1  ;;  %8766 = vst [vmem:[#allocation19_spill] sm:$0xff] %v7143_v29 }
 0x356   :  { %v1398_v33 = vsel %vm845_vm13, %v1385_v15, 0 }
 0x358   :  { %v1508_v62 = vpop.permute.xlu0 %1507 }
 0x359   :  { %v1510_v0 = vpop.permute.xlu1 %1509  ;;  %v1513_v7 = vsel %vm1511_vm6, %v1506_v45, %v1508_v62 }
 0x35a   :  { %5868 = vmatmul.mubr.msk.bf16.vlgmr.msra.gmra.mrb[16].mxu0 %vm8692_vm15, %v6384_v40  ;;  %v1515_v10 = vsel %vm1511_vm6, %v1510_v0, %v1504_v35  ;;  %v1533_v16 = vmul.f32 %v7126_v2, %v1513_v7 }
 0x35b   :  { %1259 = vmatpush1.bf16.msra.mxu0 %v1247_v54  ;;  %5870 = vmatmul.mubr.msk.bf16.vlgmr.msra.gmra.mrb[16].mxu1 %vm8692_vm15, %v6384_v40  ;;  %v1535_v26 = vmul.f32 %v7133_v9, %v1515_v10  ;;  %v1514_v40 = vsel %vm1511_vm6, %v1504_v35, %v1506_v45  ;;  %v1512_v54 = vsel %vm1511_vm6, %v1508_v62, %v1510_v0  ;;  %v6386_v10 = vld [vmem:[%s8668_s9 + $0x18] sm:$0xff]  }
 0x35c   :  { %1302 = vmatpush1.bf16.msra.mxu1 %v1253_v58  ;;  %5877 = vmatprep.subr.msk.bf16.mxu0 %vm845_vm13, %v1386_v51  ;;  %v1655_v17 = vpop.permute.xlu0 %1654  ;;  %v1537_v31 = vpack.c.bf16 %v1533_v16, %v1533_v16  ;;  %v1404_v51 = vsel %vm845_vm13, %v1387_v23, 0  ;;  %v1532_v35 = vmul.f32 %v7143_v29, %v1514_v40  ;;  %v7163_v45 = vrot.slane %v6958_v36, %v1669_v55 }
 0x35d   :  { %5879 = vmatprep.subr.msk.bf16.mxu1 %vm845_vm13, %v1388_v57  ;;  %1290 = vmatprep.mubr.bf16.mxu0 %v8684_v4  ;;  %v1657_v27 = vpop.permute.xlu1 %1656  ;;  %v1539_v43 = vpack.c.bf16 %v1535_v26, %v1535_v26  ;;  %v1534_v59 = vmul.f32 %v7150_v42, %v1512_v54  ;;  %v7170_v62 = vrot.slane %v6977_v41, %v1669_v55 }
 0x35e   :  { %1333 = vmatprep.mubr.bf16.mxu1 %v8684_v4  ;;  %8768 = vst [vmem:[#allocation21_spill] sm:$0xff] %v7163_v45  ;;  %v1536_v63 = vpack.c.bf16 %v1532_v35, %v1532_v35  ;;  %v7180_v23 = vrot.slane %v6967_v39, %v1669_v55  ;;  %v7187_v40 = vrot.slane %v6972_v11, %v1669_v55  ;;  %v1820_v35 = vsub.s32 7, %v6830_v14 }
 0x35f   :  { %8769 = vst [vmem:[#allocation22_spill] sm:$0xff] %v7170_v62  ;;  %v1538_v15 = vpack.c.bf16 %v1534_v59, %v1534_v59 }
 0x360   :  { %v1659_v57 = vpop.permute.xlu0 %1658  ;;  %8770 = vst [vmem:[#allocation23_spill] sm:$0xff] %v7180_v23  ;;  %8771 = vst [vmem:[#allocation24_spill] sm:$0xff] %v7187_v40 }
 0x361   :  { %v1661_v58 = vpop.permute.xlu1 %1660  ;;  %v1664_v61 = vsel %vm1662_vm7, %v1657_v27, %v1659_v57 }
 0x362   :  { %v1666_v0 = vsel %vm1662_vm7, %v1661_v58, %v1655_v17  ;;  %v1684_v1 = vmul.f32 %v7163_v45, %v1664_v61  ;;  %v1663_v54 = vsel %vm1662_vm7, %v1659_v57, %v1661_v58  ;;  %v7207_v57 = vrot.slane %v6977_v41, %v1820_v35 }
 0x363   :  { %v1686_v16 = vmul.f32 %v7170_v62, %v1666_v0  ;;  %v1685_v14 = vmul.f32 %v7187_v40, %v1663_v54 }
 0x364   :  { %v1806_v7 = vpop.permute.xlu0 %1805  ;;  %v1688_v26 = vpack.c.bf16 %v1684_v1, %v1684_v1  ;;  %8773 = vst [vmem:[#allocation26_spill] sm:$0xff] %v7207_v57 }
 0x366   :  { %5873 = vmatmul.mubr.msk.bf16.vlgmr.msra.gmra.mrb[16].mxu0 %vm8692_vm15, %v6385_v22 }
 0x367   :  { %1410 = vmatpush1.bf16.msra.mxu0 %v1398_v33  ;;  %5875 = vmatmul.mubr.msk.bf16.vlgmr.msra.gmra.mrb[16].mxu1 %vm8692_vm15, %v6385_v22  ;;  %v1808_v22 = vpop.permute.xlu1 %1807  ;;  %v1665_v33 = vsel %vm1662_vm7, %v1655_v17, %v1657_v27  ;;  %v7200_v27 = vrot.slane %v6958_v36, %v1820_v35  ;;  %v6387_v36 = vld [vmem:[%s8668_s9 + $0x28] sm:$0xff]  }
 0x368   :  { %1453 = vmatpush1.bf16.msra.mxu1 %v1404_v51  ;;  %5882 = vmatprep.subr.msk.bf16.mxu0 %vm845_vm13, %v1537_v31  ;;  %v1549_v31 = vsel %vm845_vm13, %v1536_v63, 0  ;;  %v1555_v51 = vsel %vm845_vm13, %v1538_v15, 0  ;;  %v1810_v59 = vpop.permute.xlu0 %1809  ;;  %v1683_v17 = vmul.f32 %v7180_v23, %v1665_v33  ;;  %v1816_v33 = vsel %vm1813_vm8, %v1806_v7, %v1808_v22 }
 0x369   :  { %5884 = vmatprep.subr.msk.bf16.mxu1 %vm845_vm13, %v1539_v43  ;;  %1441 = vmatprep.mubr.bf16.mxu0 %v8684_v4  ;;  %v1690_v43 = vpack.c.bf16 %v1686_v16, %v1686_v16  ;;  %8772 = vst [vmem:[#allocation25_spill] sm:$0xff] %v7200_v27  ;;  %v1815_v55 = vsel %vm1813_vm8, %v1808_v22, %v1810_v59  ;;  %v5897_v22 = vld [vmem:[%s8670_s4 + $0x28] ss:$0 sm:$0xff] }
 0x36a   :  { %1484 = vmatprep.mubr.bf16.mxu1 %v8684_v4  ;;  %v1687_v0 = vpack.c.bf16 %v1683_v17, %v1683_v17  ;;  %v1835_v63 = vmul.f32 %v7200_v27, %v1815_v55 }
 0x36b   :  { %v1812_v61 = vpop.permute.xlu1 %1811 }
 0x36c   :  { %v1817_v58 = vsel %vm1813_vm8, %v1812_v61, %v1806_v7  ;;  %v1957_v1 = vpop.permute.xlu0 %1956  ;;  %v1839_v41 = vpack.c.bf16 %v1835_v63, %v1835_v63 }
 0x36d   :  { %v1837_v15 = vmul.f32 %v7207_v57, %v1817_v58 }
 0x36f   :  { %v1959_v16 = vpop.permute.xlu1 %1958 }
 0x370   :  { %v1961_v17 = vpop.permute.xlu0 %1960 }
 0x372   :  { %5878 = vmatmul.mubr.msk.bf16.vlgmr.msra.gmra.mrb[16].mxu0 %vm8692_vm15, %v6386_v10 }
 0x373   :  { %1561 = vmatpush1.bf16.msra.mxu0 %v1549_v31  ;;  %5880 = vmatmul.mubr.msk.bf16.vlgmr.msra.gmra.mrb[16].mxu1 %vm8692_vm15, %v6386_v10  ;;  %v1689_v10 = vpack.c.bf16 %v1685_v14, %v1685_v14  ;;  %v1700_v31 = vsel %vm845_vm13, %v1687_v0, 0  ;;  %v1963_v14 = vpop.permute.xlu1 %1962  ;;  %v6388_v0 = vld [vmem:[%s8668_s9 + $0x30] sm:$0xff]  }
 0x374   :  { %1604 = vmatpush1.bf16.msra.mxu1 %v1555_v51  ;;  %5887 = vmatprep.subr.msk.bf16.mxu0 %vm845_vm13, %v1688_v26  ;;  %v7217_v26 = vrot.slane %v6967_v39, %v1820_v35  ;;  %v1841_v51 = vpack.c.bf16 %v1837_v15, %v1837_v15  ;;  %v1814_v39 = vsel %vm1813_vm8, %v1810_v59, %v1812_v61  ;;  %v5899_v59 = vld [vmem:[%s8670_s4 + $0x38] ss:$0 sm:$0xff] }
 0x375   :  { %5889 = vmatprep.subr.msk.bf16.mxu1 %vm845_vm13, %v1690_v43  ;;  %1592 = vmatprep.mubr.bf16.mxu0 %v8684_v4  ;;  %v7224_v43 = vrot.slane %v6972_v11, %v1820_v35  ;;  %v1706_v54 = vsel %vm845_vm13, %v1689_v10, 0  ;;  %v1966_v35 = vsel %vm1964_vm9, %v1959_v16, %v1961_v17  ;;  %v1968_v61 = vsel %vm1964_vm9, %v1963_v14, %v1957_v1 }
 0x376   :  { %1635 = vmatprep.mubr.bf16.mxu1 %v8684_v4  ;;  %8774 = vst [vmem:[#allocation27_spill] sm:$0xff] %v7217_v26  ;;  %v1834_v11 = vmul.f32 %v7217_v26, %v1816_v33  ;;  %v1986_v58 = vmul.f32 %v5897_v22, %v1966_v35  ;;  %v6390_v35 = vld [vmem:[%s8668_s9 + $0x40] sm:$0xff]  }
 0x377   :  { %8775 = vst [vmem:[#allocation28_spill] sm:$0xff] %v7224_v43  ;;  %v1836_v7 = vmul.f32 %v7224_v43, %v1814_v39  ;;  %v1965_v39 = vsel %vm1964_vm9, %v1961_v17, %v1963_v14 }
 0x378   :  { %v1838_v55 = vpack.c.bf16 %v1834_v11, %v1834_v11  ;;  %v1990_v10 = vpack.c.bf16 %v1986_v58, %v1986_v58 }
 0x379   :  { %v1840_v63 = vpack.c.bf16 %v1836_v7, %v1836_v7  ;;  %v6389_v7 = vld [vmem:[%s8668_s9 + $0x38] sm:$0xff]  }
 0x37a   :  { %v1851_v15 = vsel %vm845_vm13, %v1838_v55, 0 }
 0x37e   :  { %5883 = vmatmul.mubr.msk.bf16.vlgmr.msra.gmra.mrb[16].mxu0 %vm8692_vm15, %v6387_v36 }
 0x37f   :  { %1712 = vmatpush1.bf16.msra.mxu0 %v1700_v31  ;;  %5885 = vmatmul.mubr.msk.bf16.vlgmr.msra.gmra.mrb[16].mxu1 %vm8692_vm15, %v6387_v36  ;;  %v1988_v36 = vmul.f32 %v5899_v59, %v1968_v61  ;;  %v1967_v31 = vsel %vm1964_vm9, %v1957_v1, %v1959_v16 }
 0x380   :  { %1755 = vmatpush1.bf16.msra.mxu1 %v1706_v54  ;;  %5892 = vmatprep.subr.msk.bf16.mxu0 %vm845_vm13, %v1839_v41  ;;  %v5896_v41 = vld [vmem:[%s8670_s4 + $0x20] ss:$0 sm:$0xff]  ;;  %v5898_v54 = vld [vmem:[%s8670_s4 + $0x30] ss:$0 sm:$0xff] }
 0x381   :  { %5894 = vmatprep.subr.msk.bf16.mxu1 %vm845_vm13, %v1841_v51  ;;  %1743 = vmatprep.mubr.bf16.mxu0 %v8684_v4  ;;  %v1992_v33 = vpack.c.bf16 %v1988_v36, %v1988_v36  ;;  %v1857_v51 = vsel %vm845_vm13, %v1840_v63, 0  ;;  %v1985_v1 = vmul.f32 %v5896_v41, %v1967_v31  ;;  %v1987_v16 = vmul.f32 %v5898_v54, %v1965_v39 }
 0x382   :  { %1786 = vmatprep.mubr.bf16.mxu1 %v8684_v4 }
 0x383   :  { %v1989_v11 = vpack.c.bf16 %v1985_v1, %v1985_v1  ;;  %v1991_v22 = vpack.c.bf16 %v1987_v16, %v1987_v16 }
 0x385   :  { %v2002_v17 = vsel %vm845_vm13, %v1989_v11, 0  ;;  %v2008_v14 = vsel %vm845_vm13, %v1991_v22, 0 }
 0x38a   :  { %5888 = vmatmul.mubr.msk.bf16.vlgmr.msra.gmra.mrb[16].mxu0 %vm8692_vm15, %v6388_v0 }
 0x38b   :  { %1863 = vmatpush1.bf16.msra.mxu0 %v1851_v15  ;;  %5890 = vmatmul.mubr.msk.bf16.vlgmr.msra.gmra.mrb[16].mxu1 %vm8692_vm15, %v6388_v0 }
 0x38c   :  { %1906 = vmatpush1.bf16.msra.mxu1 %v1857_v51  ;;  %5901 = vmatprep.subr.msk.bf16.mxu0 %vm845_vm13, %v1990_v10 }
 0x38d   :  { %5903 = vmatprep.subr.msk.bf16.mxu1 %vm845_vm13, %v1992_v33  ;;  %1894 = vmatprep.mubr.bf16.mxu0 %v8684_v4 }
 0x38e   :  { %1937 = vmatprep.mubr.bf16.mxu1 %v8684_v4 }
 0x396   :  { %5893 = vmatmul.mubr.msk.bf16.vlgmr.msra.gmra.mrb[16].mxu0 %vm8692_vm15, %v6389_v7 }
 0x397   :  { %2014 = vmatpush1.bf16.msra.mxu0 %v2002_v17  ;;  %5895 = vmatmul.mubr.msk.bf16.vlgmr.msra.gmra.mrb[16].mxu1 %vm8692_vm15, %v6389_v7 }
 0x398   :  { %2057 = vmatpush1.bf16.msra.mxu1 %v2008_v14  ;;  %2045 = vmatprep.mubr.bf16.mxu0 %v8684_v4 }
 0x399   :  { %2088 = vmatprep.mubr.bf16.mxu1 %v8684_v4  ;;  %2237 = vmatprep.subr.mxu0 %v6842_v20 }
 0x39a   :  { %5905 = vmatprep.subr.msk.mxu1 %vm8740_vm2, %v6842_v20 }
 0x3a2   :  { %5902 = vmatmul.mubr.msk.bf16.vlgmr.msra.gmra.mrb[16].mxu0 %vm8692_vm15, %v6390_v35 }
 0x3a3   :  { %5904 = vmatmul.mubr.msk.bf16.vlgmr.msra.gmra.mrb[16].mxu1 %vm8692_vm15, %v6390_v35  ;;  %2238 = vmatpush1.xpose.msra.mxu0 %v6836_v18 }
 0x3a4   :  { %2322 = vmatprep.subr.mxu0 %v6846_v21  ;;  %5906 = vmatpush1.msk.msra.mxu1 %vm8740_vm2, %v6836_v18 }
 0x3a5   :  { %2493 = vmatprep.mubr.f32.mxu1 %v8686_v3  ;;  %5911 = vmatprep.subr.msk.mxu1 %vm8740_vm2, %v6846_v21 }
 0x475   :  { %v7292_v59 = vpop.f32.mrb[16].mxu0 }
 0x476   :  { %v2117_v61 = vmul.f32 %v7292_v59, %v7292_v59  ;;  %v7296_v55 = vpop.f32.mrb[17].mxu0  ;;  %v7298_v58 = vpop.f32.mrb[16].mxu1 }
 0x477   :  { %v2107_v0 = vadd.f32 %v7296_v55, %v7292_v59  ;;  %v2118_v63 = vmul.f32 %v7296_v55, %v7296_v55  ;;  %v7304_v36 = vpop.f32.mrb[18].mxu0  ;;  %v7306_v10 = vpop.f32.mrb[17].mxu1  ;;  %v2119_v1 = vmul.f32 %v7298_v58, %v7298_v58 }
 0x478   :  { %v2121_v15 = vmul.f32 %v7304_v36, %v7304_v36  ;;  %v7310_v41 = vpop.f32.mrb[19].mxu0  ;;  %v7312_v31 = vpop.f32.mrb[18].mxu1  ;;  %v2120_v14 = vmul.f32 %v7306_v10, %v7306_v10 }
 0x479   :  { %v2112_v33 = vadd.f32 %v7310_v41, %v7304_v36  ;;  %v2122_v51 = vmul.f32 %v7310_v41, %v7310_v41  ;;  %v7318_v54 = vpop.f32.mrb[19].mxu1  ;;  %v2108_v39 = vadd.f32 %v2107_v0, %v7298_v58  ;;  %v2125_v16 = vadd.f32 %v2118_v63, %v2117_v61 }
 0x47a   :  { %v2123_v11 = vmul.f32 %v7312_v31, %v7312_v31  ;;  %v2124_v0 = vmul.f32 %v7318_v54, %v7318_v54 }
 0x47b   :  { %v2109_v7 = vadd.f32 %v2108_v39, %v7306_v10  ;;  %v2113_v22 = vadd.f32 %v2112_v33, %v7312_v31  ;;  %v2130_v17 = vadd.f32 %v2122_v51, %v2121_v15  ;;  %v2126_v35 = vadd.f32 %v2125_v16, %v2119_v1  ;;  %v776_v15 = vld [vmem:[%s8669_s10 + $0x8] sm:$0xff]  ;;  %v778_v33 = vld [vmem:[%s8669_s10 + $0x18] sm:$0xff]  ;;  %v2913_v39 = vld [vmem:[%s8671_s12] sm:$0xff] }
 0x47c   :  { %v2914_v51 = vld [vmem:[%s8671_s12 + $0x8] sm:$0xff]  ;;  %v2915_v16 = vld [vmem:[%s8671_s12 + $0x10] sm:$0xff] }
 0x47d   :  { %2110 = vadd.xlane.f32.xlu0 %v2109_v7  ;;  %v2114_v4 = vadd.f32 %v2113_v22, %v7318_v54  ;;  %v2131_v3 = vadd.f32 %v2130_v17, %v2123_v11  ;;  %v2127_v61 = vadd.f32 %v2126_v35, %v2120_v14  ;;  %v2918_v1 = vld [vmem:[%s8671_s12 + $0x28] sm:$0xff]  ;;  %v2920_v11 = vld [vmem:[%s8671_s12 + $0x38] sm:$0xff]  ;;  %v2917_v7 = vld [vmem:[%s8671_s12 + $0x20] sm:$0xff] }
 0x47e   :  { %v2930_v22 = vld [vmem:[%s8672_s14 + $0x8] sm:$0xff]  ;;  %v2919_v17 = vld [vmem:[%s8671_s12 + $0x30] sm:$0xff]  ;;  %v2932_v14 = vld [vmem:[%s8672_s14 + $0x18] sm:$0xff] }
 0x47f   :  { %v2132_v63 = vadd.f32 %v2131_v3, %v2124_v0  ;;  %2128 = vadd.xlane.f32.xlu1 %v2127_v61  ;;  %v777_v3 = vld [vmem:[%s8669_s10 + $0x10] sm:$0xff]  ;;  %v2929_v35 = vld [vmem:[%s8672_s14] sm:$0xff]  ;;  %v2934_v0 = vld [vmem:[%s8672_s14 + $0x28] sm:$0xff] }
 0x480   :  { %v2931_v61 = vld [vmem:[%s8672_s14 + $0x10] sm:$0xff] }
 0x481   :  { %2115 = vadd.xlane.f32.xlu0 %v2114_v4  ;;  %v2916_v4 = vld [vmem:[%s8671_s12 + $0x18] sm:$0xff] }
 0x485   :  { %2133 = vadd.xlane.f32.xlu0 %v2132_v63  ;;  %v2936_v63 = vld [vmem:[%s8672_s14 + $0x38] sm:$0xff] }
 0x490   :  { %2172 = vperm.xlu1 %6380, %v776_v15   ;;  %v2933_v15 = vld [vmem:[%s8672_s14 + $0x20] sm:$0xff] }
 0x494   :  { %2190 = vperm.xlu1 %6380, %v778_v33   ;;  %v788_v33 = vld [vmem:[%s8669_s10 + $0x68] sm:$0xff] }
 0x498   :  { %2944 = vperm.xlu1 %6380, %v2914_v51   ;;  %v2935_v51 = vld [vmem:[%s8672_s14 + $0x30] sm:$0xff] }
 0x49b   :  { %2185 = vperm.xlu0 %6379, %v777_v3   ;;  %v790_v3 = vld [vmem:[%s8669_s10 + $0x78] sm:$0xff] }
 0x49c   :  { %2954 = vperm.xlu1 %6380, %v2916_v4   ;;  %v787_v4 = vld [vmem:[%s8669_s10 + $0x60] sm:$0xff] }
 0x49f   :  { %2939 = vperm.xlu0 %6379, %v2913_v39   ;;  %v780_v39 = vld [vmem:[%s8669_s10 + $0x28] sm:$0xff] }
 0x4a0   :  { %2964 = vperm.xlu1 %6380, %v2918_v1   ;;  %v789_v1 = vld [vmem:[%s8669_s10 + $0x70] sm:$0xff] }
 0x4a3   :  { %2949 = vperm.xlu0 %6379, %v2915_v16   ;;  %v784_v16 = vld [vmem:[%s8669_s10 + $0x48] sm:$0xff] }
 0x4a4   :  { %2974 = vperm.xlu1 %6380, %v2920_v11   ;;  %v779_v11 = vld [vmem:[%s8669_s10 + $0x20] sm:$0xff] }
 0x4a7   :  { %2959 = vperm.xlu0 %6379, %v2917_v7   ;;  %v782_v7 = vld [vmem:[%s8669_s10 + $0x38] sm:$0xff] }
 0x4a8   :  { %3121 = vperm.xlu1 %6380, %v2930_v22   ;;  %v783_v22 = vld [vmem:[%s8669_s10 + $0x40] sm:$0xff] }
 0x4ab   :  { %2969 = vperm.xlu0 %6379, %v2919_v17   ;;  %v786_v17 = vld [vmem:[%s8669_s10 + $0x58] sm:$0xff] }
 0x4ac   :  { %3131 = vperm.xlu1 %6380, %v2932_v14   ;;  %v781_v14 = vld [vmem:[%s8669_s10 + $0x30] sm:$0xff] }
 0x4af   :  { %3116 = vperm.xlu0 %6379, %v2929_v35   ;;  %v792_v35 = vld [vmem:[%s8669_s10 + $0x88] sm:$0xff] }
 0x4b0   :  { %3141 = vperm.xlu1 %6380, %v2934_v0   ;;  %v785_v0 = vld [vmem:[%s8669_s10 + $0x50] sm:$0xff] }
 0x4b3   :  { %3126 = vperm.xlu0 %6379, %v2931_v61   ;;  %v2870_v61 = vsub.f32 1.0, %v792_v35 }
 0x4b4   :  { %3151 = vperm.xlu1 %6380, %v2936_v63   ;;  %v791_v63 = vld [vmem:[%s8669_s10 + $0x80] sm:$0xff] }
 0x4b7   :  { %3136 = vperm.xlu0 %6379, %v2933_v15   ;;  %v2869_v15 = vsub.f32 1.0, %v791_v63 }
 0x4b8   :  { %2730 = vperm.xlu1 %6380, %v788_v33   ;;  %v7431_v33 = vpop.permute.xlu1 %2167 }
 0x4bb   :  { %3146 = vperm.xlu0 %6379, %v2935_v51  }
 0x4bc   :  { %2748 = vperm.xlu1 %6380, %v790_v3  }
 0x4bf   :  { %2725 = vperm.xlu0 %6379, %v787_v4  }
 0x4c0   :  { %2614 = vperm.xlu1 %6380, %v780_v39  }
 0x4c3   :  { %2743 = vperm.xlu0 %6379, %v789_v1  }
 0x4c4   :  { %2766 = vperm.xlu1 %6380, %v784_v16  }
 0x4c7   :  { %2609 = vperm.xlu0 %6379, %v779_v11  }
 0x4c8   :  { %2632 = vperm.xlu1 %6380, %v782_v7  }
 0x4cb   :  { %2761 = vperm.xlu0 %6379, %v783_v22  }
 0x4cc   :  { %2784 = vperm.xlu1 %6380, %v786_v17  }
 0x4cf   :  { %2627 = vperm.xlu0 %6379, %v781_v14  }
 0x4d0   :  { %2858 = vperm.xlu1 %6380, %v792_v35  }
 0x4d3   :  { %2779 = vperm.xlu0 %6379, %v785_v0  }
 0x4d4   :  { %2886 = vperm.xlu1 %6380, %v2870_v61  }
 0x4d7   :  { %2853 = vperm.xlu0 %6379, %v791_v63  }
 0x4db   :  { %2881 = vperm.xlu0 %6379, %v2869_v15  }
 0x50a   :  { %v2111_v51 = vpop.xlane.xlu0 %2110 }
 0x50b   :  { %v2135_v3 = vmul.f32 0.001953125, %v2111_v51 }
 0x50c   :  { %v2129_v4 = vpop.xlane.xlu1 %2128 }
 0x50d   :  { %v2137_v39 = vmul.f32 0.001953125, %v2129_v4  ;;  %v2139_v1 = vmul.f32 %v2135_v3, %v2135_v3  ;;  %v2145_v15 = vsub.f32 %v7292_v59, %v2135_v3  ;;  %v2146_v51 = vsub.f32 %v7296_v55, %v2135_v3 }
 0x50e   :  { %v2116_v16 = vpop.xlane.xlu0 %2115 }
 0x50f   :  { %v2136_v11 = vmul.f32 0.001953125, %v2116_v16  ;;  %v2141_v7 = vsub.f32 %v2137_v39, %v2139_v1  ;;  %v2148_v16 = vsub.f32 %v7306_v10, %v2135_v3 }
 0x510   :  { %v2173_v48 = vpop.permute.xlu1 %2172 }
 0x511   :  { %v2143_v22 = vmax.f32 %v2141_v7, 0.0  ;;  %v2140_v14 = vmul.f32 %v2136_v11, %v2136_v11  ;;  %v2149_v7 = vsub.f32 %v7304_v36, %v2136_v11  ;;  %v2152_v10 = vsub.f32 %v7318_v54, %v2136_v11 }
 0x512   :  { %v2134_v17 = vpop.xlane.xlu0 %2133  ;;  %v2151_v54 = vsub.f32 %v7312_v31, %v2136_v11 }
 0x513   :  { %v2138_v35 = vmul.f32 0.001953125, %v2134_v17  ;;  %v2153_v0 = vadd.f32 1e-05, %v2143_v22 }
 0x514   :  { %v2191_v36 = vpop.permute.xlu1 %2190 }
 0x515   :  { %v2142_v8 = vsub.f32 %v2138_v35, %v2140_v14  ;;  %6400 = vrsqrt.f32 %v2153_v0 }
 0x517   :  { %v2144_v61 = vmax.f32 %v2142_v8, 0.0  ;;  %v2150_v8 = vsub.f32 %v7310_v41, %v2136_v11 }
 0x519   :  { %v2154_v63 = vadd.f32 1e-05, %v2144_v61 }
 0x51a   :  { %v2186_v22 = vpop.permute.xlu0 %2185 }
 0x51b   :  { %6402 = vrsqrt.f32 %v2154_v63 }
 0x51f   :  { %v6401_v12 = vpop.eup %6400 }
 0x520   :  { %v2157_v4 = vmul.f32 %v6401_v12, %v2145_v15  ;;  %v2158_v47 = vmul.f32 %v6401_v12, %v2146_v51  ;;  %v2160_v0 = vmul.f32 %v6401_v12, %v2148_v16 }
 0x522   :  { %v2175_v39 = vmul.f32 %v7431_v33, %v2157_v4  ;;  %v2176_v1 = vmul.f32 %v7431_v33, %v2158_v47  ;;  %v2147_v47 = vsub.f32 %v7298_v58, %v2135_v3 }
 0x524   :  { %v2193_v14 = vadd.f32 %v2186_v22, %v2175_v39  ;;  %v2194_v59 = vadd.f32 %v2186_v22, %v2176_v1 }
 0x525   :  { %v6403_v17 = vpop.eup %6402 }
 0x526   :  { %v2161_v35 = vmul.f32 %v6403_v17, %v2149_v7  ;;  %v2162_v55 = vmul.f32 %v6403_v17, %v2150_v8  ;;  %vm2202_vm10 = vcmp.ge.f32.partialorder %v2194_v59, 0.0  ;;  %v2210_v61 = vmul.f32 0.2, %v2194_v59 }
 0x527   :  { %vm2201_vm11 = vcmp.ge.f32.partialorder %v2193_v14, 0.0  ;;  %v2209_v63 = vmul.f32 0.2, %v2193_v14  ;;  %v2164_v16 = vmul.f32 %v6403_v17, %v2152_v10  ;;  %v2159_v7 = vmul.f32 %v6401_v12, %v2147_v47 }
 0x528   :  { %v2179_v15 = vmul.f32 %v2173_v48, %v2161_v35  ;;  %v2180_v51 = vmul.f32 %v2173_v48, %v2162_v55  ;;  %v7442_v4 = vsel %vm2202_vm10, %v2194_v59, %v2210_v61  ;;  %v2178_v8 = vmul.f32 %v7431_v33, %v2160_v0 }
 0x529   :  { %v7444_v41 = vsel %vm2201_vm11, %v2193_v14, %v2209_v63  ;;  %2301 = vmatprep.mubr.f32.mxu0 %v7442_v4  ;;  %v2163_v59 = vmul.f32 %v6403_v17, %v2151_v54  ;;  %v2177_v12 = vmul.f32 %v7431_v33, %v2159_v7  ;;  %v2226_v55 = vmul.f32 %v7442_v4, %v7442_v4  ;;  %v2907_v54 = vld [vmem:[%s8673_s11 + $0x10] sm:$0xff] }
 0x52a   :  { %v2197_v39 = vadd.f32 %v2191_v36, %v2179_v15  ;;  %v2198_v1 = vadd.f32 %v2191_v36, %v2180_v51  ;;  %2302 = vmatmul.mubr.f32.vlgmr.msra.gmra.mrb[14].mxu0 %v7444_v41  ;;  %v2182_v0 = vmul.f32 %v2173_v48, %v2164_v16  ;;  %v2196_v61 = vadd.f32 %v2186_v22, %v2178_v8 }
 0x52b   :  { %2323 = vmatpush1.xpose.msra.mxu0 %v6838_v19  ;;  %v2225_v31 = vmul.f32 %v7444_v41, %v7444_v41  ;;  %v2181_v11 = vmul.f32 %v2173_v48, %v2163_v59  ;;  %v2195_v63 = vadd.f32 %v2186_v22, %v2177_v12  ;;  %v2908_v59 = vld [vmem:[%s8673_s11 + $0x18] sm:$0xff]  ;;  %v2909_v12 = vld [vmem:[%s8673_s11 + $0x20] sm:$0xff] }
 0x52c   :  { %vm2206_vm13 = vcmp.ge.f32.partialorder %v2198_v1, 0.0  ;;  %v2214_v35 = vmul.f32 0.2, %v2198_v1  ;;  %vm2205_vm15 = vcmp.ge.f32.partialorder %v2197_v39, 0.0  ;;  %v2213_v58 = vmul.f32 0.2, %v2197_v39  ;;  %6201 = vmatprep.subr.bf16.mxu0 %v6753_v32 }
 0x52d   :  { %v2200_v15 = vadd.f32 %v2191_v36, %v2182_v0  ;;  %v2212_v33 = vmul.f32 0.2, %v2196_v61  ;;  %v2199_v47 = vadd.f32 %v2191_v36, %v2181_v11  ;;  %v2211_v10 = vmul.f32 0.2, %v2195_v63  ;;  %v2911_v0 = vld [vmem:[%s8673_s11 + $0x30] sm:$0xff] }
 0x52e   :  { %v7452_v3 = vsel %vm2206_vm13, %v2198_v1, %v2214_v35  ;;  %v7454_v14 = vsel %vm2205_vm15, %v2197_v39, %v2213_v58  ;;  %vm2204_vm15 = vcmp.ge.f32.partialorder %v2196_v61, 0.0  ;;  %vm2203_vm10 = vcmp.ge.f32.partialorder %v2195_v63, 0.0  ;;  %v2905_v58 = vld [vmem:[%s8673_s11] sm:$0xff] }
 0x52f   :  { %2306 = vmatprep.mubr.f32.mxu0 %v7452_v3  ;;  %v2230_v17 = vmul.f32 %v7452_v3, %v7452_v3  ;;  %v2229_v51 = vmul.f32 %v7454_v14, %v7454_v14  ;;  %v7467_v39 = vsel %vm2204_vm15, %v2196_v61, %v2212_v33  ;;  %v2216_v1 = vmul.f32 0.2, %v2200_v15  ;;  %v2912_v61 = vld [vmem:[%s8673_s11 + $0x38] sm:$0xff] }
 0x530   :  { %2307 = vmatmul.mubr.f32.gmra.mrb[20].mxu0 %v7454_v14  ;;  %vm2208_vm11 = vcmp.ge.f32.partialorder %v2200_v15, 0.0  ;;  %v7470_v48 = vsel %vm2203_vm10, %v2195_v63, %v2211_v10  ;;  %v2215_v22 = vmul.f32 0.2, %v2199_v47  ;;  %vm2207_vm13 = vcmp.ge.f32.partialorder %v2199_v47, 0.0 }
 0x531   :  { %2311 = vmatprep.mubr.f32.mxu0 %v2226_v55  ;;  %v7473_v16 = vsel %vm2208_vm11, %v2200_v15, %v2216_v1  ;;  %v2228_v7 = vmul.f32 %v7467_v39, %v7467_v39  ;;  %v2227_v8 = vmul.f32 %v7470_v48, %v7470_v48  ;;  %v2910_v55 = vld [vmem:[%s8673_s11 + $0x28] sm:$0xff] }
 0x532   :  { %v7478_v36 = vsel %vm2207_vm13, %v2199_v47, %v2215_v22 }
 0x533   :  { %v2231_v35 = vmul.f32 %v7478_v36, %v7478_v36 }
 0x534   :  { %2312 = vmatmul.mubr.f32.gmra.mrb[22].mxu0 %v2225_v31  ;;  %v8776_v31 = vmov 0.0  }
 0x535   :  { %2316 = vmatprep.mubr.f32.mxu0 %v2230_v17 }
 0x538   :  { %2317 = vmatmul.mubr.f32.gmra.mrb[24].mxu0 %v2229_v51 }
 0x539   :  { %2386 = vmatprep.mubr.f32.mxu0 %v7467_v39 }
 0x53c   :  { %2387 = vmatmul.mubr.f32.vlgmr.msra.gmra.mrb[14].mxu0 %v7470_v48 }
 0x53d   :  { %2391 = vmatprep.mubr.f32.mxu0 %v7473_v16  ;;  %6203 = vmatpush3.bf16.msra.mxu0 %v6753_v32  ;;  %v2232_v32 = vmul.f32 %v7473_v16, %v7473_v16 }
 0x53e   :  { %6205 = vmatprep.subr.bf16.mxu0 %v6771_v38 }
 0x540   :  { %2392 = vmatmul.mubr.f32.gmra.mrb[20].mxu0 %v7478_v36 }
 0x541   :  { %2396 = vmatprep.mubr.f32.mxu0 %v2228_v7  ;;  %6207 = vmatpush3.bf16.msra.mxu0 %v6771_v38  ;;  %v2906_v38 = vld [vmem:[%s8673_s11 + $0x8] sm:$0xff]  ;;  %v2945_v7 = vpop.permute.xlu1 %2944 }
 0x542   :  { %5949 = vmatprep.subr.msk.mxu0 %vm8740_vm2, %v6842_v20 }
 0x544   :  { %2397 = vmatmul.mubr.f32.gmra.mrb[22].mxu0 %v2227_v8  ;;  %v2940_v8 = vpop.permute.xlu0 %2939 }
 0x545   :  { %2401 = vmatprep.mubr.f32.mxu0 %v2232_v32 }
 0x548   :  { %2402 = vmatmul.mubr.f32.gmra.mrb[24].mxu0 %v2231_v35 }
 0x549   :  { %6112 = vmatprep.mubr.msk.f32.mxu0 %vm280_vm1, %v2905_v58 }
 0x54c   :  { %6113 = vmatmul.mubr.msk.f32.vlgmr.msra.gmra.mrb[26].mxu0 %vm280_vm1, %v2906_v38 }
 0x54d   :  { %6115 = vmatprep.mubr.msk.f32.mxu0 %vm280_vm1, %v2907_v54  ;;  %5950 = vmatpush1.msk.msra.mxu0 %vm8740_vm2, %v6836_v18 }
 0x550   :  { %6116 = vmatmul.mubr.msk.f32.gmra.mrb[28].mxu0 %vm280_vm1, %v2908_v59 }
 0x551   :  { %6118 = vmatprep.mubr.msk.f32.mxu0 %vm280_vm1, %v2909_v12 }
 0x554   :  { %6119 = vmatmul.mubr.msk.f32.gmra.mrb[30].mxu0 %vm280_vm1, %v2910_v55  ;;  %v2955_v55 = vpop.permute.xlu1 %2954 }
 0x555   :  { %6121 = vmatprep.mubr.msk.f32.mxu0 %vm280_vm1, %v2911_v0 }
 0x558   :  { %6122 = vmatmul.mubr.msk.f32.gmra.mrb[32].mxu0 %vm280_vm1, %v2912_v61  ;;  %v2950_v61 = vpop.permute.xlu0 %2949 }
 0x559   :  { %3371 = vmatprep.mubr.f32.mxu0 %v8776_v31 }
 0x60f   :  { %v2388_v11 = vpop.f32.mrb[14].mxu0 }
 0x610   :  { %v2407_v63 = vmul.f32 0.00390625, %v2388_v11  ;;  %v2390_v17 = vpop.f32.mrb[15].mxu0 }
 0x612   :  { %5907 = vmatmul.mubr.msk.f32.vlgmr.msra.gmra.mrb[14].mxu1 %vm8739_vm3, %v2407_v63  ;;  %v2411_v1 = vmul.f32 %v2407_v63, %v2407_v63 }
 0x613   :  { %v2393_v15 = vpop.f32.mrb[20].mxu0  ;;  %2499 = vmatprep.mubr.f32.mxu1 %v8776_v31  ;;  %5912 = vmatpush1.msk.msra.mxu1 %vm8740_vm2, %v6838_v19 }
 0x614   :  { %v2408_v33 = vmul.f32 0.00390625, %v2393_v15  ;;  %v2395_v51 = vpop.f32.mrb[21].mxu0 }
 0x616   :  { %5908 = vmatmul.mubr.msk.f32.gmra.mrb[20].mxu1 %vm8739_vm3, %v2408_v33  ;;  %v2412_v54 = vmul.f32 %v2408_v33, %v2408_v33 }
 0x617   :  { %v2398_v47 = vpop.f32.mrb[22].mxu0  ;;  %2505 = vmatprep.mubr.f32.mxu1 %v8776_v31 }
 0x618   :  { %v2409_v10 = vmul.f32 0.00390625, %v2398_v47  ;;  %v2400_v22 = vpop.f32.mrb[23].mxu0 }
 0x61a   :  { %v2413_v32 = vsub.f32 %v2409_v10, %v2411_v1 }
 0x61b   :  { %v2403_v35 = vpop.f32.mrb[24].mxu0 }
 0x61c   :  { %v2415_v58 = vmax.f32 %v2413_v32, 0.0  ;;  %v2410_v38 = vmul.f32 0.00390625, %v2403_v35  ;;  %v2405_v59 = vpop.f32.mrb[25].mxu0  ;;  %v2965_v35 = vpop.permute.xlu1 %2964 }
 0x61d   :  { %v2960_v59 = vpop.permute.xlu0 %2959 }
 0x61e   :  { %v2414_v12 = vsub.f32 %v2410_v38, %v2412_v54  ;;  %5909 = vmatmul.mubr.msk.f32.gmra.mrb[22].mxu1 %vm8739_vm3, %v2415_v58 }
 0x61f   :  { %v6114_v0 = vpop.f32.mrb[26].mxu0  ;;  %2511 = vmatprep.mubr.f32.mxu1 %v8776_v31 }
 0x620   :  { %v2416_v11 = vmax.f32 %v2414_v12, 0.0  ;;  %v3073_v17 = vadd.f32 %v6114_v0, %v2945_v7  ;;  %v3067_v15 = vpop.f32.mrb[27].mxu0 }
 0x621   :  { %v3068_v51 = vadd.f32 %v3067_v15, %v2940_v8 }
 0x622   :  { %v3107_v47 = vmax.f32 %v3073_v17, 0.0  ;;  %5910 = vmatmul.mubr.msk.f32.gmra.mrb[24].mxu1 %vm8739_vm3, %v2416_v11 }
 0x623   :  { %v3106_v10 = vmax.f32 %v3068_v51, 0.0  ;;  %v6117_v1 = vpop.f32.mrb[28].mxu0  ;;  %2582 = vmatprep.mubr.f32.mxu1 %v8776_v31 }
 0x624   :  { %v3083_v22 = vadd.f32 %v6117_v1, %v2955_v55  ;;  %v3077_v32 = vpop.f32.mrb[29].mxu0  ;;  %v2975_v55 = vpop.permute.xlu1 %2974 }
 0x625   :  { %v6208_v38 = vpack.c.bf16 %v3107_v47, %v3106_v10  ;;  %v3078_v54 = vadd.f32 %v3077_v32, %v2950_v61 }
 0x626   :  { %v3109_v18 = vmax.f32 %v3083_v22, 0.0  ;;  %5913 = vmatmul.mubr.msk.f32.vlgmr.msra.gmra.mrb[26].mxu1 %vm8739_vm3, %v2407_v63  ;;  %v2970_v63 = vpop.permute.xlu0 %2969 }
 0x627   :  { %v3108_v12 = vmax.f32 %v3078_v54, 0.0  ;;  %v6120_v7 = vpop.f32.mrb[30].mxu0  ;;  %6209 = vmatprep.subr.bf16.mxu1 %v6208_v38  ;;  %2588 = vmatprep.mubr.f32.mxu1 %v8776_v31  ;;  %v2923_v54 = vld [vmem:[%s8674_s13 + $0x10] sm:$0xff] }
 0x628   :  { %v3093_v8 = vadd.f32 %v6120_v7, %v2965_v35  ;;  %v3087_v0 = vpop.f32.mrb[31].mxu0  ;;  %6211 = vmatpush3.bf16.msra.mxu1 %v6208_v38  ;;  %v2927_v7 = vld [vmem:[%s8674_s13 + $0x30] sm:$0xff] }
 0x629   :  { %v6212_v17 = vpack.c.bf16 %v3109_v18, %v3108_v12  ;;  %v3088_v15 = vadd.f32 %v3087_v0, %v2960_v59  ;;  %v2925_v59 = vld [vmem:[%s8674_s13 + $0x20] sm:$0xff]  ;;  %v2926_v12 = vld [vmem:[%s8674_s13 + $0x28] sm:$0xff] }
 0x62a   :  { %v3111_v51 = vmax.f32 %v3093_v8, 0.0  ;;  %5914 = vmatmul.mubr.msk.f32.gmra.mrb[28].mxu1 %vm8739_vm3, %v2408_v33  ;;  %v2921_v33 = vld [vmem:[%s8674_s13] sm:$0xff]  ;;  %v2928_v8 = vld [vmem:[%s8674_s13 + $0x38] sm:$0xff]  ;;  %v7581_v0 = vpop.permute.xlu0 %3116 }
 0x62b   :  { %v3110_v47 = vmax.f32 %v3088_v15, 0.0  ;;  %v6123_v61 = vpop.f32.mrb[32].mxu0  ;;  %6213 = vmatprep.subr.bf16.mxu1 %v6212_v17  ;;  %2594 = vmatprep.mubr.f32.mxu1 %v8776_v31 }
 0x62c   :  { %v3103_v10 = vadd.f32 %v6123_v61, %v2975_v55  ;;  %v3097_v1 = vpop.f32.mrb[33].mxu0  ;;  %6215 = vmatpush3.bf16.msra.mxu1 %v6212_v17  ;;  %v7583_v17 = vpop.permute.xlu1 %3121 }
 0x62d   :  { %v6216_v22 = vpack.c.bf16 %v3111_v51, %v3110_v47  ;;  %v3098_v32 = vadd.f32 %v3097_v1, %v2970_v63 }
 0x62e   :  { %v3113_v35 = vmax.f32 %v3103_v10, 0.0  ;;  %5915 = vmatmul.mubr.msk.f32.gmra.mrb[30].mxu1 %vm8739_vm3, %v2415_v58  ;;  %v2922_v58 = vld [vmem:[%s8674_s13 + $0x8] sm:$0xff]  ;;  %v7585_v15 = vpop.permute.xlu0 %3126 }
 0x62f   :  { %v3112_v18 = vmax.f32 %v3098_v32, 0.0  ;;  %6217 = vmatprep.subr.bf16.mxu1 %v6216_v22  ;;  %2600 = vmatprep.mubr.f32.mxu1 %v8776_v31 }
 0x630   :  { %6219 = vmatpush3.bf16.msra.mxu1 %v6216_v22  ;;  %v7587_v51 = vpop.permute.xlu1 %3131 }
 0x631   :  { %v6220_v38 = vpack.c.bf16 %v3113_v35, %v3112_v18 }
 0x632   :  { %5916 = vmatmul.mubr.msk.f32.gmra.mrb[32].mxu1 %vm8739_vm3, %v2416_v11  ;;  %v2924_v11 = vld [vmem:[%s8674_s13 + $0x18] sm:$0xff]  ;;  %v7589_v55 = vpop.permute.xlu0 %3136 }
 0x633   :  { %6221 = vmatprep.subr.bf16.mxu1 %v6220_v38  ;;  %6140 = vmatprep.mubr.msk.f32.mxu1 %vm93_vm0, %v2921_v33 }
 0x634   :  { %6223 = vmatpush3.bf16.msra.mxu1 %v6220_v38  ;;  %v7591_v47 = vpop.permute.xlu1 %3141 }
 0x635   :  { %5959 = vmatprep.subr.msk.mxu1 %vm8740_vm2, %v6846_v21 }
 0x636   :  { %v7593_v61 = vpop.permute.xlu0 %3146 }
 0x637   :  { %6141 = vmatmul.mubr.msk.f32.vlgmr.msra.gmra.mrb[34].mxu1 %vm93_vm0, %v2922_v58 }
 0x638   :  { %6143 = vmatprep.mubr.msk.f32.mxu1 %vm93_vm0, %v2923_v54  ;;  %5960 = vmatpush1.msk.msra.mxu1 %vm8740_vm2, %v6838_v19  ;;  %v7595_v63 = vpop.permute.xlu1 %3151 }
 0x63a   :  { %v7597_v10 = vpop.permute.xlu0 %2725 }
 0x63b   :  { %6144 = vmatmul.mubr.msk.f32.gmra.mrb[36].mxu1 %vm93_vm0, %v2924_v11 }
 0x63c   :  { %6146 = vmatprep.mubr.msk.f32.mxu1 %vm93_vm0, %v2925_v59  ;;  %v7599_v1 = vpop.permute.xlu1 %2730 }
 0x63e   :  { %v7601_v22 = vpop.permute.xlu0 %2743 }
 0x63f   :  { %6147 = vmatmul.mubr.msk.f32.gmra.mrb[38].mxu1 %vm93_vm0, %v2926_v12 }
 0x640   :  { %6149 = vmatprep.mubr.msk.f32.mxu1 %vm93_vm0, %v2927_v7  ;;  %v7603_v35 = vpop.permute.xlu1 %2748 }
 0x642   :  { %v7605_v33 = vpop.permute.xlu0 %2609 }
 0x643   :  { %6150 = vmatmul.mubr.msk.f32.gmra.mrb[40].mxu1 %vm93_vm0, %v2928_v8 }
 0x644   :  { %3484 = vmatprep.mubr.f32.mxu1 %v8776_v31  ;;  %v7609_v54 = vpop.permute.xlu1 %2614 }
 0x646   :  { %v7611_v11 = vpop.permute.xlu0 %2761 }
 0x648   :  { %v7614_v7 = vpop.permute.xlu1 %2766 }
 0x64a   :  { %v7616_v20 = vpop.permute.xlu0 %2627 }
 0x64c   :  { %v7621_v45 = vpop.permute.xlu1 %2632 }
 0x6e5   :  { %v2495_v32 = vpop.f32.mrb[14].mxu1 }
 0x6e6   :  { %v2497_v18 = vpop.f32.mrb[15].mxu1  ;;  %v2617_v59 = vmul.f32 %v7605_v33, %v2495_v32 }
 0x6e7   :  { %v2618_v57 = vmul.f32 %v7605_v33, %v2497_v18 }
 0x6e8   :  { %v2635_v43 = vadd.f32 %v7616_v20, %v2617_v59 }
 0x6e9   :  { %v2501_v38 = vpop.f32.mrb[20].mxu1 }
 0x6ea   :  { %v7607_v58 = vpop.f32.mrb[21].mxu1  ;;  %v2621_v26 = vmul.f32 %v7609_v54, %v2501_v38 }
 0x6ec   :  { %v2639_v9 = vadd.f32 %v7621_v45, %v2621_v26  ;;  %v2692_v26 = vsub.f32 %v7442_v4, %v2497_v18 }
 0x6f1   :  { %v2507_v12 = vpop.f32.mrb[22].mxu1 }
 0x6f2   :  { %v2699_v8 = vadd.f32 1e-05, %v2507_v12  ;;  %v2509_v19 = vpop.f32.mrb[23].mxu1  ;;  %v2636_v12 = vadd.f32 %v7616_v20, %v2618_v57 }
 0x6f3   :  { %v2700_v21 = vadd.f32 1e-05, %v2509_v19  ;;  %v5917_v19 = vmul.f32 -1.442695, %v2635_v43 }
 0x6f4   :  { %6404 = vrsqrt.f32 %v2699_v8  ;;  %v2622_v8 = vmul.f32 %v7609_v54, %v7607_v58 }
 0x6f5   :  { %6406 = vrsqrt.f32 %v2700_v21  ;;  %v2513_v27 = vpop.f32.mrb[24].mxu1  ;;  %v5918_v21 = vmul.f32 -1.442695, %v2636_v12 }
 0x6f6   :  { %v2703_v62 = vadd.f32 1e-05, %v2513_v27  ;;  %v2515_v40 = vpop.f32.mrb[25].mxu1  ;;  %v5921_v27 = vmul.f32 -1.442695, %v2639_v9  ;;  %v2640_v29 = vadd.f32 %v7621_v45, %v2622_v8 }
 0x6f7   :  { %v2704_v23 = vadd.f32 1e-05, %v2515_v40  ;;  %v2691_v40 = vsub.f32 %v7444_v41, %v2495_v32 }
 0x6f8   :  { %6408 = vrsqrt.f32 %v2703_v62  ;;  %v5922_v12 = vmul.f32 -1.442695, %v2640_v29 }
 0x6f9   :  { %v7627_v42 = vpop.f32.mrb[26].mxu1  ;;  %6410 = vrsqrt.f32 %v2704_v23  ;;  %v2695_v23 = vsub.f32 %v7454_v14, %v2501_v38 }
 0x6fa   :  { %v7629_v59 = vpop.f32.mrb[27].mxu1  ;;  %6412 = vpow2.f32 %v5917_v19 }
 0x6fb   :  { %6414 = vpow2.f32 %v5918_v21  ;;  %v2696_v21 = vsub.f32 %v7452_v3, %v7607_v58 }
 0x6fc   :  { %6416 = vpow2.f32 %v5921_v27  ;;  %v7647_v27 = vpop.permute.xlu0 %2779 }
 0x6fd   :  { %v7633_v57 = vpop.f32.mrb[28].mxu1  ;;  %6418 = vpow2.f32 %v5922_v12 }
 0x6fe   :  { %v6405_v62 = vpop.eup %6404  ;;  %v7636_v43 = vpop.f32.mrb[29].mxu1 }
 0x6ff   :  { %v6407_v2 = vpop.eup %6406  ;;  %v2715_v28 = vmul.f32 %v6405_v62, %v2691_v40 }
 0x700   :  { %v2716_v52 = vmul.f32 %v6407_v2, %v2692_v26 }
 0x701   :  { %v2733_v32 = vmul.f32 %v7597_v10, %v2715_v28  ;;  %v2596_v9 = vpop.f32.mrb[30].mxu1 }
 0x702   :  { %v6409_v19 = vpop.eup %6408  ;;  %v2734_v8 = vmul.f32 %v7597_v10, %v2716_v52  ;;  %v2701_v56 = vadd.f32 1e-05, %v2596_v9  ;;  %v2598_v24 = vpop.f32.mrb[31].mxu1 }
 0x703   :  { %v2751_v18 = vadd.f32 %v7601_v22, %v2733_v32  ;;  %v2719_v53 = vmul.f32 %v6409_v19, %v2695_v23  ;;  %v2702_v6 = vadd.f32 1e-05, %v2598_v24  ;;  %v6411_v40 = vpop.eup %6410  ;;  %v2619_v19 = vmul.f32 %v7605_v33, %v7627_v42 }
 0x704   :  { %v2752_v2 = vadd.f32 %v7601_v22, %v2734_v8  ;;  %v2720_v62 = vmul.f32 %v6411_v40, %v2696_v21  ;;  %6420 = vrsqrt.f32 %v2701_v56  ;;  %v6413_v23 = vpop.eup %6412 }
 0x705   :  { %v2769_v29 = vmul.f32 %v7611_v11, %v2751_v18  ;;  %v2737_v28 = vmul.f32 %v7599_v1, %v2719_v53  ;;  %v2602_v38 = vpop.f32.mrb[32].mxu1  ;;  %6422 = vrsqrt.f32 %v2702_v6  ;;  %v2620_v18 = vmul.f32 %v7605_v33, %v7629_v59  ;;  %v6415_v21 = vpop.eup %6414 }
 0x706   :  { %v2770_v52 = vmul.f32 %v7611_v11, %v2752_v2  ;;  %v2705_v26 = vadd.f32 1e-05, %v2602_v38  ;;  %v2604_v24 = vpop.f32.mrb[33].mxu1  ;;  %v2738_v53 = vmul.f32 %v7599_v1, %v2720_v62  ;;  %v7659_v2 = vpop.permute.xlu1 %2784  ;;  %v2667_v6 = vadd.f32 1.0, %v6413_v23 }
 0x707   :  { %v2787_v58 = vadd.f32 %v7647_v27, %v2769_v29  ;;  %v2755_v32 = vadd.f32 %v7603_v35, %v2737_v28  ;;  %v2706_v12 = vadd.f32 1e-05, %v2604_v24  ;;  %v2623_v28 = vmul.f32 %v7609_v54, %v7633_v57 }
 0x708   :  { %v2788_v9 = vadd.f32 %v7647_v27, %v2770_v52  ;;  %6424 = vrsqrt.f32 %v2705_v26  ;;  %v2756_v29 = vadd.f32 %v7603_v35, %v2738_v53  ;;  %v6417_v52 = vpop.eup %6416  ;;  %v2624_v26 = vmul.f32 %v7609_v54, %v7636_v43 }
 0x709   :  { %v5925_v8 = vmul.f32 -1.442695, %v2787_v58  ;;  %v2773_v56 = vmul.f32 %v7614_v7, %v2755_v32  ;;  %6426 = vrsqrt.f32 %v2706_v12  ;;  %v2637_v58 = vadd.f32 %v7616_v20, %v2619_v19  ;;  %v6419_v19 = vpop.eup %6418 }
 0x70a   :  { %v5926_v40 = vmul.f32 -1.442695, %v2788_v9  ;;  %v6142_v38 = vpop.f32.mrb[34].mxu1  ;;  %v2774_v33 = vmul.f32 %v7614_v7, %v2756_v29  ;;  %v2668_v32 = vadd.f32 1.0, %v6415_v21  ;;  %v2638_v9 = vadd.f32 %v7616_v20, %v2620_v18 }
 0x70b   :  { %v2791_v62 = vadd.f32 %v7659_v2, %v2773_v56  ;;  %v3244_v24 = vpop.f32.mrb[35].mxu1  ;;  %6428 = vpow2.f32 %v5925_v8  ;;  %v2671_v53 = vadd.f32 1.0, %v6417_v52  ;;  %v2641_v13 = vadd.f32 %v7621_v45, %v2623_v28 }
 0x70c   :  { %v3245_v23 = vadd.f32 %v3244_v24, %v7581_v0  ;;  %6430 = vpow2.f32 %v5926_v40  ;;  %v2792_v56 = vadd.f32 %v7659_v2, %v2774_v33  ;;  %v2693_v0 = vsub.f32 %v7470_v48, %v7627_v42 }
 0x70d   :  { %v5929_v12 = vmul.f32 -1.442695, %v2791_v62  ;;  %6432 = vrcp.f32 %v2667_v6  ;;  %v2642_v8 = vadd.f32 %v7621_v45, %v2624_v26  ;;  %v5919_v6 = vmul.f32 -1.442695, %v2637_v58 }
 0x70e   :  { %v7673_v54 = vpop.f32.mrb[36].mxu1  ;;  %5951 = vmatmul.mubr.msk.f32.vlgmr.msra.gmra.mrb[34].mxu0 %vm8739_vm3, %v3245_v23  ;;  %5961 = vmatmul.mubr.msk.f32.vlgmr.msra.gmra.mrb[42].mxu1 %vm8739_vm3, %v3245_v23  ;;  %v6421_v20 = vpop.eup %6420  ;;  %v5930_v18 = vmul.f32 -1.442695, %v2792_v56  ;;  %v2694_v40 = vsub.f32 %v7467_v39, %v7629_v59  ;;  %v3250_v29 = vadd.f32 %v6142_v38, %v7583_v17  ;;  %v5920_v52 = vmul.f32 -1.442695, %v2638_v9 }
 0x70f   :  { %v3254_v21 = vpop.f32.mrb[37].mxu1  ;;  %3377 = vmatprep.mubr.f32.mxu0 %v8776_v31  ;;  %3490 = vmatprep.mubr.f32.mxu1 %v8776_v31  ;;  %6434 = vpow2.f32 %v5929_v12  ;;  %v6423_v28 = vpop.eup %6422  ;;  %v2697_v42 = vsub.f32 %v7478_v36, %v7633_v57  ;;  %v2717_v45 = vmul.f32 %v6421_v20, %v2693_v0  ;;  %v5923_v26 = vmul.f32 -1.442695, %v2641_v13 }
 0x710   :  { %6436 = vrcp.f32 %v2668_v32  ;;  %v2698_v24 = vsub.f32 %v7473_v16, %v7636_v43  ;;  %v2718_v33 = vmul.f32 %v6423_v28, %v2694_v40  ;;  %v5924_v59 = vmul.f32 -1.442695, %v2642_v8 }
 0x711   :  { %6438 = vrcp.f32 %v2671_v53  ;;  %v2735_v38 = vmul.f32 %v7597_v10, %v2717_v45  ;;  %v3255_v32 = vadd.f32 %v3254_v21, %v7585_v15  ;;  %v2672_v9 = vadd.f32 1.0, %v6419_v19 }
 0x712   :  { %v6425_v62 = vpop.eup %6424  ;;  %v7689_v58 = vpop.f32.mrb[38].mxu1  ;;  %5952 = vmatmul.mubr.msk.f32.gmra.mrb[36].mxu0 %vm8739_vm3, %v3250_v29  ;;  %5962 = vmatmul.mubr.msk.f32.gmra.mrb[44].mxu1 %vm8739_vm3, %v3250_v29  ;;  %6440 = vpow2.f32 %v5930_v18  ;;  %v2736_v13 = vmul.f32 %v7597_v10, %v2718_v33  ;;  %v3260_v29 = vadd.f32 %v7673_v54, %v7587_v51 }
 0x713   :  { %v6427_v17 = vpop.eup %6426  ;;  %v2721_v23 = vmul.f32 %v6425_v62, %v2697_v42  ;;  %v3264_v57 = vpop.f32.mrb[39].mxu1  ;;  %3383 = vmatprep.mubr.f32.mxu0 %v8776_v31  ;;  %3496 = vmatprep.mubr.f32.mxu1 %v8776_v31  ;;  %6442 = vpow2.f32 %v5919_v6  ;;  %v2753_v53 = vadd.f32 %v7601_v22, %v2735_v38 }
 0x714   :  { %v2722_v43 = vmul.f32 %v6427_v17, %v2698_v24  ;;  %6444 = vpow2.f32 %v5920_v52  ;;  %v2754_v8 = vadd.f32 %v7601_v22, %v2736_v13  ;;  %v7727_v38 = vpop.permute.xlu0 %2853 }
 0x715   :  { %v6429_v12 = vpop.eup %6428  ;;  %v2739_v56 = vmul.f32 %v7599_v1, %v2721_v23  ;;  %6446 = vpow2.f32 %v5923_v26  ;;  %v2771_v10 = vmul.f32 %v7611_v11, %v2753_v53 }
 0x716   :  { %v6431_v0 = vpop.eup %6430  ;;  %v2740_v20 = vmul.f32 %v7599_v1, %v2722_v43  ;;  %v7702_v18 = vpop.f32.mrb[40].mxu1  ;;  %5953 = vmatmul.mubr.msk.f32.gmra.mrb[38].mxu0 %vm8739_vm3, %v3255_v32  ;;  %5963 = vmatmul.mubr.msk.f32.gmra.mrb[46].mxu1 %vm8739_vm3, %v3255_v32  ;;  %v2819_v15 = vadd.f32 1.0, %v6429_v12  ;;  %6448 = vpow2.f32 %v5924_v59  ;;  %v2772_v6 = vmul.f32 %v7611_v11, %v2754_v8 }
 0x717   :  { %v2757_v19 = vadd.f32 %v7603_v35, %v2739_v56  ;;  %v7708_v21 = vpop.f32.mrb[41].mxu1  ;;  %3389 = vmatprep.mubr.f32.mxu0 %v8776_v31  ;;  %3502 = vmatprep.mubr.f32.mxu1 %v8776_v31  ;;  %v2820_v22 = vadd.f32 1.0, %v6431_v0  ;;  %v6433_v1 = vpop.eup %6432  ;;  %v2789_v52 = vadd.f32 %v7647_v27, %v2771_v10 }
 0x718   :  { %v2758_v40 = vadd.f32 %v7603_v35, %v2740_v20  ;;  %6450 = vrcp.f32 %v2819_v15  ;;  %v2790_v45 = vadd.f32 %v7647_v27, %v2772_v6  ;;  %v3265_v27 = vadd.f32 %v3264_v57, %v7589_v55  ;;  %v7744_v20 = vpop.permute.xlu0 %2881 }
 0x719   :  { %v6435_v28 = vpop.eup %6434  ;;  %v2775_v42 = vmul.f32 %v7614_v7, %v2757_v19  ;;  %6452 = vrcp.f32 %v2820_v22  ;;  %v5927_v26 = vmul.f32 -1.442695, %v2789_v52  ;;  %v2843_v32 = vmul.f32 %v6433_v1, %v7444_v41 }
 0x71a   :  { %6454 = vrcp.f32 %v2672_v9  ;;  %v2776_v62 = vmul.f32 %v7614_v7, %v2758_v40  ;;  %5954 = vmatmul.mubr.msk.f32.gmra.mrb[40].mxu0 %vm8739_vm3, %v3260_v29  ;;  %5964 = vmatmul.mubr.msk.f32.gmra.mrb[48].mxu1 %vm8739_vm3, %v3260_v29  ;;  %v2823_v35 = vadd.f32 1.0, %v6435_v28  ;;  %v6437_v11 = vpop.eup %6436  ;;  %v5928_v24 = vmul.f32 -1.442695, %v2790_v45  ;;  %v7736_v9 = vpop.permute.xlu1 %2858 }
 0x71b   :  { %v2793_v51 = vadd.f32 %v7659_v2, %v2775_v42  ;;  %3395 = vmatprep.mubr.f32.mxu0 %v8776_v31  ;;  %3508 = vmatprep.mubr.f32.mxu1 %v8776_v31  ;;  %v6439_v54 = vpop.eup %6438  ;;  %v2844_v56 = vmul.f32 %v6437_v11, %v7442_v4  ;;  %v3275_v10 = vadd.f32 %v7708_v21, %v7593_v61 }
 0x71c   :  { %v2794_v33 = vadd.f32 %v7659_v2, %v2776_v62  ;;  %6456 = vrcp.f32 %v2823_v35  ;;  %v6441_v7 = vpop.eup %6440  ;;  %v3270_v2 = vadd.f32 %v7689_v58, %v7591_v47  ;;  %v2861_v1 = vmul.f32 %v7727_v38, %v2843_v32 }
 0x71d   :  { %v5931_v17 = vmul.f32 -1.442695, %v2793_v51  ;;  %6458 = vpow2.f32 %v5927_v26  ;;  %v6443_v59 = vpop.eup %6442  ;;  %v2824_v13 = vadd.f32 1.0, %v6441_v7  ;;  %v2847_v40 = vmul.f32 %v6439_v54, %v7454_v14 }
 0x71e   :  { %v5932_v23 = vmul.f32 -1.442695, %v2794_v33  ;;  %5955 = vmatmul.mubr.msk.f32.gmra.mrb[42].mxu0 %vm8739_vm3, %v3265_v27  ;;  %5965 = vmatmul.mubr.msk.f32.gmra.mrb[50].mxu1 %vm8739_vm3, %v3265_v27  ;;  %6460 = vpow2.f32 %v5928_v24  ;;  %v6445_v43 = vpop.eup %6444  ;;  %v2669_v53 = vadd.f32 1.0, %v6443_v59  ;;  %v2887_v45 = vpop.permute.xlu1 %2886  ;;  %v3280_v62 = vadd.f32 %v7702_v18, %v7595_v63 }
 0x71f   :  { %3401 = vmatprep.mubr.f32.mxu0 %v8776_v31  ;;  %3514 = vmatprep.mubr.f32.mxu1 %v8776_v31  ;;  %6462 = vpow2.f32 %v5931_v17  ;;  %v6447_v55 = vpop.eup %6446  ;;  %v2670_v8 = vadd.f32 1.0, %v6445_v43  ;;  %v2865_v54 = vmul.f32 %v7736_v9, %v2847_v40  ;;  %v8777_v18 = vmov 0  }
 0x720   :  { %6464 = vrcp.f32 %v2824_v13  ;;  %v6449_v57 = vpop.eup %6448  ;;  %v2673_v15 = vadd.f32 1.0, %v6447_v55 }
 0x721   :  { %6466 = vpow2.f32 %v5932_v23  ;;  %v2674_v22 = vadd.f32 1.0, %v6449_v57 }
 0x722   :  { %v6451_v12 = vpop.eup %6450  ;;  %5956 = vmatmul.mubr.msk.f32.gmra.mrb[44].mxu0 %vm8739_vm3, %v3270_v2  ;;  %5966 = vmatmul.mubr.msk.f32.gmra.mrb[52].mxu1 %vm8739_vm3, %v3270_v2  ;;  %6468 = vrcp.f32 %v2669_v53 }
 0x723   :  { %v6453_v0 = vpop.eup %6452  ;;  %3407 = vmatprep.mubr.f32.mxu0 %v8776_v31  ;;  %3520 = vmatprep.mubr.f32.mxu1 %v8776_v31  ;;  %v2871_v47 = vmul.f32 %v6451_v12, %v7444_v41  ;;  %v2862_v41 = vmul.f32 %v7727_v38, %v2844_v56  ;;  %6470 = vrcp.f32 %v2670_v8 }
 0x724   :  { %v6455_v58 = vpop.eup %6454  ;;  %v2872_v19 = vmul.f32 %v6453_v0, %v7442_v4  ;;  %6472 = vrcp.f32 %v2673_v15 }
 0x725   :  { %v2889_v6 = vmul.f32 %v7744_v20, %v2871_v47  ;;  %v2848_v52 = vmul.f32 %v6455_v58, %v7452_v3  ;;  %6474 = vrcp.f32 %v2674_v22 }
 0x726   :  { %v6457_v29 = vpop.eup %6456  ;;  %5957 = vmatmul.mubr.msk.f32.gmra.mrb[46].mxu0 %vm8739_vm3, %v3275_v10  ;;  %5967 = vmatmul.mubr.msk.f32.gmra.mrb[54].mxu1 %vm8739_vm3, %v3275_v10  ;;  %v2890_v28 = vmul.f32 %v7744_v20, %v2872_v19 }
 0x727   :  { %v6459_v61 = vpop.eup %6458  ;;  %3413 = vmatprep.mubr.f32.mxu0 %v8776_v31  ;;  %3526 = vmatprep.mubr.f32.mxu1 %v8776_v31  ;;  %v2897_v4 = vadd.f32 %v2889_v6, %v2861_v1  ;;  %v2875_v21 = vmul.f32 %v6457_v29, %v7454_v14  ;;  %v2866_v59 = vmul.f32 %v7736_v9, %v2848_v52 }
 0x728   :  { %v6461_v42 = vpop.eup %6460  ;;  %v2821_v35 = vadd.f32 1.0, %v6459_v61  ;;  %v2898_v11 = vadd.f32 %v2890_v28, %v2862_v41 }
 0x729   :  { %v6463_v26 = vpop.eup %6462  ;;  %v2822_v51 = vadd.f32 1.0, %v6461_v42  ;;  %v2893_v24 = vmul.f32 %v2887_v45, %v2875_v21 }
 0x72a   :  { %v6465_v33 = vpop.eup %6464  ;;  %5958 = vmatmul.mubr.msk.f32.gmra.mrb[48].mxu0 %vm8739_vm3, %v3280_v62  ;;  %5968 = vmatmul.mubr.msk.f32.gmra.mrb[56].mxu1 %vm8739_vm3, %v3280_v62  ;;  %6476 = vrcp.f32 %v2821_v35  ;;  %v2825_v14 = vadd.f32 1.0, %v6463_v26 }
 0x72b   :  { %v6467_v27 = vpop.eup %6466  ;;  %6478 = vrcp.f32 %v2822_v51  ;;  %v2901_v7 = vadd.f32 %v2893_v24, %v2865_v54  ;;  %v2876_v63 = vmul.f32 %v6465_v33, %v7452_v3  ;;  %3730 = vmatprep.mubr.bf16.mxu0 %v8777_v18  ;;  %3773 = vmatprep.mubr.bf16.mxu1 %v8777_v18 }
 0x72c   :  { %6480 = vrcp.f32 %v2825_v14  ;;  %v2826_v17 = vadd.f32 1.0, %v6467_v27  ;;  %v6469_v43 = vpop.eup %6468 }
 0x72d   :  { %v2894_v23 = vmul.f32 %v2887_v45, %v2876_v63  ;;  %v6471_v55 = vpop.eup %6470  ;;  %v2845_v32 = vmul.f32 %v6469_v43, %v7470_v48 }
 0x72e   :  { %6482 = vrcp.f32 %v2826_v17  ;;  %v6473_v2 = vpop.eup %6472  ;;  %v2846_v3 = vmul.f32 %v6471_v55, %v7467_v39 }
 0x72f   :  { %v2902_v13 = vadd.f32 %v2894_v23, %v2866_v59  ;;  %v6475_v57 = vpop.eup %6474  ;;  %v2849_v0 = vmul.f32 %v6473_v2, %v7478_v36  ;;  %v2863_v58 = vmul.f32 %v7727_v38, %v2845_v32 }
 0x730   :  { %v2850_v19 = vmul.f32 %v6475_v57, %v7473_v16  ;;  %v2864_v1 = vmul.f32 %v7727_v38, %v2846_v3 }
 0x732   :  { %v2868_v61 = vmul.f32 %v7736_v9, %v2850_v19 }
 0x734   :  { %v6477_v12 = vpop.eup %6476 }
 0x735   :  { %v6479_v53 = vpop.eup %6478  ;;  %v2873_v56 = vmul.f32 %v6477_v12, %v7470_v48  ;;  %v2867_v48 = vmul.f32 %v7736_v9, %v2849_v0 }
 0x736   :  { %v6481_v8 = vpop.eup %6480  ;;  %v2874_v47 = vmul.f32 %v6479_v53, %v7467_v39 }
 0x737   :  { %v2891_v15 = vmul.f32 %v7744_v20, %v2873_v56  ;;  %v2877_v10 = vmul.f32 %v6481_v8, %v7478_v36 }
 0x738   :  { %v6483_v22 = vpop.eup %6482  ;;  %v2892_v6 = vmul.f32 %v7744_v20, %v2874_v47 }
 0x739   :  { %v2899_v40 = vadd.f32 %v2891_v15, %v2863_v58  ;;  %v2895_v29 = vmul.f32 %v2887_v45, %v2877_v10  ;;  %v2878_v41 = vmul.f32 %v6483_v22, %v7473_v16 }
 0x73a   :  { %v2900_v39 = vadd.f32 %v2892_v6, %v2864_v1 }
 0x73b   :  { %v2903_v28 = vadd.f32 %v2895_v29, %v2867_v48  ;;  %v2896_v21 = vmul.f32 %v2887_v45, %v2878_v41 }
 0x73d   :  { %v2904_v52 = vadd.f32 %v2896_v21, %v2868_v61 }
 0x7e1   :  { %v3373_v36 = vpop.f32.mrb[34].mxu0  ;;  %v3486_v42 = vpop.f32.mrb[42].mxu1 }
 0x7e2   :  { %v3533_v62 = vmul.f32 %v3373_v36, %v2897_v4  ;;  %v3535_v35 = vmul.f32 %v3486_v42, %v2899_v40  ;;  %v3375_v26 = vpop.f32.mrb[35].mxu0  ;;  %v3488_v38 = vpop.f32.mrb[43].mxu1 }
 0x7e3   :  { %v3534_v51 = vmul.f32 %v3375_v26, %v2898_v11  ;;  %v3536_v20 = vmul.f32 %v3488_v38, %v2900_v39 }
 0x7e5   :  { %v3379_v54 = vpop.f32.mrb[36].mxu0  ;;  %v3492_v24 = vpop.f32.mrb[44].mxu1 }
 0x7e6   :  { %v3537_v33 = vmul.f32 %v3379_v54, %v2901_v7  ;;  %v3539_v14 = vmul.f32 %v3492_v24, %v2903_v28  ;;  %v3381_v27 = vpop.f32.mrb[37].mxu0  ;;  %v3494_v16 = vpop.f32.mrb[45].mxu1 }
 0x7e7   :  { %v3538_v63 = vmul.f32 %v3381_v27, %v2902_v13  ;;  %v3540_v17 = vmul.f32 %v3494_v16, %v2904_v52 }
 0x7e9   :  { %v3385_v59 = vpop.f32.mrb[38].mxu0  ;;  %v3498_v9 = vpop.f32.mrb[46].mxu1 }
 0x7ea   :  { %v3541_v45 = vadd.f32 %v3533_v62, %v3385_v59  ;;  %v3543_v23 = vadd.f32 %v3535_v35, %v3498_v9  ;;  %v3387_v43 = vpop.f32.mrb[39].mxu0  ;;  %v3500_v55 = vpop.f32.mrb[47].mxu1 }
 0x7eb   :  { %v3542_v4 = vadd.f32 %v3534_v51, %v3387_v43  ;;  %v3544_v2 = vadd.f32 %v3536_v20, %v3500_v55 }
 0x7ec   :  { %v3557_v57 = vmul.f32 0.2, %v3541_v45  ;;  %v3559_v32 = vmul.f32 0.2, %v3543_v23  ;;  %vm3549_vm0 = vcmp.ge.f32.partialorder %v3541_v45, 0.0  ;;  %vm3551_vm1 = vcmp.ge.f32.partialorder %v3543_v23, 0.0 }
 0x7ed   :  { %v3558_v11 = vmul.f32 0.2, %v3542_v4  ;;  %v3560_v12 = vmul.f32 0.2, %v3544_v2  ;;  %v3391_v7 = vpop.f32.mrb[40].mxu0  ;;  %v3504_v3 = vpop.f32.mrb[48].mxu1 }
 0x7ee   :  { %v3545_v53 = vadd.f32 %v3537_v33, %v3391_v7  ;;  %v3547_v56 = vadd.f32 %v3539_v14, %v3504_v3  ;;  %v3393_v13 = vpop.f32.mrb[41].mxu0  ;;  %v3506_v0 = vpop.f32.mrb[49].mxu1  ;;  %vm3550_vm15 = vcmp.ge.f32.partialorder %v3542_v4, 0.0  ;;  %vm3552_vm10 = vcmp.ge.f32.partialorder %v3544_v2, 0.0 }
 0x7ef   :  { %v3546_v8 = vadd.f32 %v3538_v63, %v3393_v13  ;;  %v3548_v47 = vadd.f32 %v3540_v17, %v3506_v0  ;;  %v3565_v10 = vsel %vm3549_vm0, %v3541_v45, %v3557_v57  ;;  %v3567_v19 = vsel %vm3551_vm1, %v3543_v23, %v3559_v32 }
 0x7f0   :  { %v3561_v58 = vmul.f32 0.2, %v3545_v53  ;;  %v3563_v15 = vmul.f32 0.2, %v3547_v56  ;;  %v3566_v48 = vsel %vm3550_vm15, %v3542_v4, %v3558_v11  ;;  %v3568_v29 = vsel %vm3552_vm10, %v3544_v2, %v3560_v12 }
 0x7f1   :  { %v3562_v22 = vmul.f32 0.2, %v3546_v8  ;;  %v3564_v1 = vmul.f32 0.2, %v3548_v47  ;;  %v3397_v6 = vpop.f32.mrb[42].mxu0  ;;  %v3510_v40 = vpop.f32.mrb[50].mxu1 }
 0x7f2   :  { %v3573_v41 = vmul.f32 %v3565_v10, %v3397_v6  ;;  %v3575_v39 = vmul.f32 %v3567_v19, %v3510_v40  ;;  %v3399_v28 = vpop.f32.mrb[43].mxu0  ;;  %v3512_v61 = vpop.f32.mrb[51].mxu1  ;;  %vm3553_vm11 = vcmp.ge.f32.partialorder %v3545_v53, 0.0  ;;  %vm3555_vm13 = vcmp.ge.f32.partialorder %v3547_v56, 0.0 }
 0x7f3   :  { %v3574_v21 = vmul.f32 %v3566_v48, %v3399_v28  ;;  %v3576_v52 = vmul.f32 %v3568_v29, %v3512_v61  ;;  %vm3554_vm3 = vcmp.ge.f32.partialorder %v3546_v8, 0.0  ;;  %vm3556_vm2 = vcmp.ge.f32.partialorder %v3548_v47, 0.0 }
 0x7f4   :  { %v3569_v42 = vsel %vm3553_vm11, %v3545_v53, %v3561_v58  ;;  %v3571_v35 = vsel %vm3555_vm13, %v3547_v56, %v3563_v15  ;;  %v3570_v20 = vsel %vm3554_vm3, %v3546_v8, %v3562_v22  ;;  %v3572_v24 = vsel %vm3556_vm2, %v3548_v47, %v3564_v1 }
 0x7f5   :  { %v3403_v36 = vpop.f32.mrb[44].mxu0  ;;  %v3516_v62 = vpop.f32.mrb[52].mxu1 }
 0x7f6   :  { %v3577_v26 = vmul.f32 %v3569_v42, %v3403_v36  ;;  %v3579_v38 = vmul.f32 %v3571_v35, %v3516_v62  ;;  %v3405_v51 = vpop.f32.mrb[45].mxu0  ;;  %v3518_v54 = vpop.f32.mrb[53].mxu1  ;;  %v3631_v36 = vld [vmem:[%s8676_s16] sm:$0xff] }
 0x7f7   :  { %v3578_v33 = vmul.f32 %v3570_v20, %v3405_v51  ;;  %v3580_v14 = vmul.f32 %v3572_v24, %v3518_v54 }
 0x7f9   :  { %v3409_v27 = vpop.f32.mrb[46].mxu0  ;;  %v3522_v16 = vpop.f32.mrb[54].mxu1 }
 0x7fa   :  { %v3581_v63 = vadd.f32 %v3573_v41, %v3409_v27  ;;  %v3583_v17 = vadd.f32 %v3575_v39, %v3522_v16  ;;  %v3411_v59 = vpop.f32.mrb[47].mxu0  ;;  %v3524_v9 = vpop.f32.mrb[55].mxu1 }
 0x7fb   :  { %v3582_v45 = vadd.f32 %v3574_v21, %v3411_v59  ;;  %v3584_v23 = vadd.f32 %v3576_v52, %v3524_v9 }
 0x7fc   :  { %vm3589_vm0 = vcmp.ge.f32.partialorder %v3581_v63, 0.0  ;;  %v3597_v43 = vmul.f32 0.2, %v3581_v63  ;;  %v3599_v4 = vmul.f32 0.2, %v3583_v17  ;;  %vm3591_vm3 = vcmp.ge.f32.partialorder %v3583_v17, 0.0 }
 0x7fd   :  { %v3415_v2 = vpop.f32.mrb[48].mxu0  ;;  %v3528_v57 = vpop.f32.mrb[56].mxu1  ;;  %v3598_v58 = vmul.f32 0.2, %v3582_v45  ;;  %vm3590_vm15 = vcmp.ge.f32.partialorder %v3582_v45, 0.0  ;;  %vm3592_vm10 = vcmp.ge.f32.partialorder %v3584_v23, 0.0 }
 0x7fe   :  { %v7785_v55 = vsel %vm3589_vm0, %v3581_v63, %v3597_v43  ;;  %v3585_v32 = vadd.f32 %v3577_v26, %v3415_v2  ;;  %v3587_v11 = vadd.f32 %v3579_v38, %v3528_v57  ;;  %v3417_v12 = vpop.f32.mrb[49].mxu0  ;;  %v3530_v7 = vpop.f32.mrb[57].mxu1  ;;  %v7789_v13 = vsel %vm3591_vm3, %v3583_v17, %v3599_v4 }
 0x7ff   :  { %3653 = vrot.lane.b32.xlu0 %v7785_v55, %s6575_s3  ;;  %v3586_v3 = vadd.f32 %v3578_v33, %v3417_v12  ;;  %v3588_v53 = vadd.f32 %v3580_v14, %v3530_v7  ;;  %v7811_v15 = vsel %vm3590_vm15, %v3582_v45, %v3598_v58  ;;  %v3600_v10 = vmul.f32 0.2, %v3584_v23 }
 0x800   :  { %vm3593_vm2 = vcmp.ge.f32.partialorder %v3585_v32, 0.0  ;;  %v3601_v56 = vmul.f32 0.2, %v3585_v32  ;;  %v3603_v8 = vmul.f32 0.2, %v3587_v11  ;;  %vm3595_vm1 = vcmp.ge.f32.partialorder %v3587_v11, 0.0 }
 0x801   :  { %v3602_v19 = vmul.f32 0.2, %v3586_v3  ;;  %vm3594_vm11 = vcmp.ge.f32.partialorder %v3586_v3, 0.0  ;;  %v7817_v22 = vsel %vm3592_vm10, %v3584_v23, %v3600_v10  ;;  %v3604_v6 = vmul.f32 0.2, %v3588_v53 }
 0x802   :  { %v7791_v0 = vsel %vm3593_vm2, %v3585_v32, %v3601_v56  ;;  %v7797_v47 = vsel %vm3595_vm1, %v3587_v11, %v3603_v8  ;;  %vm3596_vm13 = vcmp.ge.f32.partialorder %v3588_v53, 0.0  ;;  %v6391_v56 = vld [vmem:[%s8675_s15] sm:$0xff]   ;;  %vm8806_vm15 = vcmask 64512  }
 0x803   :  { %3661 = vrot.lane.b32.xlu0 %v7789_v13, %s6575_s3  ;;  %3655 = vrot.lane.b32.xlu1 %v7791_v0, %s6575_s3  ;;  %v7819_v1 = vsel %vm3594_vm11, %v3586_v3, %v3602_v19  ;;  %v7825_v40 = vsel %vm3596_vm13, %v3588_v53, %v3604_v6  ;;  %v3649_v8 = vpack.c.bf16 %v7791_v0, %v7785_v55  ;;  %vm8807_vm10 = vmmov %vm8806_vm15  ;;  %vm8808_vm11 = vcmask 15360  }
 0x804   :  { %v3650_v53 = vpack.c.bf16 %v7819_v1, %v7811_v15  ;;  %v3651_v58 = vpack.c.bf16 %v7797_v47, %v7789_v13 }
 0x807   :  { %3878 = vrot.lane.b32.xlu0 %v7785_v55, %s6576_s7  ;;  %3663 = vrot.lane.b32.xlu1 %v7797_v47, %s6575_s3 }
 0x80b   :  { %3886 = vrot.lane.b32.xlu0 %v7789_v13, %s6576_s7  ;;  %3880 = vrot.lane.b32.xlu1 %v7791_v0, %s6576_s7 }
 0x80f   :  { %4016 = vrot.lane.b32.xlu0 %v7785_v55, %s6577_s24  ;;  %3888 = vrot.lane.b32.xlu1 %v7797_v47, %s6576_s7 }
 0x813   :  { %3657 = vrot.lane.b32.xlu0 %v7811_v15, %s6575_s3  ;;  %4018 = vrot.lane.b32.xlu1 %v7791_v0, %s6577_s24 }
 0x817   :  { %3665 = vrot.lane.b32.xlu0 %v7817_v22, %s6575_s3  ;;  %3659 = vrot.lane.b32.xlu1 %v7819_v1, %s6575_s3 }
 0x81b   :  { %4024 = vrot.lane.b32.xlu0 %v7789_v13, %s6577_s24  ;;  %3667 = vrot.lane.b32.xlu1 %v7825_v40, %s6575_s3 }
 0x81f   :  { %3882 = vrot.lane.b32.xlu0 %v7811_v15, %s6576_s7  ;;  %4026 = vrot.lane.b32.xlu1 %v7797_v47, %s6577_s24 }
 0x823   :  { %3890 = vrot.lane.b32.xlu0 %v7817_v22, %s6576_s7  ;;  %4156 = vrot.lane.b32.xlu1 %v7791_v0, %s6578_s25 }
 0x827   :  { %4020 = vrot.lane.b32.xlu0 %v7811_v15, %s6577_s24  ;;  %4164 = vrot.lane.b32.xlu1 %v7797_v47, %s6578_s25 }
 0x82b   :  { %4028 = vrot.lane.b32.xlu0 %v7817_v22, %s6577_s24  ;;  %4302 = vrot.lane.b32.xlu1 %v7797_v47, %s6579_s8 }
 0x82f   :  { %4154 = vrot.lane.b32.xlu0 %v7785_v55, %s6578_s25  ;;  %3884 = vrot.lane.b32.xlu1 %v7819_v1, %s6576_s7 }
 0x833   :  { %4158 = vrot.lane.b32.xlu0 %v7811_v15, %s6578_s25  ;;  %3892 = vrot.lane.b32.xlu1 %v7825_v40, %s6576_s7 }
 0x837   :  { %4166 = vrot.lane.b32.xlu0 %v7817_v22, %s6578_s25  ;;  %4294 = vrot.lane.b32.xlu1 %v7791_v0, %s6579_s8 }
 0x83b   :  { %4162 = vrot.lane.b32.xlu0 %v7789_v13, %s6578_s25  ;;  %4022 = vrot.lane.b32.xlu1 %v7819_v1, %s6577_s24 }
 0x83f   :  { %4296 = vrot.lane.b32.xlu0 %v7811_v15, %s6579_s8  ;;  %4030 = vrot.lane.b32.xlu1 %v7825_v40, %s6577_s24 }
 0x843   :  { %4300 = vrot.lane.b32.xlu0 %v7789_v13, %s6579_s8  ;;  %4440 = vrot.lane.b32.xlu1 %v7797_v47, %s6580_s26 }
 0x847   :  { %4292 = vrot.lane.b32.xlu0 %v7785_v55, %s6579_s8  ;;  %4160 = vrot.lane.b32.xlu1 %v7819_v1, %s6578_s25 }
 0x84b   :  { %4304 = vrot.lane.b32.xlu0 %v7817_v22, %s6579_s8  ;;  %4168 = vrot.lane.b32.xlu1 %v7825_v40, %s6578_s25 }
 0x84f   :  { %4434 = vrot.lane.b32.xlu0 %v7811_v15, %s6580_s26  ;;  %4432 = vrot.lane.b32.xlu1 %v7791_v0, %s6580_s26 }
 0x853   :  { %4438 = vrot.lane.b32.xlu0 %v7789_v13, %s6580_s26  ;;  %4578 = vrot.lane.b32.xlu1 %v7797_v47, %s6581_s21 }
 0x857   :  { %4430 = vrot.lane.b32.xlu0 %v7785_v55, %s6580_s26  ;;  %4298 = vrot.lane.b32.xlu1 %v7819_v1, %s6579_s8 }
 0x85b   :  { %4442 = vrot.lane.b32.xlu0 %v7817_v22, %s6580_s26  ;;  %4306 = vrot.lane.b32.xlu1 %v7825_v40, %s6579_s8 }
 0x85f   :  { %4572 = vrot.lane.b32.xlu0 %v7811_v15, %s6581_s21  ;;  %4570 = vrot.lane.b32.xlu1 %v7791_v0, %s6581_s21 }
 0x863   :  { %4576 = vrot.lane.b32.xlu0 %v7789_v13, %s6581_s21  ;;  %4436 = vrot.lane.b32.xlu1 %v7819_v1, %s6580_s26 }
 0x867   :  { %4568 = vrot.lane.b32.xlu0 %v7785_v55, %s6581_s21  ;;  %4444 = vrot.lane.b32.xlu1 %v7825_v40, %s6580_s26 }
 0x86b   :  { %4580 = vrot.lane.b32.xlu0 %v7817_v22, %s6581_s21  ;;  %4716 = vrot.lane.b32.xlu1 %v7797_v47, %s6582_s28 }
 0x86f   :  { %4710 = vrot.lane.b32.xlu0 %v7811_v15, %s6582_s28  ;;  %4574 = vrot.lane.b32.xlu1 %v7819_v1, %s6581_s21 }
 0x871   :  { %v3654_v48 = vpop.permute.xlu0 %3653 }
 0x873   :  { %4714 = vrot.lane.b32.xlu0 %v7789_v13, %s6582_s28  ;;  %4582 = vrot.lane.b32.xlu1 %v7825_v40, %s6581_s21 }
 0x875   :  { %v3662_v29 = vpop.permute.xlu0 %3661  ;;  %v3656_v41 = vpop.permute.xlu1 %3655 }
 0x877   :  { %4706 = vrot.lane.b32.xlu0 %v7785_v55, %s6582_s28  ;;  %4708 = vrot.lane.b32.xlu1 %v7791_v0, %s6582_s28  ;;  %v6392_v55 = vld [vmem:[%s8675_s15 + $0x20] sm:$0xff]  }
 0x879   :  { %v7923_v39 = vpop.permute.xlu0 %3878  ;;  %v3664_v28 = vpop.permute.xlu1 %3663 }
 0x87b   :  { %4718 = vrot.lane.b32.xlu0 %v7817_v22, %s6582_s28  ;;  %4712 = vrot.lane.b32.xlu1 %v7819_v1, %s6582_s28 }
 0x87d   :  { %v7929_v61 = vpop.permute.xlu0 %3886  ;;  %v7931_v21 = vpop.permute.xlu1 %3880 }
 0x87f   :  { %4720 = vrot.lane.b32.xlu1 %v7825_v40, %s6582_s28 }
 0x881   :  { %v7935_v52 = vpop.permute.xlu0 %4016  ;;  %v7940_v42 = vpop.permute.xlu1 %3888 }
 0x883   :  { %4904 = vperm.xlu1 %6380, %v3631_v36  }
 0x885   :  { %v3658_v62 = vpop.permute.xlu0 %3657  ;;  %v7942_v35 = vpop.permute.xlu1 %4018 }
 0x886   :  { %v3673_v26 = vsel %vm807_vm12, %v3654_v48, %v3658_v62  ;;  %v3671_v63 = vsel %vm807_vm12, %v3658_v62, %v3662_v29 }
 0x887   :  { %v3678_v54 = vmul.f32 %v3673_v26, %v6962_v37  ;;  %v3679_v57 = vmul.f32 %v3671_v63, %v6986_v46 }
 0x889   :  { %v3666_v38 = vpop.permute.xlu0 %3665  ;;  %v3660_v51 = vpop.permute.xlu1 %3659 }
 0x88a   :  { %v3674_v20 = vsel %vm807_vm12, %v3656_v41, %v3660_v51  ;;  %v3672_v24 = vsel %vm807_vm12, %v3660_v51, %v3664_v28  ;;  %v3669_v14 = vsel %vm807_vm12, %v3662_v29, %v3666_v38  ;;  %v3675_v27 = vsel %vm807_vm12, %v3666_v38, %v3654_v48 }
 0x88b   :  { %v3682_v33 = vmul.f32 %v3674_v20, %v6962_v37  ;;  %v3683_v9 = vmul.f32 %v3672_v24, %v6986_v46  ;;  %v3677_v23 = vmul.f32 %v3675_v27, %v6982_v44  ;;  %v3680_v43 = vmul.f32 %v3669_v14, %v6989_v49 }
 0x88d   :  { %v7956_v16 = vpop.permute.xlu0 %4024  ;;  %v3668_v17 = vpop.permute.xlu1 %3667  ;;  %v3686_v59 = vpack.c.bf16 %v3682_v33, %v3678_v54  ;;  %v3687_v3 = vpack.c.bf16 %v3683_v9, %v3679_v57  ;;  %v8778_v57 = vld [vmem:[#allocation12_spill] sm:$0xff] }
 0x88e   :  { %v3670_v45 = vsel %vm807_vm12, %v3664_v28, %v3668_v17  ;;  %v3676_v37 = vsel %vm807_vm12, %v3668_v17, %v3656_v41  ;;  %vm3694_vm12 = vcmask 130048  }
 0x88f   :  { %v3681_v4 = vmul.f32 %v3676_v37, %v6982_v44  ;;  %v3684_v2 = vmul.f32 %v3670_v45, %v6989_v49  ;;  %3698 = vmatprep.subr.bf16.mxu0 %v3686_v59  ;;  %v3652_v44 = vpack.c.bf16 %v7825_v40, %v7817_v22 }
 0x891   :  { %v3883_v32 = vpop.permute.xlu0 %3882  ;;  %v3685_v11 = vpack.c.bf16 %v3681_v4, %v3677_v23  ;;  %v7970_v12 = vpop.permute.xlu1 %4026  ;;  %v3688_v7 = vpack.c.bf16 %v3684_v2, %v3680_v43 }
 0x892   :  { %v3898_v13 = vsel %vm1058_vm14, %v7923_v39, %v3883_v32 }
 0x893   :  { %3699 = vmatpush1.bf16.msra.mxu0 %v3685_v11  ;;  %3741 = vmatprep.subr.bf16.mxu1 %v3688_v7  ;;  %v3903_v6 = vmul.f32 %v3898_v13, %v7004_v60  ;;  %v8779_v7 = vld [vmem:[#allocation11_spill] sm:$0xff] }
 0x894   :  { %3742 = vmatpush1.bf16.msra.mxu1 %v3687_v3  ;;  %3792 = vmatprep.subr.bf16.mxu0 %v3650_v53  ;;  %v8780_v53 = vld [vmem:[#allocation10_spill] sm:$0xff] }
 0x895   :  { %v3891_v46 = vpop.permute.xlu0 %3890  ;;  %v7979_v49 = vpop.permute.xlu1 %4156  ;;  %3835 = vmatprep.subr.bf16.mxu1 %v3652_v44 }
 0x896   :  { %5970 = vmatmul.mubr.msk.bf16.vlgmr.msra.gmra.mrb[52].mxu0 %vm3694_vm12, %v6391_v56  ;;  %v3894_v29 = vsel %vm1058_vm14, %v7929_v61, %v3891_v46  ;;  %v3900_v41 = vsel %vm1058_vm14, %v3891_v46, %v7923_v39 }
 0x897   :  { %3793 = vmatpush1.bf16.msra.mxu0 %v3649_v8  ;;  %5971 = vmatmul.mubr.msk.bf16.vlgmr.msra.gmra.mrb[60].mxu1 %vm3694_vm12, %v6391_v56  ;;  %v3902_v51 = vmul.f32 %v3900_v41, %v7029_v25  ;;  %v3905_v20 = vmul.f32 %v3894_v29, %v7009_v5 }
 0x898   :  { %3836 = vmatpush1.bf16.msra.mxu1 %v3651_v58  ;;  %3824 = vmatprep.mubr.bf16.mxu0 %v8777_v18 }
 0x899   :  { %v4021_v15 = vpop.permute.xlu0 %4020  ;;  %v7988_v10 = vpop.permute.xlu1 %4164  ;;  %3867 = vmatprep.mubr.bf16.mxu1 %v8777_v18 }
 0x89d   :  { %v4029_v19 = vpop.permute.xlu0 %4028  ;;  %v7991_v22 = vpop.permute.xlu1 %4302 }
 0x89e   :  { %v4032_v37 = vsel %vm1209_vm4, %v7956_v16, %v4029_v19  ;;  %v4038_v23 = vsel %vm1209_vm4, %v4029_v19, %v7935_v52 }
 0x89f   :  { %v4040_v3 = vmul.f32 %v4038_v23, %v8779_v7  ;;  %v4043_v56 = vmul.f32 %v4032_v37, %v8780_v53 }
 0x8a1   :  { %v7999_v0 = vpop.permute.xlu0 %4154  ;;  %v3885_v47 = vpop.permute.xlu1 %3884 }
 0x8a2   :  { %v3899_v1 = vsel %vm1058_vm14, %v7931_v21, %v3885_v47  ;;  %5973 = vmatmul.mubr.msk.bf16.vlgmr.msra.gmra.mrb[52].mxu0 %vm3694_vm12, %v6392_v55  ;;  %v3897_v40 = vsel %vm1058_vm14, %v3885_v47, %v7940_v42 }
 0x8a3   :  { %v3907_v48 = vmul.f32 %v3899_v1, %v7004_v60  ;;  %5974 = vmatmul.mubr.msk.bf16.vlgmr.msra.gmra.mrb[60].mxu1 %vm3694_vm12, %v6392_v55  ;;  %3954 = vmatprep.mubr.bf16.mxu0 %v8777_v18  ;;  %v3896_v60 = vsel %vm1058_vm14, %v3883_v32, %v7929_v61  ;;  %v3908_v26 = vmul.f32 %v3897_v40, %v7039_v30 }
 0x8a4   :  { %3997 = vmatprep.mubr.bf16.mxu1 %v8777_v18  ;;  %v3904_v24 = vmul.f32 %v3896_v60, %v7039_v30 }
 0x8a5   :  { %v8018_v28 = vpop.permute.xlu0 %4158  ;;  %v3893_v36 = vpop.permute.xlu1 %3892  ;;  %v3911_v62 = vpack.c.bf16 %v3907_v48, %v3903_v6  ;;  %v8781_v6 = vld [vmem:[#allocation13_spill] sm:$0xff] }
 0x8a6   :  { %v3895_v38 = vsel %vm1058_vm14, %v7940_v42, %v3893_v36  ;;  %v3901_v39 = vsel %vm1058_vm14, %v3893_v36, %v7931_v21  ;;  %v3912_v63 = vpack.c.bf16 %v3908_v26, %v3904_v24  ;;  %v6393_v21 = vld [vmem:[%s8675_s15 + $0x8] sm:$0xff]   ;;  %v4174_v55 = vsel %vm1360_vm5, %v7999_v0, %v8018_v28  ;;  %v8784_v24 = vld [vmem:[#allocation14_spill] sm:$0xff] }
 0x8a7   :  { %v3906_v54 = vmul.f32 %v3901_v39, %v7029_v25  ;;  %v3909_v61 = vmul.f32 %v3895_v38, %v7009_v5  ;;  %3922 = vmatprep.subr.bf16.mxu0 %v3911_v62  ;;  %v4036_v25 = vsel %vm1209_vm4, %v7935_v52, %v4021_v15  ;;  %v4179_v40 = vmul.f32 %v4174_v55, %v8781_v6  ;;  %v8782_v39 = vld [vmem:[#allocation16_spill] sm:$0xff] }
 0x8a8   :  { %v4041_v59 = vmul.f32 %v4036_v25, %v7052_v50  ;;  %vm8798_vm14 = vcmask 1041408  }
 0x8a9   :  { %v4167_v33 = vpop.permute.xlu0 %4166  ;;  %v3910_v14 = vpack.c.bf16 %v3906_v54, %v3902_v51  ;;  %v8036_v27 = vpop.permute.xlu1 %4294  ;;  %v3913_v42 = vpack.c.bf16 %v3909_v61, %v3905_v20  ;;  %v8783_v54 = vld [vmem:[#allocation15_spill] sm:$0xff] }
 0x8aa   :  { %v4176_v41 = vsel %vm1360_vm5, %v4167_v33, %v7999_v0 }
 0x8ab   :  { %3923 = vmatpush1.bf16.msra.mxu0 %v3910_v14  ;;  %3965 = vmatprep.subr.bf16.mxu1 %v3913_v42  ;;  %v4178_v61 = vmul.f32 %v4176_v41, %v8783_v54 }
 0x8ac   :  { %3966 = vmatpush1.bf16.msra.mxu1 %v3912_v63 }
 0x8ad   :  { %v4163_v5 = vpop.permute.xlu0 %4162  ;;  %v4023_v17 = vpop.permute.xlu1 %4022 }
 0x8ae   :  { %v4037_v30 = vsel %vm1209_vm4, %v7942_v35, %v4023_v17  ;;  %5976 = vmatmul.mubr.msk.bf16.vlgmr.msra.gmra.mrb[52].mxu0 %vm3694_vm12, %v6393_v21  ;;  %v4035_v9 = vsel %vm1209_vm4, %v4023_v17, %v7970_v12  ;;  %v4170_v60 = vsel %vm1360_vm5, %v4163_v5, %v4167_v33  ;;  %v4172_v62 = vsel %vm1360_vm5, %v8018_v28, %v4163_v5 }
 0x8af   :  { %v4045_v45 = vmul.f32 %v4037_v30, %v7052_v50  ;;  %5977 = vmatmul.mubr.msk.bf16.vlgmr.msra.gmra.mrb[60].mxu1 %vm3694_vm12, %v6393_v21  ;;  %4092 = vmatprep.mubr.bf16.mxu0 %v8777_v18  ;;  %v4034_v50 = vsel %vm1209_vm4, %v4021_v15, %v7956_v16  ;;  %v4046_v32 = vmul.f32 %v4035_v9, %v8778_v57 }
 0x8b0   :  { %4135 = vmatprep.mubr.bf16.mxu1 %v8777_v18  ;;  %v4042_v46 = vmul.f32 %v4034_v50, %v8778_v57  ;;  %v4181_v33 = vmul.f32 %v4170_v60, %v8784_v24  ;;  %v4180_v42 = vmul.f32 %v4172_v62, %v8782_v39  ;;  %v8786_v57 = vld [vmem:[#allocation19_spill] sm:$0xff] }
 0x8b1   :  { %v8061_v43 = vpop.permute.xlu0 %4296  ;;  %v4031_v4 = vpop.permute.xlu1 %4030  ;;  %v4049_v2 = vpack.c.bf16 %v4045_v45, %v4041_v59 }
 0x8b2   :  { %v4033_v11 = vsel %vm1209_vm4, %v7970_v12, %v4031_v4  ;;  %v4039_v52 = vsel %vm1209_vm4, %v4031_v4, %v7942_v35  ;;  %v4050_v19 = vpack.c.bf16 %v4046_v32, %v4042_v46  ;;  %v6394_v35 = vld [vmem:[%s8675_s15 + $0x10] sm:$0xff]   ;;  %v8785_v4 = vld [vmem:[#allocation17_spill] sm:$0xff]  ;;  %vm8800_vm4 = vmmov %vm8798_vm14 }
 0x8b3   :  { %v4044_v44 = vmul.f32 %v4039_v52, %v8779_v7  ;;  %v4047_v16 = vmul.f32 %v4033_v11, %v8780_v53  ;;  %4060 = vmatprep.subr.bf16.mxu0 %v4049_v2  ;;  %vm8809_vm13 = vmmov %vm8800_vm4 }
 0x8b5   :  { %v4301_v8 = vpop.permute.xlu0 %4300  ;;  %v4048_v58 = vpack.c.bf16 %v4044_v44, %v4040_v3  ;;  %v8079_v15 = vpop.permute.xlu1 %4440  ;;  %v4051_v12 = vpack.c.bf16 %v4047_v16, %v4043_v56 }
 0x8b6   :  { %v4310_v59 = vsel %vm1511_vm6, %v8061_v43, %v4301_v8 }
 0x8b7   :  { %4061 = vmatpush1.bf16.msra.mxu0 %v4048_v58  ;;  %4103 = vmatprep.subr.bf16.mxu1 %v4051_v12  ;;  %v4317_v2 = vmul.f32 %v4310_v59, %v8785_v4  ;;  %v8787_v58 = vld [vmem:[#allocation20_spill] sm:$0xff] }
 0x8b8   :  { %4104 = vmatpush1.bf16.msra.mxu1 %v4050_v19  ;;  %v8788_v19 = vld [vmem:[#allocation18_spill] sm:$0xff] }
 0x8b9   :  { %v4293_v13 = vpop.permute.xlu0 %4292  ;;  %v4161_v47 = vpop.permute.xlu1 %4160 }
 0x8ba   :  { %v4175_v1 = vsel %vm1360_vm5, %v7979_v49, %v4161_v47  ;;  %5979 = vmatmul.mubr.msk.bf16.vlgmr.msra.gmra.mrb[52].mxu0 %vm3694_vm12, %v6394_v35  ;;  %v4173_v48 = vsel %vm1360_vm5, %v4161_v47, %v7988_v10  ;;  %v4312_v9 = vsel %vm1511_vm6, %v4293_v13, %v8061_v43 }
 0x8bb   :  { %v4183_v29 = vmul.f32 %v4175_v1, %v8781_v6  ;;  %5980 = vmatmul.mubr.msk.bf16.vlgmr.msra.gmra.mrb[60].mxu1 %vm3694_vm12, %v6394_v35  ;;  %4230 = vmatprep.mubr.bf16.mxu0 %v8777_v18  ;;  %v4184_v51 = vmul.f32 %v4173_v48, %v8782_v39  ;;  %v4316_v32 = vmul.f32 %v4312_v9, %v8786_v57 }
 0x8bc   :  { %4273 = vmatprep.mubr.bf16.mxu1 %v8777_v18 }
 0x8bd   :  { %v4305_v36 = vpop.permute.xlu0 %4304  ;;  %v4169_v26 = vpop.permute.xlu1 %4168  ;;  %v4187_v38 = vpack.c.bf16 %v4183_v29, %v4179_v40  ;;  %v4188_v5 = vpack.c.bf16 %v4184_v51, %v4180_v42  ;;  %v8791_v42 = vld [vmem:[#allocation24_spill] sm:$0xff] }
 0x8be   :  { %v4171_v20 = vsel %vm1360_vm5, %v7988_v10, %v4169_v26  ;;  %v4177_v0 = vsel %vm1360_vm5, %v4169_v26, %v7979_v49  ;;  %v6395_v49 = vld [vmem:[%s8675_s15 + $0x18] sm:$0xff]   ;;  %v4308_v52 = vsel %vm1511_vm6, %v4301_v8, %v4305_v36  ;;  %v4314_v7 = vsel %vm1511_vm6, %v4305_v36, %v4293_v13  ;;  %v6396_v13 = vld [vmem:[%s8675_s15 + $0x28] sm:$0xff]   ;;  %vm8802_vm5 = vmmov %vm8800_vm4 }
 0x8bf   :  { %v4182_v14 = vmul.f32 %v4177_v0, %v8783_v54  ;;  %v4185_v28 = vmul.f32 %v4171_v20, %v8784_v24  ;;  %4198 = vmatprep.subr.bf16.mxu0 %v4187_v38  ;;  %v4318_v12 = vmul.f32 %v4308_v52, %v8787_v58  ;;  %v4319_v35 = vmul.f32 %v4314_v7, %v8788_v19  ;;  %v8789_v36 = vld [vmem:[#allocation21_spill] sm:$0xff]  ;;  %v8790_v26 = vld [vmem:[#allocation23_spill] sm:$0xff] }
 0x8c1   :  { %v4435_v63 = vpop.permute.xlu0 %4434  ;;  %v4186_v21 = vpack.c.bf16 %v4182_v14, %v4178_v61  ;;  %v8120_v25 = vpop.permute.xlu1 %4432  ;;  %v4189_v10 = vpack.c.bf16 %v4185_v28, %v4181_v33 }
 0x8c3   :  { %4199 = vmatpush1.bf16.msra.mxu0 %v4186_v21  ;;  %4241 = vmatprep.subr.bf16.mxu1 %v4189_v10  ;;  %v8792_v21 = vld [vmem:[#allocation22_spill] sm:$0xff] }
 0x8c4   :  { %4242 = vmatpush1.bf16.msra.mxu1 %v4188_v5 }
 0x8c5   :  { %v4439_v17 = vpop.permute.xlu0 %4438  ;;  %v8125_v30 = vpop.permute.xlu1 %4578 }
 0x8c6   :  { %5982 = vmatmul.mubr.msk.bf16.vlgmr.msra.gmra.mrb[52].mxu0 %vm3694_vm12, %v6395_v49 }
 0x8c7   :  { %5983 = vmatmul.mubr.msk.bf16.vlgmr.msra.gmra.mrb[60].mxu1 %vm3694_vm12, %v6395_v49  ;;  %4368 = vmatprep.mubr.bf16.mxu0 %v8777_v18 }
 0x8c8   :  { %4411 = vmatprep.mubr.bf16.mxu1 %v8777_v18 }
 0x8c9   :  { %v4431_v45 = vpop.permute.xlu0 %4430  ;;  %v4299_v37 = vpop.permute.xlu1 %4298 }
 0x8ca   :  { %v4311_v23 = vsel %vm1511_vm6, %v4299_v37, %v7991_v22  ;;  %v4313_v50 = vsel %vm1511_vm6, %v8036_v27, %v4299_v37  ;;  %v4450_v40 = vsel %vm1662_vm7, %v4431_v45, %v4435_v63 }
 0x8cb   :  { %v4320_v11 = vmul.f32 %v4313_v50, %v8786_v57  ;;  %v4321_v43 = vmul.f32 %v4311_v23, %v8785_v4  ;;  %v4454_v38 = vmul.f32 %v4450_v40, %v8790_v26  ;;  %v8793_v57 = vld [vmem:[#allocation25_spill] sm:$0xff] }
 0x8cd   :  { %v4443_v3 = vpop.permute.xlu0 %4442  ;;  %v4324_v53 = vpack.c.bf16 %v4320_v11, %v4316_v32  ;;  %v4307_v56 = vpop.permute.xlu1 %4306  ;;  %v4325_v44 = vpack.c.bf16 %v4321_v43, %v4317_v2  ;;  %v8794_v11 = vld [vmem:[#allocation27_spill] sm:$0xff] }
 0x8ce   :  { %v4309_v16 = vsel %vm1511_vm6, %v7991_v22, %v4307_v56  ;;  %v4315_v46 = vsel %vm1511_vm6, %v4307_v56, %v8036_v27  ;;  %v4448_v27 = vsel %vm1662_vm7, %v4435_v63, %v4439_v17  ;;  %v4446_v20 = vsel %vm1662_vm7, %v4439_v17, %v4443_v3  ;;  %v6397_v17 = vld [vmem:[%s8675_s15 + $0x30] sm:$0xff]  }
 0x8cf   :  { %v4322_v8 = vmul.f32 %v4309_v16, %v8787_v58  ;;  %v4323_v55 = vmul.f32 %v4315_v46, %v8788_v19  ;;  %4336 = vmatprep.subr.bf16.mxu0 %v4325_v44  ;;  %v4455_v62 = vmul.f32 %v4448_v27, %v8789_v36  ;;  %v4452_v0 = vsel %vm1662_vm7, %v4443_v3, %v4431_v45  ;;  %v8795_v19 = vld [vmem:[#allocation28_spill] sm:$0xff] }
 0x8d0   :  { %4337 = vmatpush1.bf16.msra.mxu0 %v4324_v53  ;;  %v4456_v63 = vmul.f32 %v4446_v20, %v8791_v42  ;;  %v4457_v10 = vmul.f32 %v4452_v0, %v8792_v21 }
 0x8d1   :  { %v4573_v47 = vpop.permute.xlu0 %4572  ;;  %v4326_v22 = vpack.c.bf16 %v4322_v8, %v4318_v12  ;;  %v4571_v1 = vpop.permute.xlu1 %4570  ;;  %v4327_v6 = vpack.c.bf16 %v4323_v55, %v4319_v35  ;;  %v8796_v8 = vld [vmem:[#allocation26_spill] sm:$0xff] }
 0x8d3   :  { %5985 = vmatmul.mubr.msk.bf16.vlgmr.msra.gmra.mrb[52].mxu0 %vm3694_vm12, %v6396_v13  ;;  %4379 = vmatprep.subr.bf16.mxu1 %v4327_v6 }
 0x8d4   :  { %4380 = vmatpush1.bf16.msra.mxu1 %v4326_v22  ;;  %4506 = vmatprep.mubr.bf16.mxu0 %v8777_v18  ;;  %v6398_v22 = vld [vmem:[%s8675_s15 + $0x38] sm:$0xff]  }
 0x8d5   :  { %v4577_v48 = vpop.permute.xlu0 %4576  ;;  %v4437_v29 = vpop.permute.xlu1 %4436 }
 0x8d6   :  { %v4449_v41 = vsel %vm1662_vm7, %v4437_v29, %v8079_v15  ;;  %v4451_v60 = vsel %vm1662_vm7, %v8120_v25, %v4437_v29 }
 0x8d7   :  { %v4458_v39 = vmul.f32 %v4451_v60, %v8790_v26  ;;  %v4459_v51 = vmul.f32 %v4449_v41, %v8789_v36  ;;  %5986 = vmatmul.mubr.msk.bf16.vlgmr.msra.gmra.mrb[60].mxu1 %vm3694_vm12, %v6396_v13 }
 0x8d8   :  { %4549 = vmatprep.mubr.bf16.mxu1 %v8777_v18 }
 0x8d9   :  { %v4569_v54 = vpop.permute.xlu0 %4568  ;;  %v4462_v61 = vpack.c.bf16 %v4458_v39, %v4454_v38  ;;  %v4445_v24 = vpop.permute.xlu1 %4444  ;;  %v4463_v33 = vpack.c.bf16 %v4459_v51, %v4455_v62  ;;  %v6568_v62 = vld [vmem:[%s8670_s4 + $0x28] ss:$0 sm:$0xff]  ;;  %v6569_v38 = vld [vmem:[%s8670_s4 + $0x20] ss:$0 sm:$0xff] }
 0x8da   :  { %v4447_v14 = vsel %vm1662_vm7, %v8079_v15, %v4445_v24  ;;  %v4453_v28 = vsel %vm1662_vm7, %v4445_v24, %v8120_v25  ;;  %v4586_v25 = vsel %vm1813_vm8, %v4573_v47, %v4577_v48  ;;  %v4588_v37 = vsel %vm1813_vm8, %v4569_v54, %v4573_v47 }
 0x8db   :  { %v4460_v5 = vmul.f32 %v4447_v14, %v8791_v42  ;;  %v4461_v49 = vmul.f32 %v4453_v28, %v8792_v21  ;;  %4474 = vmatprep.subr.bf16.mxu0 %v4463_v33  ;;  %v4593_v32 = vmul.f32 %v4586_v25, %v8793_v57  ;;  %v4592_v43 = vmul.f32 %v4588_v37, %v8794_v11  ;;  %v6570_v42 = vld [vmem:[%s8670_s4 + $0x30] ss:$0 sm:$0xff]  ;;  %v6571_v21 = vld [vmem:[%s8670_s4 + $0x38] ss:$0 sm:$0xff] }
 0x8dc   :  { %4475 = vmatpush1.bf16.msra.mxu0 %v4462_v61 }
 0x8dd   :  { %v4581_v59 = vpop.permute.xlu0 %4580  ;;  %v4464_v15 = vpack.c.bf16 %v4460_v5, %v4456_v63  ;;  %v4717_v9 = vpop.permute.xlu1 %4716  ;;  %v4465_v45 = vpack.c.bf16 %v4461_v49, %v4457_v10  ;;  %v6399_v49 = vld [vmem:[%s8675_s15 + $0x40] sm:$0xff]  }
 0x8de   :  { %v4584_v3 = vsel %vm1813_vm8, %v4577_v48, %v4581_v59  ;;  %v4590_v53 = vsel %vm1813_vm8, %v4581_v59, %v4569_v54  ;;  %v8797_v59 = vld [vmem:[#allocation8_spill] sm:$0xff] }
 0x8df   :  { %5988 = vmatmul.mubr.msk.bf16.vlgmr.msra.gmra.mrb[52].mxu0 %vm3694_vm12, %v6397_v17  ;;  %4517 = vmatprep.subr.bf16.mxu1 %v4465_v45  ;;  %v4594_v35 = vmul.f32 %v4584_v3, %v8795_v19  ;;  %v4595_v55 = vmul.f32 %v4590_v53, %v8796_v8 }
 0x8e0   :  { %4518 = vmatpush1.bf16.msra.mxu1 %v4464_v15  ;;  %4644 = vmatprep.mubr.bf16.mxu0 %v8777_v18  ;;  %v8799_v15 = vld [vmem:[#allocation6_spill] sm:$0xff] }
 0x8e1   :  { %v4711_v23 = vpop.permute.xlu0 %4710  ;;  %v4575_v50 = vpop.permute.xlu1 %4574 }
 0x8e2   :  { %v4587_v4 = vsel %vm1813_vm8, %v4575_v50, %v8125_v30  ;;  %v4589_v2 = vsel %vm1813_vm8, %v4571_v1, %v4575_v50 }
 0x8e3   :  { %v4596_v52 = vmul.f32 %v4589_v2, %v8794_v11  ;;  %v4597_v7 = vmul.f32 %v4587_v4, %v8793_v57  ;;  %5989 = vmatmul.mubr.msk.bf16.vlgmr.msra.gmra.mrb[60].mxu1 %vm3694_vm12, %v6397_v17 }
 0x8e4   :  { %4687 = vmatprep.mubr.bf16.mxu1 %v8777_v18 }
 0x8e5   :  { %v4715_v56 = vpop.permute.xlu0 %4714  ;;  %v4600_v44 = vpack.c.bf16 %v4596_v52, %v4592_v43  ;;  %v4583_v16 = vpop.permute.xlu1 %4582  ;;  %v4601_v46 = vpack.c.bf16 %v4597_v7, %v4593_v32 }
 0x8e6   :  { %v4585_v58 = vsel %vm1813_vm8, %v8125_v30, %v4583_v16  ;;  %v4591_v12 = vsel %vm1813_vm8, %v4583_v16, %v4571_v1  ;;  %v4724_v1 = vsel %vm1964_vm9, %v4711_v23, %v4715_v56 }
 0x8e7   :  { %v4598_v13 = vmul.f32 %v4585_v58, %v8795_v19  ;;  %v4599_v47 = vmul.f32 %v4591_v12, %v8796_v8  ;;  %4612 = vmatprep.subr.bf16.mxu0 %v4601_v46  ;;  %v4731_v26 = vmul.f32 %v6568_v62, %v4724_v1  ;;  %v3646_v1 = vld [vmem:[%s8676_s16 + $0x78] sm:$0xff] }
 0x8e8   :  { %4613 = vmatpush1.bf16.msra.mxu0 %v4600_v44 }
 0x8e9   :  { %v4707_v6 = vpop.permute.xlu0 %4706  ;;  %v4602_v27 = vpack.c.bf16 %v4598_v13, %v4594_v35  ;;  %v4709_v30 = vpop.permute.xlu1 %4708  ;;  %v4603_v40 = vpack.c.bf16 %v4599_v47, %v4595_v55 }
 0x8ea   :  { %v4726_v48 = vsel %vm1964_vm9, %v4707_v6, %v4711_v23 }
 0x8eb   :  { %5991 = vmatmul.mubr.msk.bf16.vlgmr.msra.gmra.mrb[52].mxu0 %vm3694_vm12, %v6398_v22  ;;  %4655 = vmatprep.subr.bf16.mxu1 %v4603_v40  ;;  %v4730_v39 = vmul.f32 %v6569_v38, %v4726_v48  ;;  %v3633_v40 = vld [vmem:[%s8676_s16 + $0x10] sm:$0xff]  ;;  %v3643_v48 = vld [vmem:[%s8676_s16 + $0x60] sm:$0xff] }
 0x8ec   :  { %4656 = vmatpush1.bf16.msra.mxu1 %v4602_v27  ;;  %4782 = vmatprep.mubr.bf16.mxu0 %v8777_v18  ;;  %v3634_v27 = vld [vmem:[%s8676_s16 + $0x18] sm:$0xff] }
 0x8ed   :  { %v4713_v29 = vpop.permute.xlu1 %4712  ;;  %v4719_v41 = vpop.permute.xlu0 %4718 }
 0x8ee   :  { %v4725_v60 = vsel %vm1964_vm9, %v4713_v29, %v4717_v9  ;;  %v4727_v36 = vsel %vm1964_vm9, %v4709_v30, %v4713_v29  ;;  %v4722_v0 = vsel %vm1964_vm9, %v4715_v56, %v4719_v41  ;;  %v4728_v54 = vsel %vm1964_vm9, %v4719_v41, %v4707_v6  ;;  %v3632_v6 = vld [vmem:[%s8676_s16 + $0x8] sm:$0xff]  ;;  %v3645_v41 = vld [vmem:[%s8676_s16 + $0x70] sm:$0xff] }
 0x8ef   :  { %v4734_v51 = vmul.f32 %v6569_v38, %v4727_v36  ;;  %v4735_v20 = vmul.f32 %v6568_v62, %v4725_v60  ;;  %5992 = vmatmul.mubr.msk.bf16.vlgmr.msra.gmra.mrb[60].mxu1 %vm3694_vm12, %v6398_v22  ;;  %v4732_v63 = vmul.f32 %v6570_v42, %v4722_v0  ;;  %v4733_v10 = vmul.f32 %v6571_v21, %v4728_v54  ;;  %v3636_v29 = vld [vmem:[%s8676_s16 + $0x28] sm:$0xff]  ;;  %v3635_v36 = vld [vmem:[%s8676_s16 + $0x20] sm:$0xff]  ;;  %v3638_v62 = vld [vmem:[%s8676_s16 + $0x38] sm:$0xff] }
 0x8f0   :  { %4825 = vmatprep.mubr.bf16.mxu1 %v8777_v18  ;;  %v3640_v60 = vld [vmem:[%s8676_s16 + $0x48] sm:$0xff]  ;;  %v3642_v38 = vld [vmem:[%s8676_s16 + $0x58] sm:$0xff]  ;;  %v3641_v0 = vld [vmem:[%s8676_s16 + $0x50] sm:$0xff] }
 0x8f1   :  { %v4738_v61 = vpack.c.bf16 %v4734_v51, %v4730_v39  ;;  %v4721_v24 = vpop.permute.xlu1 %4720  ;;  %v4739_v33 = vpack.c.bf16 %v4735_v20, %v4731_v26  ;;  %v3639_v26 = vld [vmem:[%s8676_s16 + $0x40] sm:$0xff]  ;;  %v3637_v39 = vld [vmem:[%s8676_s16 + $0x30] sm:$0xff]  ;;  %v3648_v51 = vld [vmem:[%s8676_s16 + $0x88] sm:$0xff] }
 0x8f2   :  { %v4723_v14 = vsel %vm1964_vm9, %v4717_v9, %v4721_v24  ;;  %v4729_v28 = vsel %vm1964_vm9, %v4721_v24, %v4709_v30  ;;  %v8801_v9 = vld [vmem:[#allocation9_spill] sm:$0xff]  ;;  %v3644_v30 = vld [vmem:[%s8676_s16 + $0x68] sm:$0xff]  ;;  %v5603_v20 = vsub.f32 1.0, %v3648_v51  ;;  %v3647_v54 = vld [vmem:[%s8676_s16 + $0x80] sm:$0xff] }
 0x8f3   :  { %v4736_v18 = vmul.f32 %v6570_v42, %v4723_v14  ;;  %v4737_v5 = vmul.f32 %v6571_v21, %v4729_v28  ;;  %4750 = vmatprep.subr.bf16.mxu0 %v4739_v33  ;;  %v5602_v24 = vsub.f32 1.0, %v3647_v54  ;;  %v5640_v33 = vld [vmem:[%s8677_s18] sm:$0xff] }
 0x8f4   :  { %4751 = vmatpush1.bf16.msra.mxu0 %v4738_v61  ;;  %v5641_v61 = vld [vmem:[%s8677_s18 + $0x8] sm:$0xff] }
 0x8f5   :  { %v4740_v34 = vpack.c.bf16 %v4736_v18, %v4732_v63  ;;  %v4741_v17 = vpack.c.bf16 %v4737_v5, %v4733_v10  ;;  %4970 = vmatprep.subr.mxu0 %v8797_v59 }
 0x8f7   :  { %5994 = vmatmul.mubr.msk.bf16.vlgmr.msra.gmra.mrb[52].mxu0 %vm3694_vm12, %v6399_v49  ;;  %4793 = vmatprep.subr.bf16.mxu1 %v4741_v17 }
 0x8f8   :  { %4794 = vmatpush1.bf16.msra.mxu1 %v4740_v34 }
 0x8f9   :  { %5996 = vmatprep.subr.msk.mxu1 %vm8798_vm14, %v8797_v59  ;;  %vm8812_vm14 = vmmov %vm8808_vm11 }
 0x8fb   :  { %5995 = vmatmul.mubr.msk.bf16.vlgmr.msra.gmra.mrb[60].mxu1 %vm3694_vm12, %v6399_v49  ;;  %vm8811_vm12 = vmmov %vm8808_vm11 }
 0x8fc   :  { %5997 = vmatpush1.msk.msra.mxu1 %vm8800_vm4, %v8799_v15  ;;  %5226 = vmatprep.mubr.f32.mxu1 %v8776_v31  ;;  %vm8813_vm4 = vmmov %vm8808_vm11 }
 0x8fd   :  { %4971 = vmatpush1.xpose.msra.mxu0 %v8799_v15  ;;  %6002 = vmatprep.subr.msk.mxu1 %vm8802_vm5, %v8801_v9  ;;  %vm8814_vm5 = vmmov %vm8813_vm4 }
 0x8fe   :  { %5055 = vmatprep.subr.mxu0 %v8801_v9 }
 0x902   :  { %v8376_v14 = vpop.permute.xlu1 %4904 }
 0x9ca   :  { %v8279_v45 = vpop.f32.mrb[52].mxu0 }
 0x9cb   :  { %v4854_v25 = vmul.f32 %v8279_v45, %v8279_v45  ;;  %v8283_v37 = vpop.f32.mrb[53].mxu0 }
 0x9cc   :  { %v4844_v23 = vadd.f32 %v8283_v37, %v8279_v45  ;;  %v4855_v50 = vmul.f32 %v8283_v37, %v8283_v37  ;;  %v8289_v4 = vpop.f32.mrb[54].mxu0 }
 0x9cd   :  { %v4858_v2 = vmul.f32 %v8289_v4, %v8289_v4  ;;  %v8293_v57 = vpop.f32.mrb[55].mxu0 }
 0x9ce   :  { %v4862_v32 = vadd.f32 %v4855_v50, %v4854_v25  ;;  %v4849_v11 = vadd.f32 %v8293_v57, %v8289_v4  ;;  %v4859_v43 = vmul.f32 %v8293_v57, %v8293_v57  ;;  %v8299_v52 = vpop.f32.mrb[60].mxu1 }
 0x9cf   :  { %v4845_v7 = vadd.f32 %v4844_v23, %v8299_v52  ;;  %v4856_v3 = vmul.f32 %v8299_v52, %v8299_v52  ;;  %v8304_v53 = vpop.f32.mrb[61].mxu1 }
 0x9d0   :  { %v4867_v56 = vadd.f32 %v4859_v43, %v4858_v2  ;;  %v4857_v44 = vmul.f32 %v8304_v53, %v8304_v53  ;;  %v8308_v16 = vpop.f32.mrb[62].mxu1 }
 0x9d1   :  { %v4863_v46 = vadd.f32 %v4862_v32, %v4856_v3  ;;  %v4846_v58 = vadd.f32 %v4845_v7, %v8304_v53  ;;  %v4850_v12 = vadd.f32 %v4849_v11, %v8308_v16  ;;  %v4860_v19 = vmul.f32 %v8308_v16, %v8308_v16  ;;  %v8314_v35 = vpop.f32.mrb[63].mxu1 }
 0x9d2   :  { %v4861_v8 = vmul.f32 %v8314_v35, %v8314_v35 }
 0x9d3   :  { %v4868_v55 = vadd.f32 %v4867_v56, %v4860_v19  ;;  %v4851_v13 = vadd.f32 %v4850_v12, %v8314_v35  ;;  %4847 = vadd.xlane.f32.xlu0 %v4846_v58  ;;  %v4864_v47 = vadd.f32 %v4863_v46, %v4857_v44 }
 0x9d5   :  { %4865 = vadd.xlane.f32.xlu1 %v4864_v47  ;;  %v4869_v22 = vadd.f32 %v4868_v55, %v4861_v8 }
 0x9d7   :  { %4852 = vadd.xlane.f32.xlu0 %v4851_v13 }
 0x9db   :  { %4870 = vadd.xlane.f32.xlu0 %v4869_v22 }
 0x9e6   :  { %4909 = vperm.xlu1 %6380, %v3632_v6  }
 0x9ea   :  { %4927 = vperm.xlu1 %6380, %v3634_v27  }
 0x9ee   :  { %5463 = vperm.xlu1 %6380, %v3644_v30  }
 0x9f1   :  { %4922 = vperm.xlu0 %6379, %v3633_v40  }
 0x9f2   :  { %5481 = vperm.xlu1 %6380, %v3646_v1  }
 0x9f5   :  { %5458 = vperm.xlu0 %6379, %v3643_v48  }
 0x9f6   :  { %5347 = vperm.xlu1 %6380, %v3636_v29  }
 0x9f9   :  { %5476 = vperm.xlu0 %6379, %v3645_v41  }
 0x9fa   :  { %5499 = vperm.xlu1 %6380, %v3640_v60  }
 0x9fd   :  { %5342 = vperm.xlu0 %6379, %v3635_v36  }
 0x9fe   :  { %5365 = vperm.xlu1 %6380, %v3638_v62   ;;  %v8803_v62 = vld [vmem:[#allocation7_spill] sm:$0xff] }
 0xa01   :  { %5494 = vperm.xlu0 %6379, %v3639_v26  }
 0xa02   :  { %5517 = vperm.xlu1 %6380, %v3642_v38   ;;  %v8804_v38 = vld [vmem:[#allocation3_spill] sm:$0xff] }
 0xa05   :  { %5360 = vperm.xlu0 %6379, %v3637_v39  }
 0xa06   :  { %5591 = vperm.xlu1 %6380, %v3648_v51  }
 0xa09   :  { %5512 = vperm.xlu0 %6379, %v3641_v0  }
 0xa0a   :  { %5619 = vperm.xlu1 %6380, %v5603_v20  }
 0xa0d   :  { %5586 = vperm.xlu0 %6379, %v3647_v54  }
 0xa0e   :  { %5649 = vperm.xlu1 %6380, %v5641_v61  }
 0xa11   :  { %5614 = vperm.xlu0 %6379, %v5602_v24  }
 0xa15   :  { %5644 = vperm.xlu0 %6379, %v5640_v33  }
 0xa60   :  { %v4848_v28 = vpop.xlane.xlu0 %4847 }
 0xa61   :  { %v4872_v42 = vmul.f32 0.001953125, %v4848_v28 }
 0xa62   :  { %v4866_v63 = vpop.xlane.xlu1 %4865 }
 0xa63   :  { %v4874_v21 = vmul.f32 0.001953125, %v4866_v63  ;;  %v4876_v10 = vmul.f32 %v4872_v42, %v4872_v42  ;;  %v4882_v2 = vsub.f32 %v8279_v45, %v4872_v42  ;;  %v4883_v32 = vsub.f32 %v8283_v37, %v4872_v42 }
 0xa64   :  { %v4853_v18 = vpop.xlane.xlu0 %4852  ;;  %v4885_v46 = vsub.f32 %v8304_v53, %v4872_v42  ;;  %v4884_v1 = vsub.f32 %v8299_v52, %v4872_v42 }
 0xa65   :  { %v4878_v5 = vsub.f32 %v4874_v21, %v4876_v10  ;;  %v4873_v49 = vmul.f32 0.001953125, %v4853_v18 }
 0xa66   :  { %v4910_v44 = vpop.permute.xlu1 %4909 }
 0xa67   :  { %v4880_v34 = vmax.f32 %v4878_v5, 0.0  ;;  %v4877_v15 = vmul.f32 %v4873_v49, %v4873_v49  ;;  %v4886_v12 = vsub.f32 %v8289_v4, %v4873_v49  ;;  %v4887_v19 = vsub.f32 %v8293_v57, %v4873_v49 }
 0xa68   :  { %v4871_v17 = vpop.xlane.xlu0 %4870  ;;  %v4889_v53 = vsub.f32 %v8314_v35, %v4873_v49  ;;  %v4888_v26 = vsub.f32 %v8308_v16, %v4873_v49 }
 0xa69   :  { %v4890_v59 = vadd.f32 1e-05, %v4880_v34  ;;  %v4875_v9 = vmul.f32 0.001953125, %v4871_v17 }
 0xa6a   :  { %v4928_v40 = vpop.permute.xlu1 %4927 }
 0xa6b   :  { %6484 = vrsqrt.f32 %v4890_v59  ;;  %v4879_v25 = vsub.f32 %v4875_v9, %v4877_v15  ;;  %v8805_v15 = vld [vmem:[#allocation2_spill] sm:$0xff] }
 0xa6d   :  { %v4881_v23 = vmax.f32 %v4879_v25, 0.0 }
 0xa6f   :  { %v4891_v50 = vadd.f32 1e-05, %v4881_v23 }
 0xa70   :  { %v4923_v58 = vpop.permute.xlu0 %4922 }
 0xa71   :  { %6486 = vrsqrt.f32 %v4891_v50 }
 0xa75   :  { %v6485_v11 = vpop.eup %6484 }
 0xa76   :  { %v4894_v43 = vmul.f32 %v6485_v11, %v4882_v2  ;;  %v4895_v7 = vmul.f32 %v6485_v11, %v4883_v32  ;;  %v4897_v47 = vmul.f32 %v6485_v11, %v4885_v46  ;;  %v4896_v60 = vmul.f32 %v6485_v11, %v4884_v1  ;;  %v5638_v32 = vld [vmem:[%s8678_s17] sm:$0xff]  ;;  %v5639_v11 = vld [vmem:[%s8678_s17 + $0x8] sm:$0xff]  ;;  %v8810_v46 = vld [vmem:[#allocation5_spill] sm:$0xff] }
 0xa78   :  { %v4912_v3 = vmul.f32 %v8376_v14, %v4894_v43  ;;  %v4913_v56 = vmul.f32 %v8376_v14, %v4895_v7  ;;  %v4915_v36 = vmul.f32 %v8376_v14, %v4897_v47  ;;  %v4914_v0 = vmul.f32 %v8376_v14, %v4896_v60  ;;  %v8476_v60 = vpop.permute.xlu1 %5463 }
 0xa7a   :  { %v4930_v8 = vadd.f32 %v4923_v58, %v4912_v3  ;;  %v4931_v55 = vadd.f32 %v4923_v58, %v4913_v56  ;;  %v4933_v24 = vadd.f32 %v4923_v58, %v4915_v36  ;;  %v4932_v28 = vadd.f32 %v4923_v58, %v4914_v0 }
 0xa7b   :  { %v6487_v45 = vpop.eup %6486 }
 0xa7c   :  { %v4898_v13 = vmul.f32 %v6487_v45, %v4886_v12  ;;  %v4899_v37 = vmul.f32 %v6487_v45, %v4887_v19  ;;  %vm4939_vm6 = vcmp.ge.f32.partialorder %v4931_v55, 0.0  ;;  %v4947_v22 = vmul.f32 0.2, %v4931_v55 }
 0xa7d   :  { %vm4938_vm7 = vcmp.ge.f32.partialorder %v4930_v8, 0.0  ;;  %v4946_v6 = vmul.f32 0.2, %v4930_v8  ;;  %v4901_v41 = vmul.f32 %v6487_v45, %v4889_v53  ;;  %v4900_v20 = vmul.f32 %v6487_v45, %v4888_v26 }
 0xa7e   :  { %v4916_v27 = vmul.f32 %v4910_v44, %v4898_v13  ;;  %v4917_v30 = vmul.f32 %v4910_v44, %v4899_v37  ;;  %v8387_v4 = vsel %vm4939_vm6, %v4931_v55, %v4947_v22  ;;  %v4949_v14 = vmul.f32 0.2, %v4933_v24  ;;  %vm8816_vm6 = vmmov %vm8813_vm4 }
 0xa7f   :  { %v8389_v57 = vsel %vm4938_vm7, %v4930_v8, %v4946_v6  ;;  %5034 = vmatprep.mubr.f32.mxu0 %v8387_v4  ;;  %v4963_v54 = vmul.f32 %v8387_v4, %v8387_v4  ;;  %v4919_v61 = vmul.f32 %v4910_v44, %v4901_v41  ;;  %v4918_v33 = vmul.f32 %v4910_v44, %v4900_v20  ;;  %vm8817_vm7 = vmmov %vm8813_vm4  ;;  %v8474_v41 = vpop.permute.xlu0 %5458 }
 0xa80   :  { %v4934_v48 = vadd.f32 %v4928_v40, %v4916_v27  ;;  %v4935_v29 = vadd.f32 %v4928_v40, %v4917_v30  ;;  %5035 = vmatmul.mubr.f32.vlgmr.msra.gmra.mrb[50].mxu0 %v8389_v57  ;;  %v4962_v16 = vmul.f32 %v8389_v57, %v8389_v57  ;;  %vm4941_vm0 = vcmp.ge.f32.partialorder %v4933_v24, 0.0 }
 0xa81   :  { %5056 = vmatpush1.xpose.msra.mxu0 %v8803_v62  ;;  %v4937_v63 = vadd.f32 %v4928_v40, %v4919_v61  ;;  %v4936_v10 = vadd.f32 %v4928_v40, %v4918_v33  ;;  %v4948_v18 = vmul.f32 0.2, %v4932_v28  ;;  %v8412_v5 = vsel %vm4941_vm0, %v4933_v24, %v4949_v14 }
 0xa82   :  { %vm4943_vm8 = vcmp.ge.f32.partialorder %v4935_v29, 0.0  ;;  %v4951_v35 = vmul.f32 0.2, %v4935_v29  ;;  %vm4942_vm9 = vcmp.ge.f32.partialorder %v4934_v48, 0.0  ;;  %v4950_v52 = vmul.f32 0.2, %v4934_v48  ;;  %5658 = vmatprep.subr.mxu0 %v8804_v38 }
 0xa83   :  { %vm4940_vm3 = vcmp.ge.f32.partialorder %v4932_v28, 0.0  ;;  %v4953_v49 = vmul.f32 0.2, %v4937_v63  ;;  %vm4945_vm2 = vcmp.ge.f32.partialorder %v4937_v63, 0.0  ;;  %v4952_v17 = vmul.f32 0.2, %v4936_v10  ;;  %v8478_v36 = vpop.permute.xlu0 %5476 }
 0xa84   :  { %v8397_v39 = vsel %vm4943_vm8, %v4935_v29, %v4951_v35  ;;  %v8399_v51 = vsel %vm4942_vm9, %v4934_v48, %v4950_v52  ;;  %v8415_v34 = vsel %vm4940_vm3, %v4932_v28, %v4948_v18  ;;  %vm4944_vm1 = vcmp.ge.f32.partialorder %v4936_v10, 0.0  ;;  %v8815_v29 = vld [vmem:[#allocation4_spill] sm:$0xff]  ;;  %vm8818_vm8 = vmmov %vm8813_vm4  ;;  %v8480_v52 = vpop.permute.xlu1 %5481 }
 0xa85   :  { %5039 = vmatprep.mubr.f32.mxu0 %v8397_v39  ;;  %v4967_v42 = vmul.f32 %v8397_v39, %v8397_v39  ;;  %v4966_v21 = vmul.f32 %v8399_v51, %v8399_v51  ;;  %v8418_v59 = vsel %vm4945_vm2, %v4937_v63, %v4953_v49  ;;  %v8422_v9 = vsel %vm4944_vm1, %v4936_v10, %v4952_v17  ;;  %vm8819_vm9 = vmmov %vm8807_vm10 }
 0xa86   :  { %5040 = vmatmul.mubr.f32.gmra.mrb[56].mxu0 %v8399_v51  ;;  %v4965_v25 = vmul.f32 %v8412_v5, %v8412_v5  ;;  %v4964_v23 = vmul.f32 %v8415_v34, %v8415_v34  ;;  %v4969_v50 = vmul.f32 %v8418_v59, %v8418_v59  ;;  %v4968_v2 = vmul.f32 %v8422_v9, %v8422_v9  ;;  %vm8820_vm0 = vmmov %vm8819_vm9 }
 0xa87   :  { %5044 = vmatprep.mubr.f32.mxu0 %v4963_v54  ;;  %v8484_v20 = vpop.permute.xlu0 %5342 }
 0xa88   :  { %v8486_v0 = vpop.permute.xlu1 %5347 }
 0xa8a   :  { %5045 = vmatmul.mubr.f32.gmra.mrb[58].mxu0 %v4962_v16 }
 0xa8b   :  { %5049 = vmatprep.mubr.f32.mxu0 %v4967_v42 }
 0xa8c   :  { %v8491_v28 = vpop.permute.xlu1 %5499 }
 0xa8e   :  { %5050 = vmatmul.mubr.f32.gmra.mrb[60].mxu0 %v4966_v21 }
 0xa8f   :  { %5119 = vmatprep.mubr.f32.mxu0 %v8412_v5 }
 0xa92   :  { %5120 = vmatmul.mubr.f32.vlgmr.msra.gmra.mrb[50].mxu0 %v8415_v34 }
 0xa93   :  { %5659 = vmatpush1.msra.mxu0 %v8805_v15  ;;  %5124 = vmatprep.mubr.f32.mxu0 %v8418_v59 }
 0xa96   :  { %5125 = vmatmul.mubr.f32.gmra.mrb[56].mxu0 %v8422_v9 }
 0xa97   :  { %5129 = vmatprep.mubr.f32.mxu0 %v4965_v25 }
 0xa9a   :  { %5130 = vmatmul.mubr.f32.gmra.mrb[58].mxu0 %v4964_v23 }
 0xa9b   :  { %5134 = vmatprep.mubr.f32.mxu0 %v4969_v50 }
 0xa9e   :  { %5135 = vmatmul.mubr.f32.gmra.mrb[60].mxu0 %v4968_v2  ;;  %v8505_v2 = vpop.permute.xlu1 %5365 }
 0xa9f   :  { %5722 = vmatprep.mubr.f32.mxu0 %v8776_v31 }
 0xaa2   :  { %6024 = vmatmul.mubr.msk.f32.vlgmr.msra.gmra.mrb[62].mxu0 %vm8806_vm15, %v5638_v32 }
 0xaa3   :  { %5728 = vmatprep.mubr.f32.mxu0 %v8776_v31 }
 0xaa6   :  { %6025 = vmatmul.mubr.msk.f32.gmra.mrb[64].mxu0 %vm8807_vm10, %v5639_v11 }
 0xb65   :  { %v5121_v43 = vpop.f32.mrb[50].mxu0 }
 0xb66   :  { %v5140_v7 = vmul.f32 0.00390625, %v5121_v43  ;;  %v5123_v3 = vpop.f32.mrb[51].mxu0 }
 0xb68   :  { %5998 = vmatmul.mubr.msk.f32.vlgmr.msra.gmra.mrb[58].mxu1 %vm8808_vm11, %v5140_v7  ;;  %v5144_v8 = vmul.f32 %v5140_v7, %v5140_v7 }
 0xb69   :  { %6003 = vmatpush1.msk.msra.mxu1 %vm8809_vm13, %v8803_v62  ;;  %v5126_v56 = vpop.f32.mrb[56].mxu0  ;;  %5232 = vmatprep.mubr.f32.mxu1 %v8776_v31 }
 0xb6a   :  { %v5141_v44 = vmul.f32 0.00390625, %v5126_v56  ;;  %5735 = vmatprep.subr.mxu1 %v8810_v46  ;;  %v5128_v58 = vpop.f32.mrb[57].mxu0 }
 0xb6c   :  { %5999 = vmatmul.mubr.msk.f32.gmra.mrb[64].mxu1 %vm8811_vm12, %v5141_v44  ;;  %v5145_v22 = vmul.f32 %v5141_v44, %v5141_v44 }
 0xb6d   :  { %v5131_v12 = vpop.f32.mrb[58].mxu0  ;;  %5238 = vmatprep.mubr.f32.mxu1 %v8776_v31 }
 0xb6e   :  { %v5142_v19 = vmul.f32 0.00390625, %v5131_v12  ;;  %v5133_v55 = vpop.f32.mrb[59].mxu0 }
 0xb70   :  { %v5146_v45 = vsub.f32 %v5142_v19, %v5144_v8 }
 0xb71   :  { %v5136_v13 = vpop.f32.mrb[60].mxu0 }
 0xb72   :  { %v5148_v37 = vmax.f32 %v5146_v45, 0.0  ;;  %v5143_v47 = vmul.f32 0.00390625, %v5136_v13  ;;  %v5138_v6 = vpop.f32.mrb[61].mxu0 }
 0xb74   :  { %v5147_v27 = vsub.f32 %v5143_v47, %v5145_v22  ;;  %6000 = vmatmul.mubr.msk.f32.gmra.mrb[66].mxu1 %vm8812_vm14, %v5148_v37 }
 0xb75   :  { %v8451_v30 = vpop.f32.mrb[62].mxu0  ;;  %5244 = vmatprep.mubr.f32.mxu1 %v8776_v31 }
 0xb76   :  { %v5149_v40 = vmax.f32 %v5147_v27, 0.0  ;;  %v8454_v53 = vpop.f32.mrb[63].mxu0 }
 0xb78   :  { %6001 = vmatmul.mubr.msk.f32.gmra.mrb[68].mxu1 %vm8813_vm4, %v5149_v40 }
 0xb79   :  { %v8457_v1 = vpop.f32.mrb[64].mxu0  ;;  %5315 = vmatprep.mubr.f32.mxu1 %v8776_v31 }
 0xb7a   :  { %v8460_v48 = vpop.f32.mrb[65].mxu0 }
 0xb7c   :  { %6004 = vmatmul.mubr.msk.f32.vlgmr.msra.gmra.mrb[70].mxu1 %vm8814_vm5, %v5140_v7 }
 0xb7d   :  { %5736 = vmatpush1.msra.mxu1 %v8815_v29  ;;  %5321 = vmatprep.mubr.f32.mxu1 %v8776_v31 }
 0xb80   :  { %6005 = vmatmul.mubr.msk.f32.gmra.mrb[72].mxu1 %vm8816_vm6, %v5141_v44 }
 0xb81   :  { %5327 = vmatprep.mubr.f32.mxu1 %v8776_v31 }
 0xb84   :  { %6006 = vmatmul.mubr.msk.f32.gmra.mrb[74].mxu1 %vm8817_vm7, %v5148_v37 }
 0xb85   :  { %5333 = vmatprep.mubr.f32.mxu1 %v8776_v31 }
 0xb88   :  { %6007 = vmatmul.mubr.msk.f32.gmra.mrb[76].mxu1 %vm8818_vm8, %v5149_v40 }
 0xb89   :  { %5799 = vmatprep.mubr.f32.mxu1 %v8776_v31 }
 0xb8c   :  { %6026 = vmatmul.mubr.msk.f32.vlgmr.msra.gmra.mrb[78].mxu1 %vm8819_vm9, %v5638_v32 }
 0xb8d   :  { %5805 = vmatprep.mubr.f32.mxu1 %v8776_v31  ;;  %v8488_v31 = vpop.permute.xlu0 %5494 }
 0xb90   :  { %6027 = vmatmul.mubr.msk.f32.gmra.mrb[80].mxu1 %vm8820_vm0, %v5639_v11 }
 0xb91   :  { %v8494_v10 = vpop.permute.xlu0 %5360 }
 0xc3b   :  { %v5228_v62 = vpop.f32.mrb[58].mxu1 }
 0xc3c   :  { %v5230_v35 = vpop.f32.mrb[59].mxu1  ;;  %v5350_v33 = vmul.f32 %v8484_v20, %v5228_v62  ;;  %v5424_v43 = vsub.f32 %v8389_v57, %v5228_v62 }
 0xc3d   :  { %v5351_v63 = vmul.f32 %v8484_v20, %v5230_v35  ;;  %v5425_v46 = vsub.f32 %v8387_v4, %v5230_v35 }
 0xc3e   :  { %v5368_v49 = vadd.f32 %v8494_v10, %v5350_v33 }
 0xc3f   :  { %v5234_v26 = vpop.f32.mrb[64].mxu1  ;;  %v5369_v23 = vadd.f32 %v8494_v10, %v5351_v63 }
 0xc40   :  { %v8482_v38 = vpop.f32.mrb[65].mxu1  ;;  %v5354_v17 = vmul.f32 %v8486_v0, %v5234_v26  ;;  %v6008_v32 = vmul.f32 -1.442695, %v5368_v49  ;;  %v5428_v45 = vsub.f32 %v8399_v51, %v5234_v26 }
 0xc41   :  { %v5355_v15 = vmul.f32 %v8486_v0, %v8482_v38  ;;  %v6009_v44 = vmul.f32 -1.442695, %v5369_v23 }
 0xc42   :  { %v5372_v11 = vadd.f32 %v8505_v2, %v5354_v17 }
 0xc43   :  { %v5373_v7 = vadd.f32 %v8505_v2, %v5355_v15 }
 0xc44   :  { %v6012_v8 = vmul.f32 -1.442695, %v5372_v11 }
 0xc45   :  { %v6013_v13 = vmul.f32 -1.442695, %v5373_v7 }
 0xc47   :  { %v5240_v54 = vpop.f32.mrb[66].mxu1 }
 0xc48   :  { %v5432_v61 = vadd.f32 1e-05, %v5240_v54  ;;  %v5242_v24 = vpop.f32.mrb[67].mxu1  ;;  %v5429_v54 = vsub.f32 %v8397_v39, %v8482_v38 }
 0xc49   :  { %v5433_v16 = vadd.f32 1e-05, %v5242_v24 }
 0xc4a   :  { %6488 = vrsqrt.f32 %v5432_v61 }
 0xc4b   :  { %6490 = vrsqrt.f32 %v5433_v16  ;;  %v5246_v42 = vpop.f32.mrb[68].mxu1 }
 0xc4c   :  { %v5436_v14 = vadd.f32 1e-05, %v5246_v42  ;;  %v5248_v21 = vpop.f32.mrb[69].mxu1  ;;  %v8524_v42 = vpop.permute.xlu0 %5512 }
 0xc4d   :  { %v5437_v18 = vadd.f32 1e-05, %v5248_v21 }
 0xc4e   :  { %6492 = vrsqrt.f32 %v5436_v14 }
 0xc4f   :  { %v8500_v25 = vpop.f32.mrb[70].mxu1  ;;  %6494 = vrsqrt.f32 %v5437_v18 }
 0xc50   :  { %v8503_v50 = vpop.f32.mrb[71].mxu1  ;;  %6496 = vpow2.f32 %v6008_v32  ;;  %v5352_v15 = vmul.f32 %v8484_v20, %v8500_v25 }
 0xc51   :  { %6498 = vpow2.f32 %v6009_v44  ;;  %v8538_v44 = vpop.permute.xlu1 %5517 }
 0xc52   :  { %6500 = vpow2.f32 %v6012_v8 }
 0xc53   :  { %v8510_v3 = vpop.f32.mrb[72].mxu1  ;;  %6502 = vpow2.f32 %v6013_v13  ;;  %v5370_v13 = vadd.f32 %v8494_v10, %v5352_v15 }
 0xc54   :  { %v6489_v56 = vpop.eup %6488  ;;  %v8513_v58 = vpop.f32.mrb[73].mxu1 }
 0xc55   :  { %v6491_v12 = vpop.eup %6490  ;;  %v5448_v19 = vmul.f32 %v6489_v56, %v5424_v43  ;;  %v5353_v43 = vmul.f32 %v8484_v20, %v8503_v50 }
 0xc56   :  { %v5449_v55 = vmul.f32 %v6491_v12, %v5425_v46 }
 0xc57   :  { %v5466_v37 = vmul.f32 %v8474_v41, %v5448_v19  ;;  %v5329_v47 = vpop.f32.mrb[74].mxu1 }
 0xc58   :  { %v6493_v22 = vpop.eup %6492  ;;  %v5467_v6 = vmul.f32 %v8474_v41, %v5449_v55  ;;  %v5434_v27 = vadd.f32 1e-05, %v5329_v47  ;;  %v5331_v40 = vpop.f32.mrb[75].mxu1  ;;  %v5356_v55 = vmul.f32 %v8486_v0, %v8510_v3 }
 0xc59   :  { %v5484_v29 = vadd.f32 %v8478_v36, %v5466_v37  ;;  %v5452_v62 = vmul.f32 %v6493_v22, %v5428_v45  ;;  %v5435_v35 = vadd.f32 1e-05, %v5331_v40  ;;  %v6495_v61 = vpop.eup %6494 }
 0xc5a   :  { %v5485_v26 = vadd.f32 %v8478_v36, %v5467_v6  ;;  %v5453_v14 = vmul.f32 %v6495_v61, %v5429_v54  ;;  %6504 = vrsqrt.f32 %v5434_v27  ;;  %v6497_v56 = vpop.eup %6496  ;;  %v5371_v6 = vadd.f32 %v8494_v10, %v5353_v43 }
 0xc5b   :  { %v5502_v24 = vmul.f32 %v8488_v31, %v5484_v29  ;;  %v5470_v16 = vmul.f32 %v8476_v60, %v5452_v62  ;;  %v5335_v33 = vpop.f32.mrb[76].mxu1  ;;  %6506 = vrsqrt.f32 %v5435_v35  ;;  %v6499_v45 = vpop.eup %6498  ;;  %v5400_v47 = vadd.f32 1.0, %v6497_v56 }
 0xc5c   :  { %v5503_v63 = vmul.f32 %v8488_v31, %v5485_v26  ;;  %v5337_v21 = vpop.f32.mrb[77].mxu1  ;;  %v5471_v17 = vmul.f32 %v8476_v60, %v5453_v14  ;;  %v5438_v23 = vadd.f32 1e-05, %v5335_v33  ;;  %v6501_v40 = vpop.eup %6500  ;;  %v5357_v62 = vmul.f32 %v8486_v0, %v8513_v58 }
 0xc5d   :  { %v5520_v18 = vadd.f32 %v8524_v42, %v5502_v24  ;;  %v5488_v38 = vadd.f32 %v8480_v52, %v5470_v16  ;;  %v5439_v37 = vadd.f32 1e-05, %v5337_v21  ;;  %v6503_v54 = vpop.eup %6502  ;;  %v5401_v26 = vadd.f32 1.0, %v6499_v45 }
 0xc5e   :  { %v5521_v49 = vadd.f32 %v8524_v42, %v5503_v63  ;;  %v5489_v12 = vadd.f32 %v8480_v52, %v5471_v17  ;;  %6508 = vrsqrt.f32 %v5438_v23  ;;  %v5426_v61 = vsub.f32 %v8415_v34, %v8500_v25 }
 0xc5f   :  { %v6016_v32 = vmul.f32 -1.442695, %v5520_v18  ;;  %v5506_v11 = vmul.f32 %v8491_v28, %v5488_v38  ;;  %v8536_v7 = vpop.f32.mrb[78].mxu1  ;;  %v5374_v24 = vadd.f32 %v8505_v2, %v5356_v55  ;;  %v6010_v33 = vmul.f32 -1.442695, %v5370_v13  ;;  %v8571_v13 = vpop.permute.xlu0 %5586 }
 0xc60   :  { %v6017_v46 = vmul.f32 -1.442695, %v5521_v49  ;;  %v8541_v19 = vpop.f32.mrb[79].mxu1  ;;  %v5507_v20 = vmul.f32 %v8491_v28, %v5489_v12  ;;  %v5427_v63 = vsub.f32 %v8412_v5, %v8503_v50  ;;  %v6011_v0 = vmul.f32 -1.442695, %v5371_v6 }
 0xc61   :  { %6510 = vpow2.f32 %v6016_v32  ;;  %v5524_v8 = vadd.f32 %v8538_v44, %v5506_v11  ;;  %v5404_v18 = vadd.f32 1.0, %v6501_v40  ;;  %v5375_v38 = vadd.f32 %v8505_v2, %v5357_v62 }
 0xc62   :  { %6512 = vpow2.f32 %v6017_v46  ;;  %v5525_v29 = vadd.f32 %v8538_v44, %v5507_v20  ;;  %v6014_v25 = vmul.f32 -1.442695, %v5374_v24  ;;  %v5430_v17 = vsub.f32 %v8422_v9, %v8510_v3 }
 0xc63   :  { %v6020_v22 = vmul.f32 -1.442695, %v5524_v8  ;;  %v8549_v27 = vpop.f32.mrb[80].mxu1  ;;  %v5405_v11 = vadd.f32 1.0, %v6503_v54  ;;  %v6015_v12 = vmul.f32 -1.442695, %v5375_v38 }
 0xc64   :  { %v8554_v35 = vpop.f32.mrb[81].mxu1  ;;  %v6505_v16 = vpop.eup %6504  ;;  %v6021_v10 = vmul.f32 -1.442695, %v5525_v29 }
 0xc65   :  { %6514 = vpow2.f32 %v6020_v22  ;;  %v6507_v14 = vpop.eup %6506  ;;  %v5450_v21 = vmul.f32 %v6505_v16, %v5426_v61 }
 0xc66   :  { %6516 = vrsqrt.f32 %v5439_v37  ;;  %v5451_v49 = vmul.f32 %v6507_v14, %v5427_v63  ;;  %v5431_v37 = vsub.f32 %v8418_v59, %v8513_v58  ;;  %v8581_v63 = vpop.permute.xlu1 %5591  ;;  %v8583_v14 = vpop.permute.xlu0 %5614 }
 0xc67   :  { %6518 = vrcp.f32 %v5400_v47  ;;  %v5468_v15 = vmul.f32 %v8474_v41, %v5450_v21 }
 0xc68   :  { %6520 = vpow2.f32 %v6021_v10  ;;  %v6509_v23 = vpop.eup %6508  ;;  %v5469_v50 = vmul.f32 %v8474_v41, %v5451_v49 }
 0xc69   :  { %6522 = vrcp.f32 %v5401_v26  ;;  %v5486_v43 = vadd.f32 %v8478_v36, %v5468_v15  ;;  %v5454_v56 = vmul.f32 %v6509_v23, %v5430_v17 }
 0xc6a   :  { %6524 = vpow2.f32 %v6010_v33  ;;  %v5487_v8 = vadd.f32 %v8478_v36, %v5469_v50 }
 0xc6b   :  { %v6511_v32 = vpop.eup %6510  ;;  %6526 = vpow2.f32 %v6011_v0  ;;  %v5504_v3 = vmul.f32 %v8488_v31, %v5486_v43  ;;  %v5472_v45 = vmul.f32 %v8476_v60, %v5454_v56  ;;  %v8591_v56 = vpop.permute.xlu1 %5619 }
 0xc6c   :  { %v6513_v46 = vpop.eup %6512  ;;  %6528 = vrcp.f32 %v5404_v18  ;;  %v5552_v2 = vadd.f32 1.0, %v6511_v32  ;;  %v5505_v41 = vmul.f32 %v8488_v31, %v5487_v8 }
 0xc6d   :  { %v5553_v55 = vadd.f32 1.0, %v6513_v46  ;;  %6530 = vpow2.f32 %v6014_v25  ;;  %v5522_v47 = vadd.f32 %v8524_v42, %v5504_v3  ;;  %v5490_v36 = vadd.f32 %v8480_v52, %v5472_v45 }
 0xc6e   :  { %6532 = vrcp.f32 %v5552_v2  ;;  %v5523_v40 = vadd.f32 %v8524_v42, %v5505_v41 }
 0xc6f   :  { %v6515_v20 = vpop.eup %6514  ;;  %6534 = vrcp.f32 %v5553_v55  ;;  %v6018_v62 = vmul.f32 -1.442695, %v5522_v47  ;;  %v5508_v31 = vmul.f32 %v8491_v28, %v5490_v36 }
 0xc70   :  { %v6517_v22 = vpop.eup %6516  ;;  %6536 = vrcp.f32 %v5405_v11  ;;  %v5556_v6 = vadd.f32 1.0, %v6515_v20  ;;  %v6019_v61 = vmul.f32 -1.442695, %v5523_v40 }
 0xc71   :  { %v6519_v29 = vpop.eup %6518  ;;  %6538 = vpow2.f32 %v6015_v12  ;;  %v5455_v54 = vmul.f32 %v6517_v22, %v5431_v37  ;;  %v5526_v16 = vadd.f32 %v8538_v44, %v5508_v31 }
 0xc72   :  { %v6521_v26 = vpop.eup %6520  ;;  %6540 = vrcp.f32 %v5556_v6  ;;  %v5576_v38 = vmul.f32 %v6519_v29, %v8389_v57 }
 0xc73   :  { %v6523_v24 = vpop.eup %6522  ;;  %v5557_v58 = vadd.f32 1.0, %v6521_v26  ;;  %6542 = vpow2.f32 %v6018_v62  ;;  %v5473_v10 = vmul.f32 %v8476_v60, %v5455_v54  ;;  %v6022_v0 = vmul.f32 -1.442695, %v5526_v16  ;;  %v5650_v26 = vpop.permute.xlu1 %5649 }
 0xc74   :  { %v6525_v33 = vpop.eup %6524  ;;  %6544 = vpow2.f32 %v6019_v61  ;;  %v5577_v15 = vmul.f32 %v6523_v24, %v8387_v4  ;;  %v5731_v24 = vadd.f32 %v8457_v1, %v5650_v26 }
 0xc75   :  { %v6527_v42 = vpop.eup %6526  ;;  %6546 = vrcp.f32 %v5557_v58  ;;  %v5491_v21 = vadd.f32 %v8480_v52, %v5473_v10  ;;  %v5402_v25 = vadd.f32 1.0, %v6525_v33  ;;  %v5594_v52 = vmul.f32 %v8571_v13, %v5576_v38 }
 0xc76   :  { %v6529_v18 = vpop.eup %6528  ;;  %6548 = vpow2.f32 %v6022_v0  ;;  %v5403_v23 = vadd.f32 1.0, %v6527_v42  ;;  %v5595_v45 = vmul.f32 %v8571_v13, %v5577_v15  ;;  %v5733_v0 = vadd.f32 %v8460_v48, %v5650_v26 }
 0xc77   :  { %v6531_v49 = vpop.eup %6530  ;;  %v5509_v17 = vmul.f32 %v8491_v28, %v5491_v21  ;;  %v5580_v46 = vmul.f32 %v6529_v18, %v8399_v51  ;;  %v8596_v28 = vpop.permute.xlu0 %5644  ;;  %6550 = vrcp.f32 %v5402_v25 }
 0xc78   :  { %v6533_v60 = vpop.eup %6532  ;;  %v5406_v55 = vadd.f32 1.0, %v6531_v49  ;;  %6552 = vrcp.f32 %v5403_v23 }
 0xc79   :  { %v6535_v50 = vpop.eup %6534  ;;  %v5604_v32 = vmul.f32 %v6533_v60, %v8389_v57  ;;  %v5527_v11 = vadd.f32 %v8538_v44, %v5509_v17  ;;  %v5725_v44 = vadd.f32 %v8451_v30, %v8596_v28  ;;  %v5598_v22 = vmul.f32 %v8581_v63, %v5580_v46 }
 0xc7a   :  { %v6537_v43 = vpop.eup %6536  ;;  %v5605_v2 = vmul.f32 %v6535_v50, %v8387_v4  ;;  %v5727_v4 = vadd.f32 %v8454_v53, %v8596_v28 }
 0xc7b   :  { %v6539_v12 = vpop.eup %6538  ;;  %v5622_v8 = vmul.f32 %v8583_v14, %v5604_v32  ;;  %v6023_v3 = vmul.f32 -1.442695, %v5527_v11  ;;  %v5581_v6 = vmul.f32 %v6537_v43, %v8397_v39 }
 0xc7c   :  { %v6541_v57 = vpop.eup %6540  ;;  %v5623_v41 = vmul.f32 %v8583_v14, %v5605_v2  ;;  %v5407_v33 = vadd.f32 1.0, %v6539_v12 }
 0xc7d   :  { %v6543_v20 = vpop.eup %6542  ;;  %v5630_v37 = vadd.f32 %v5622_v8, %v5594_v52  ;;  %v5608_v47 = vmul.f32 %v6541_v57, %v8399_v51  ;;  %6554 = vpow2.f32 %v6023_v3  ;;  %v5599_v16 = vmul.f32 %v8581_v63, %v5581_v6 }
 0xc7e   :  { %v6545_v36 = vpop.eup %6544  ;;  %v5631_v40 = vadd.f32 %v5623_v41, %v5595_v45  ;;  %v5554_v30 = vadd.f32 1.0, %v6543_v20  ;;  %6556 = vrcp.f32 %v5406_v55  ;;  %v5802_v55 = vadd.f32 %v8536_v7, %v8596_v28 }
 0xc7f   :  { %v6547_v29 = vpop.eup %6546  ;;  %v5626_v62 = vmul.f32 %v8591_v56, %v5608_v47  ;;  %v5812_v31 = vadd.f32 %v5725_v44, %v5630_v37  ;;  %v5555_v54 = vadd.f32 1.0, %v6545_v36  ;;  %v5808_v7 = vadd.f32 %v8549_v27, %v5650_v26 }
 0xc80   :  { %v5609_v53 = vmul.f32 %v6547_v29, %v8397_v39  ;;  %6558 = vrcp.f32 %v5554_v30  ;;  %v5813_v61 = vadd.f32 %v5727_v4, %v5631_v40  ;;  %v6549_v51 = vpop.eup %6548  ;;  %v5810_v27 = vadd.f32 %v8554_v35, %v5650_v26 }
 0xc81   :  { %v5634_v58 = vadd.f32 %v5626_v62, %v5598_v22  ;;  %5820 = vst [vmem:[%s8679_s19] sm:$0xff] %v5812_v31  ;;  %6560 = vrcp.f32 %v5555_v54  ;;  %v5558_v39 = vadd.f32 1.0, %v6549_v51  ;;  %v6551_v21 = vpop.eup %6550 }
 0xc82   :  { %v5627_v10 = vmul.f32 %v8591_v56, %v5609_v53  ;;  %5821 = vst [vmem:[%s8679_s19 + $0x8] sm:$0xff] %v5813_v61  ;;  %v6553_v18 = vpop.eup %6552  ;;  %v5578_v60 = vmul.f32 %v6551_v21, %v8415_v34 }
 0xc83   :  { %v5816_v42 = vadd.f32 %v5731_v24, %v5634_v58  ;;  %6562 = vrcp.f32 %v5558_v39  ;;  %v5579_v15 = vmul.f32 %v6553_v18, %v8412_v5 }
 0xc84   :  { %v5635_v1 = vadd.f32 %v5627_v10, %v5599_v16  ;;  %6564 = vrcp.f32 %v5407_v33  ;;  %v5596_v11 = vmul.f32 %v8571_v13, %v5578_v60 }
 0xc85   :  { %5822 = vst [vmem:[%s8679_s19 + $0x10] sm:$0xff] %v5816_v42  ;;  %v5597_v2 = vmul.f32 %v8571_v13, %v5579_v15 }
 0xc86   :  { %v5817_v38 = vadd.f32 %v5733_v0, %v5635_v1 }
 0xc87   :  { %v6555_v49 = vpop.eup %6554 }
 0xc88   :  { %5823 = vst [vmem:[%s8679_s19 + $0x18] sm:$0xff] %v5817_v38  ;;  %v5559_v25 = vadd.f32 1.0, %v6555_v49  ;;  %v6557_v17 = vpop.eup %6556 }
 0xc89   :  { %v5582_v52 = vmul.f32 %v6557_v17, %v8422_v9 }
 0xc8a   :  { %v6559_v48 = vpop.eup %6558  ;;  %6566 = vrcp.f32 %v5559_v25 }
 0xc8b   :  { %v6561_v23 = vpop.eup %6560  ;;  %v5606_v50 = vmul.f32 %v6559_v48, %v8415_v34  ;;  %v5600_v45 = vmul.f32 %v8581_v63, %v5582_v52 }
 0xc8c   :  { %v5607_v32 = vmul.f32 %v6561_v23, %v8412_v5  ;;  %v5804_v5 = vadd.f32 %v8541_v19, %v8596_v28 }
 0xc8d   :  { %v5624_v43 = vmul.f32 %v8583_v14, %v5606_v50  ;;  %v6563_v46 = vpop.eup %6562 }
 0xc8e   :  { %v5625_v12 = vmul.f32 %v8583_v14, %v5607_v32  ;;  %v5610_v3 = vmul.f32 %v6563_v46, %v8422_v9  ;;  %v6565_v34 = vpop.eup %6564 }
 0xc8f   :  { %v5632_v8 = vadd.f32 %v5624_v43, %v5596_v11  ;;  %v5583_v9 = vmul.f32 %v6565_v34, %v8418_v59 }
 0xc90   :  { %v5633_v57 = vadd.f32 %v5625_v12, %v5597_v2  ;;  %v5628_v41 = vmul.f32 %v8591_v56, %v5610_v3 }
 0xc91   :  { %v5814_v44 = vadd.f32 %v5802_v55, %v5632_v8  ;;  %v5601_v4 = vmul.f32 %v8581_v63, %v5583_v9 }
 0xc92   :  { %v5815_v20 = vadd.f32 %v5804_v5, %v5633_v57  ;;  %v5636_v13 = vadd.f32 %v5628_v41, %v5600_v45 }
 0xc93   :  { %6028 = vst [vmem:[%s8679_s19 + $0x20] sm:$0xff] %v5814_v44 }
 0xc94   :  { %v6567_v14 = vpop.eup %6566  ;;  %6029 = vst [vmem:[%s8679_s19 + $0x28] sm:$0xff] %v5815_v20  ;;  %v5818_v19 = vadd.f32 %v5808_v7, %v5636_v13 }
 0xc95   :  { %v5611_v28 = vmul.f32 %v6567_v14, %v8418_v59 }
 0xc96   :  { %6030 = vst [vmem:[%s8679_s19 + $0x30] sm:$0xff] %v5818_v19 }
 0xc97   :  { %v5629_v37 = vmul.f32 %v8591_v56, %v5611_v28 }
 0xc99   :  { %v5637_v47 = vadd.f32 %v5629_v37, %v5601_v4 }
 0xc9b   :  { %v5819_v36 = vadd.f32 %v5810_v27, %v5637_v47 }
 0xc9d   :  { %6031 = vst [vmem:[%s8679_s19 + $0x38] sm:$0xff] %v5819_v36 }

</bundles_post_ra>
